<compile_context>
chip_gen: v7x
topology: tpu7x:2x2x1
jax: 0.10.0
libtpu: 0.0.40
codegen_flags: <defaults>
</compile_context>

<pallas_src>
import functools
import math

import jax
import jax.numpy as jnp
import numpy as np
from jax.experimental import pallas as pl
from jax.experimental.pallas import tpu as pltpu


def _axial_attention_kernel(q_ref, k_ref, v_ref, o_ref, m_sc, l_sc, acc_sc, *, scale):
    """One (batch-tile, kv-tile) step of online-softmax attention.

    q_ref:   (BT, S,  C)  queries for this batch tile (same block for every kv step)
    k_ref:   (BT, TK, C)  keys for this kv tile
    v_ref:   (BT, TK, C)  values for this kv tile
    o_ref:   (BT, S,  C)  output (written on the last kv step)
    m_sc/l_sc: (BT, S, 1) running max / normalizer (f32 scratch)
    acc_sc:  (BT, S, C)   running un-normalized output (f32 scratch)
    """
    kv = pl.program_id(1)

    @pl.when(kv == 0)
    def _():
        m_sc[...] = jnp.full(m_sc.shape, -jnp.inf, dtype=m_sc.dtype)
        l_sc[...] = jnp.zeros(l_sc.shape, dtype=l_sc.dtype)
        acc_sc[...] = jnp.zeros(acc_sc.shape, dtype=acc_sc.dtype)

    # Fold the 1/sqrt(C) scale into q (S*C multiplies instead of S*TK).
    q = q_ref[...] * scale
    k = k_ref[...]
    v = v_ref[...]

    # Scores: contract the channel axis of q and k directly (no k.T / XLU
    # transpose), batched over the BT rows of this batch tile; f32 accumulate.
    # TODO(synk): optionally cast q/k (and p) to bf16 on v6e/v7x for MXU
    # throughput; kept in the input dtype here to match reference numerics.
    s = jnp.einsum("bqc,bkc->bqk", q, k, preferred_element_type=jnp.float32)

    # Online softmax update (numerically stable, f32). No attention mask in
    # AxialAttention, so every row always has at least one valid key.
    m_prev = m_sc[...]
    m_new = jnp.maximum(m_prev, jnp.max(s, axis=-1, keepdims=True))
    alpha = jnp.exp(m_prev - m_new)
    p = jnp.exp(s - m_new)
    l_sc[...] = alpha * l_sc[...] + jnp.sum(p, axis=-1, keepdims=True)
    # Probabilities are cast to the value dtype for the PV matmul (mirrors the
    # PyTorch `attn_float.type_as(attn)` downcast); accumulation stays in f32.
    pv = jnp.einsum("bqk,bkc->bqc", p.astype(v.dtype), v,
                    preferred_element_type=jnp.float32)
    acc_sc[...] = alpha * acc_sc[...] + pv
    m_sc[...] = m_new

    @pl.when(kv == pl.num_programs(1) - 1)
    def _():
        inv_l = pl.reciprocal(l_sc[...], approx=True)   # EUP slot, ~free
        o_ref[...] = (acc_sc[...] * inv_l).astype(o_ref.dtype)


# Conservative per-step tile budget: fits the default scoped VMEM on every
# generation (v5e 16 MiB default, v6e/v7x 32 MiB) with double buffering.
_VMEM_TILE_BUDGET_BYTES = 16 * 1024 * 1024
_MAX_WHOLE_KV = 1024


def _choose_kv_tile(seq):
    """Whole-row kv for modest axial lengths, else a 128-multiple divisor."""
    if seq <= _MAX_WHOLE_KV:
        return seq
    for tk in (1024, 512, 256, 128):
        if seq % tk == 0:
            return tk
    # TODO(synk): pad ragged axial lengths instead of falling back to one tile.
    return seq


def _choose_batch_tile(batch, seq, tk, c, itemsize):
    """Largest divisor of `batch` whose per-step VMEM footprint fits the budget."""
    io_bytes = 2 * itemsize * (2 * seq * c + 2 * tk * c)   # q,o + k,v (double-buffered)
    scratch_bytes = 4 * (seq * c + 2 * seq)                # acc + m + l (f32)
    tmp_bytes = 2 * 4 * seq * tk                           # scores + probs temporaries (f32)
    per_row = io_bytes + scratch_bytes + tmp_bytes
    cap = max(1, _VMEM_TILE_BUDGET_BYTES // per_row)
    bt = 1
    for d in range(1, min(batch, cap) + 1):
        if batch % d == 0:
            bt = d
    return bt


def _attention_flat(qf, kf, vf):
    """softmax(q k^T / sqrt(C)) v over [batch, S, C] tensors (attention on S)."""
    batch, seq, c = qf.shape
    scale = 1.0 / math.sqrt(c)
    tk = _choose_kv_tile(seq)
    bt = _choose_batch_tile(batch, seq, tk, c, qf.dtype.itemsize)
    grid = (batch // bt, seq // tk)

    # Note: with C < 128 the output stores are lane-masked; padding C (4x HBM
    # bytes) or folding heads into lanes would change traffic / per-head
    # semantics, so the natural [*, S, C] layout is kept.
    kernel = functools.partial(_axial_attention_kernel, scale=scale)
    grid_spec = pltpu.PrefetchScalarGridSpec(
        num_scalar_prefetch=0,
        grid=grid,
        in_specs=[
            pl.BlockSpec((bt, seq, c), lambda b, kv: (b, 0, 0)),   # q: fixed over kv
            pl.BlockSpec((bt, tk, c), lambda b, kv: (b, kv, 0)),   # k: streamed
            pl.BlockSpec((bt, tk, c), lambda b, kv: (b, kv, 0)),   # v: streamed
        ],
        out_specs=pl.BlockSpec((bt, seq, c), lambda b, kv: (b, 0, 0)),
        scratch_shapes=[
            pltpu.VMEM((bt, seq, 1), jnp.float32),   # running max
            pltpu.VMEM((bt, seq, 1), jnp.float32),   # running normalizer
            pltpu.VMEM((bt, seq, c), jnp.float32),   # running output accumulator
        ],
    )
    return pl.pallas_call(
        kernel,
        out_shape=jax.ShapeDtypeStruct((batch, seq, c), qf.dtype),
        grid_spec=grid_spec,
        compiler_params=pltpu.CompilerParams(
            dimension_semantics=("parallel", "arbitrary"),
            vmem_limit_bytes=32 * 1024 * 1024,
        ),
    )(qf, kf, vf)


def axial_attention(q, k, v, *, axial_dim):
    """JAX/Pallas equivalent of AxialAttention(axial_dim).forward (eval mode).

    q, k, v: [b, h, d1, ..., dn, c]; attention runs over spatial dim `axial_dim`
    (0-indexed over d1..dn, exactly like the PyTorch constructor argument).
    """
    axis = axial_dim + 2                     # mirrors self.axial_dim = axial_dim + 2
    if axis >= q.ndim - 1:
        raise ValueError("axial dim does not match input shape")

    # shift_dim(x, axis, -2): move the axial dim next to the channel dim, then
    # flatten everything before it into a single batch axis.
    qm = jnp.moveaxis(q, axis, -2)
    km = jnp.moveaxis(k, axis, -2)
    vm = jnp.moveaxis(v, axis, -2)
    old_shape = vm.shape
    seq, c = old_shape[-2], old_shape[-1]
    batch = int(np.prod(old_shape[:-2]))

    # TODO(synk): attn_dropout is training-mode only; the eval path (p=0) is
    # implemented here (attention_mask / head_mask are unused by AxialAttention).
    out = _attention_flat(
        qm.reshape(batch, seq, c),
        km.reshape(batch, seq, c),
        vm.reshape(batch, seq, c),
    )
    out = out.reshape(old_shape)
    return jnp.moveaxis(out, -2, axis)       # shift_dim(out, -2, axial_dim)


def _reference(q, k, v, *, axial_dim):
    """Pure-JAX reference mirroring AxialAttention.forward."""
    axis = axial_dim + 2
    qm = jnp.moveaxis(q, axis, -2).astype(jnp.float32)
    km = jnp.moveaxis(k, axis, -2).astype(jnp.float32)
    vm = jnp.moveaxis(v, axis, -2).astype(jnp.float32)
    c = qm.shape[-1]
    attn = jnp.einsum("...qc,...kc->...qk", qm, km) / math.sqrt(c)
    attn = jax.nn.softmax(attn, axis=-1)
    out = jnp.einsum("...qk,...kc->...qc", attn, vm)
    return jnp.moveaxis(out, -2, axis).astype(q.dtype)


if __name__ == "__main__":
    # Module config: AxialAttention(axial_dim, attn_dropout=0.0), eval mode.
    # Input tokens: [b, h, d1, d2, c] = [2, 2, 8, 8, 32].
    b, h, d1, d2, c = 2, 2, 8, 8, 32
    key = jax.random.PRNGKey(0)
    kq, kk, kv = jax.random.split(key, 3)
    q = jax.random.normal(kq, (b, h, d1, d2, c), dtype=jnp.float32)
    k = jax.random.normal(kk, (b, h, d1, d2, c), dtype=jnp.float32)
    v = jax.random.normal(kv, (b, h, d1, d2, c), dtype=jnp.float32)

    # Tolerance covers the approximate (EUP) reciprocal and MXU matmul
    # precision differences vs the XLA einsum reference.
    for axial_dim in (0, 1):
        out = jax.block_until_ready(axial_attention(q, k, v, axial_dim=axial_dim))
        ref = _reference(q, k, v, axial_dim=axial_dim)
        np.testing.assert_allclose(np.asarray(out), np.asarray(ref),
                                   atol=2e-2, rtol=2e-2)

    print("KERNEL_OK")
</pallas_src>

<mosaic_0001>
module attributes {stable_mosaic.version = 11 : i64} {
  func.func @_axial_attention_kernel(%arg0: i32, %arg1: i32, %arg2: memref<32x8x32xf32, #tpu.memory_space<vmem>>, %arg3: memref<32x8x32xf32, #tpu.memory_space<vmem>>, %arg4: memref<32x8x32xf32, #tpu.memory_space<vmem>>, %arg5: memref<32x8x32xf32, #tpu.memory_space<vmem>>, %arg6: memref<32x8x1xf32, #tpu.memory_space<vmem>>, %arg7: memref<32x8x1xf32, #tpu.memory_space<vmem>>, %arg8: memref<32x8x32xf32, #tpu.memory_space<vmem>>) attributes {dimension_semantics = [#tpu.dimension_semantics<parallel>, #tpu.dimension_semantics<arbitrary>], iteration_bounds = array<i64: 1, 1>, scalar_prefetch = 0 : i64, scratch_operands = 3 : i64, tpu.core_type = #tpu.core_type<tc>, window_params = [{transform_indices = @transform_0, window_bounds = array<i64: 32, 8, 32>}, {transform_indices = @transform_1, window_bounds = array<i64: 32, 8, 32>}, {transform_indices = @transform_2, window_bounds = array<i64: 32, 8, 32>}, {transform_indices = @transform_3, window_bounds = array<i64: 32, 8, 32>}]} {
    %c0_i32 = arith.constant 0 : i32
    %0 = arith.cmpi eq, %arg1, %c0_i32 : i32
    %1 = arith.extui %0 : i1 to i32
    %c0_i32_0 = arith.constant 0 : i32
    %2 = arith.cmpi ne, %1, %c0_i32_0 : i32
    scf.if %2 {
      %cst_33 = arith.constant 0xFF800000 : f32
      %34 = vector.broadcast %cst_33 : f32 to vector<32x8x1xf32>
      %c0_34 = arith.constant 0 : index
      %c0_35 = arith.constant 0 : index
      %c0_36 = arith.constant 0 : index
      %35 = vector.load %arg6[%c0_34, %c0_35, %c0_36] : memref<32x8x1xf32, #tpu.memory_space<vmem>>, vector<32x8x1xf32>
      tpu.vector_store %arg6[%c0_34, %c0_35, %c0_36], %34 {strides = array<i32>} : memref<32x8x1xf32, #tpu.memory_space<vmem>>, vector<32x8x1xf32>,
      %cst_37 = arith.constant 0.000000e+00 : f32
      %36 = vector.broadcast %cst_37 : f32 to vector<32x8x1xf32>
      %c0_38 = arith.constant 0 : index
      %c0_39 = arith.constant 0 : index
      %c0_40 = arith.constant 0 : index
      %37 = vector.load %arg7[%c0_38, %c0_39, %c0_40] : memref<32x8x1xf32, #tpu.memory_space<vmem>>, vector<32x8x1xf32>
      tpu.vector_store %arg7[%c0_38, %c0_39, %c0_40], %36 {strides = array<i32>} : memref<32x8x1xf32, #tpu.memory_space<vmem>>, vector<32x8x1xf32>,
      %cst_41 = arith.constant 0.000000e+00 : f32
      %38 = vector.broadcast %cst_41 : f32 to vector<32x8x32xf32>
      %c0_42 = arith.constant 0 : index
      %c0_43 = arith.constant 0 : index
      %c0_44 = arith.constant 0 : index
      %39 = vector.load %arg8[%c0_42, %c0_43, %c0_44] : memref<32x8x32xf32, #tpu.memory_space<vmem>>, vector<32x8x32xf32>
      tpu.vector_store %arg8[%c0_42, %c0_43, %c0_44], %38 {strides = array<i32>} : memref<32x8x32xf32, #tpu.memory_space<vmem>>, vector<32x8x32xf32>,
    } else {
    }
    %c0 = arith.constant 0 : index
    %c0_1 = arith.constant 0 : index
    %c0_2 = arith.constant 0 : index
    %3 = vector.load %arg2[%c0, %c0_1, %c0_2] : memref<32x8x32xf32, #tpu.memory_space<vmem>>, vector<32x8x32xf32>
    %cst = arith.constant 0.176776692 : f32
    %4 = vector.broadcast %cst : f32 to vector<32x8x32xf32>
    %5 = arith.mulf %3, %4 : vector<32x8x32xf32>
    %c0_3 = arith.constant 0 : index
    %c0_4 = arith.constant 0 : index
    %c0_5 = arith.constant 0 : index
    %6 = vector.load %arg3[%c0_3, %c0_4, %c0_5] : memref<32x8x32xf32, #tpu.memory_space<vmem>>, vector<32x8x32xf32>
    %c0_6 = arith.constant 0 : index
    %c0_7 = arith.constant 0 : index
    %c0_8 = arith.constant 0 : index
    %7 = vector.load %arg4[%c0_6, %c0_7, %c0_8] : memref<32x8x32xf32, #tpu.memory_space<vmem>>, vector<32x8x32xf32>
    "tpu.trace_start"() <{level = 10 : i32, message = "bqc,bkc->bqk"}> : () -> ()
    %cst_9 = arith.constant dense<0.000000e+00> : vector<32x8x8xf32>
    %8 = tpu.matmul %5, %6, %cst_9 {dimension_numbers = #tpu.dot_dimension_numbers<[2], [2], [1], [1], [0, 0, 0, 1, 1, 1], [0], [0]>} : vector<32x8x32xf32>, vector<32x8x32xf32>, vector<32x8x8xf32> -> vector<32x8x8xf32>
    "tpu.trace_stop"() : () -> ()
    %c0_10 = arith.constant 0 : index
    %c0_11 = arith.constant 0 : index
    %c0_12 = arith.constant 0 : index
    %9 = vector.load %arg6[%c0_10, %c0_11, %c0_12] : memref<32x8x1xf32, #tpu.memory_space<vmem>>, vector<32x8x1xf32>
    %cst_13 = arith.constant dense<0xFF800000> : vector<32x8xf32>
    %10 = vector.multi_reduction <maximumf>, %8, %cst_13 [2] : vector<32x8x8xf32> to vector<32x8xf32>
    %11 = vector.shape_cast %10 : vector<32x8xf32> to vector<32x8x1xf32>
    %12 = arith.maximumf %9, %11 : vector<32x8x1xf32>
    %13 = arith.subf %9, %12 : vector<32x8x1xf32>
    %14 = math.exp %13 : vector<32x8x1xf32>
    %15 = vector.broadcast %12 : vector<32x8x1xf32> to vector<32x8x8xf32>
    %16 = arith.subf %8, %15 : vector<32x8x8xf32>
    %17 = math.exp %16 : vector<32x8x8xf32>
    %c0_14 = arith.constant 0 : index
    %c0_15 = arith.constant 0 : index
    %c0_16 = arith.constant 0 : index
    %18 = vector.load %arg7[%c0_14, %c0_15, %c0_16] : memref<32x8x1xf32, #tpu.memory_space<vmem>>, vector<32x8x1xf32>
    %19 = arith.mulf %14, %18 : vector<32x8x1xf32>
    %cst_17 = arith.constant dense<0.000000e+00> : vector<32x8xf32>
    %20 = vector.multi_reduction <add>, %17, %cst_17 [2] : vector<32x8x8xf32> to vector<32x8xf32>
    %21 = vector.shape_cast %20 : vector<32x8xf32> to vector<32x8x1xf32>
    %22 = arith.addf %19, %21 : vector<32x8x1xf32>
    %c0_18 = arith.constant 0 : index
    %c0_19 = arith.constant 0 : index
    %c0_20 = arith.constant 0 : index
    %23 = vector.load %arg7[%c0_18, %c0_19, %c0_20] : memref<32x8x1xf32, #tpu.memory_space<vmem>>, vector<32x8x1xf32>
    tpu.vector_store %arg7[%c0_18, %c0_19, %c0_20], %22 {strides = array<i32>} : memref<32x8x1xf32, #tpu.memory_space<vmem>>, vector<32x8x1xf32>,
    "tpu.trace_start"() <{level = 10 : i32, message = "bqk,bkc->bqc"}> : () -> ()
    %cst_21 = arith.constant dense<0.000000e+00> : vector<32x8x32xf32>
    %24 = tpu.matmul %17, %7, %cst_21 {dimension_numbers = #tpu.dot_dimension_numbers<[2], [1], [1], [2], [0, 0, 0, 1, 1, 2], [0], [0]>} : vector<32x8x8xf32>, vector<32x8x32xf32>, vector<32x8x32xf32> -> vector<32x8x32xf32>
    "tpu.trace_stop"() : () -> ()
    %c0_22 = arith.constant 0 : index
    %c0_23 = arith.constant 0 : index
    %c0_24 = arith.constant 0 : index
    %25 = vector.load %arg8[%c0_22, %c0_23, %c0_24] : memref<32x8x32xf32, #tpu.memory_space<vmem>>, vector<32x8x32xf32>
    %26 = vector.broadcast %14 : vector<32x8x1xf32> to vector<32x8x32xf32>
    %27 = arith.mulf %26, %25 : vector<32x8x32xf32>
    %28 = arith.addf %27, %24 : vector<32x8x32xf32>
    %c0_25 = arith.constant 0 : index
    %c0_26 = arith.constant 0 : index
    %c0_27 = arith.constant 0 : index
    %29 = vector.load %arg8[%c0_25, %c0_26, %c0_27] : memref<32x8x32xf32, #tpu.memory_space<vmem>>, vector<32x8x32xf32>
    tpu.vector_store %arg8[%c0_25, %c0_26, %c0_27], %28 {strides = array<i32>} : memref<32x8x32xf32, #tpu.memory_space<vmem>>, vector<32x8x32xf32>,
    %c0_28 = arith.constant 0 : index
    %c0_29 = arith.constant 0 : index
    %c0_30 = arith.constant 0 : index
    %30 = vector.load %arg6[%c0_28, %c0_29, %c0_30] : memref<32x8x1xf32, #tpu.memory_space<vmem>>, vector<32x8x1xf32>
    tpu.vector_store %arg6[%c0_28, %c0_29, %c0_30], %12 {strides = array<i32>} : memref<32x8x1xf32, #tpu.memory_space<vmem>>, vector<32x8x1xf32>,
    %c0_i32_31 = arith.constant 0 : i32
    %31 = arith.cmpi eq, %arg1, %c0_i32_31 : i32
    %32 = arith.extui %31 : i1 to i32
    %c0_i32_32 = arith.constant 0 : i32
    %33 = arith.cmpi ne, %32, %c0_i32_32 : i32
    scf.if %33 {
      %c0_33 = arith.constant 0 : index
      %c0_34 = arith.constant 0 : index
      %c0_35 = arith.constant 0 : index
      %34 = vector.load %arg7[%c0_33, %c0_34, %c0_35] : memref<32x8x1xf32, #tpu.memory_space<vmem>>, vector<32x8x1xf32>
      %35 = tpu.reciprocal %34 {approx = true} : vector<32x8x1xf32> -> vector<32x8x1xf32>
      %c0_36 = arith.constant 0 : index
      %c0_37 = arith.constant 0 : index
      %c0_38 = arith.constant 0 : index
      %36 = vector.load %arg8[%c0_36, %c0_37, %c0_38] : memref<32x8x32xf32, #tpu.memory_space<vmem>>, vector<32x8x32xf32>
      %37 = vector.broadcast %35 : vector<32x8x1xf32> to vector<32x8x32xf32>
      %38 = arith.mulf %36, %37 : vector<32x8x32xf32>
      %c0_39 = arith.constant 0 : index
      %c0_40 = arith.constant 0 : index
      %c0_41 = arith.constant 0 : index
      %39 = vector.load %arg5[%c0_39, %c0_40, %c0_41] : memref<32x8x32xf32, #tpu.memory_space<vmem>>, vector<32x8x32xf32>
      tpu.vector_store %arg5[%c0_39, %c0_40, %c0_41], %38 {strides = array<i32>} : memref<32x8x32xf32, #tpu.memory_space<vmem>>, vector<32x8x32xf32>,
    } else {
    }
    return
  }
  func.func @transform_0(%arg0: i32, %arg1: i32) -> (i32, i32, i32) {
    %c0_i32 = arith.constant 0 : i32
    %c0_i32_0 = arith.constant 0 : i32
    %c0_i32_1 = arith.constant 0 : i32
    return %arg0, %c0_i32, %c0_i32_0 : i32, i32, i32
  }
  func.func @transform_1(%arg0: i32, %arg1: i32) -> (i32, i32, i32) {
    %c0_i32 = arith.constant 0 : i32
    %c0_i32_0 = arith.constant 0 : i32
    return %arg0, %arg1, %c0_i32 : i32, i32, i32
  }
  func.func @transform_2(%arg0: i32, %arg1: i32) -> (i32, i32, i32) {
    %c0_i32 = arith.constant 0 : i32
    %c0_i32_0 = arith.constant 0 : i32
    return %arg0, %arg1, %c0_i32 : i32, i32, i32
  }
  func.func @transform_3(%arg0: i32, %arg1: i32) -> (i32, i32, i32) {
    %c0_i32 = arith.constant 0 : i32
    %c0_i32_0 = arith.constant 0 : i32
    %c0_i32_1 = arith.constant 0 : i32
    return %arg0, %c0_i32, %c0_i32_0 : i32, i32, i32
  }
}

</mosaic_0001>

<bundles_post_ra>
// kernel: tpu_custom_call.1
= control target key start
LH: loop header
LB: loop body
LE: loop exit
PB: predicated region body
PF: predicated region fallthrough
CT: control target
= control target key end

     0   :  { %8 = vsyncpa [#allocation6], 0  ;;  %s8785_s0 = inlined_call_operand.hbm [shape: f32[32,8,32], index: 0, kind: input, shape index: {}]   ;;  %s8786_s1 = inlined_call_operand.hbm [shape: f32[32,8,32], index: 1, kind: input, shape index: {}]   ;;  %s8787_s2 = inlined_call_operand.hbm [shape: f32[32,8,32], index: 2, kind: input, shape index: {}]   ;;  %s8788_s3 = inlined_call_operand.hbm [shape: f32[32,8,32], index: 3, kind: output, shape index: {}]  }
   0x1   :  { %9 = vsyncpa [#allocation9], 0 }
   0x2   :  { %10 = vsyncpa [#allocation7], 0  ;;  %s7296_s12 = smov [#allocation8]   ;;  %s7297_s14 = smov [#allocation5]  }
   0x3   :  { %s28_s13 = sshll.u32 %s7296_s12, 4  ;;  %s16_s15 = sshll.u32 %s7297_s14, 4  ;;  %s29_s13 = int_to_ptr.vmem [resolvable:$true] %s28_s13  ;;  %s7326_s15 = int_to_ptr.vmem [resolvable:$true] %s16_s15 }
   0x4   :  { %s7202_s18 = scalar_lea.hbm %s8786_s1, 4096 }
   0x5   :  { %p7203_p0 = scmp.ne.s32.totalorder %s8786_s1, %s7202_s18  ;;  %p7206_p1 = scmp.lt.u32.totalorder %s7202_s18, %s8786_s1 }
   0x7   :  { %p7208_p2 = pnand %p7206_p1, %p7203_p0 }
   0x9   :  { %7211 = shalt.err (!%p7208_p2)
}
   0xa   :  { %s7212_s23 = scalar_lea.vmem %s29_s13, 4096  ;;  %p7217_p4 = scmp.lt.s32.totalorder %s29_s13, %s29_s13 }
   0xb   :  { %p7213_p3 = scmp.ne.s32.totalorder %s29_s13, %s7212_s23  ;;  %p7218_p5 = scmp.lt.s32.totalorder %s7212_s23, %s7212_s23 }
   0xd   :  { %p7219_p6 = por %p7218_p5, %p7217_p4 }
   0xf   :  { %p7220_p7 = pnand %p7219_p6, %p7213_p3 }
  0x11   :  { %7223 = shalt.err (!%p7220_p7)
}
  0x12   :  { %s7298_s24 = smov 128   ;;  %s7299_s25 = smov 8  }
  0x13   :  { %34 = dma.hbm_to_vmem [thread:$0]  %s8786_s1, 4096, %s29_s13, [#allocation9], %s7298_s24, %s7298_s24, %s7299_s25  }
  0x14   :  { %s7224_s30 = scalar_lea.hbm %s8785_s0, 4096 }
  0x15   :  { %p7225_p8 = scmp.ne.s32.totalorder %s8785_s0, %s7224_s30  ;;  %p7228_p9 = scmp.lt.u32.totalorder %s7224_s30, %s8785_s0 }
  0x17   :  { %p7230_p10 = pnand %p7228_p9, %p7225_p8 }
  0x19   :  { %7233 = shalt.err (!%p7230_p10)
}
  0x1a   :  { %s7234_s8 = scalar_lea.vmem %s7326_s15, 4096  ;;  %p7239_p12 = scmp.lt.s32.totalorder %s7326_s15, %s7326_s15 }
  0x1b   :  { %p7235_p11 = scmp.ne.s32.totalorder %s7326_s15, %s7234_s8  ;;  %p7240_p13 = scmp.lt.s32.totalorder %s7234_s8, %s7234_s8 }
  0x1d   :  { %p7241_p0 = por %p7240_p13, %p7239_p12 }
  0x1f   :  { %p7242_p1 = pnand %p7241_p0, %p7235_p11 }
  0x21   :  { %7245 = shalt.err (!%p7242_p1)
}
  0x22   :  { %22 = dma.hbm_to_vmem [thread:$0]  %s8785_s0, 4096, %s7326_s15, [#allocation6], %s7298_s24, %s7298_s24, %s7299_s25  }
  0x23   :  { %s7300_s10 = smov [#allocation10]   ;;  %s7246_s14 = scalar_lea.hbm %s8787_s2, 4096 }
  0x24   :  { %s40_s11 = sshll.u32 %s7300_s10, 4  ;;  %p7247_p2 = scmp.ne.s32.totalorder %s8787_s2, %s7246_s14  ;;  %s41_s11 = int_to_ptr.vmem [resolvable:$true] %s40_s11 }
  0x25   :  { %p7250_p3 = scmp.lt.u32.totalorder %s7246_s14, %s8787_s2 }
  0x27   :  { %p7252_p4 = pnand %p7250_p3, %p7247_p2 }
  0x29   :  { %7255 = shalt.err (!%p7252_p4)
}
  0x2a   :  { %s7256_s20 = scalar_lea.vmem %s41_s11, 4096  ;;  %p7261_p6 = scmp.lt.s32.totalorder %s41_s11, %s41_s11 }
  0x2b   :  { %p7257_p5 = scmp.ne.s32.totalorder %s41_s11, %s7256_s20  ;;  %p7262_p7 = scmp.lt.s32.totalorder %s7256_s20, %s7256_s20 }
  0x2d   :  { %p7263_p8 = por %p7262_p7, %p7261_p6 }
  0x2f   :  { %p7264_p9 = pnand %p7263_p8, %p7257_p5 }
  0x31   :  { %7267 = shalt.err (!%p7264_p9)
}
  0x32   :  { %46 = dma.hbm_to_vmem [thread:$0]  %s8787_s2, 4096, %s41_s11, [#allocation9], %s7298_s24, %s7298_s24, %s7299_s25  }
  0x33   :  { %7290 = dma.done.wait [#allocation6], 4096  }
  0x34   :  { %7291 = vsyncadd [#allocation6], 4294963200 }
  0x35   :  { %7292 = dma.done.wait [#allocation9], 8192  }
  0x36   :  { %7293 = vsyncadd [#allocation9], 4294959104  ;;  %vm125_vm0 = vcmask 261120   ;;  %v8789_v0 = vmov 0.0   ;;  %vm7302_vm1 = vmmov 0   ;;  %v222_v1 = vld [vmem:[#allocation8] sm:$0xff] }
  0x37   :  { %6678 = vmatprep.subr.mxu0 %v8789_v0  ;;  %126 = vst.msk [vmem:[#allocation4] sm:$0xff] %vm125_vm0, %v8789_v0  ;;  %127 = vst.msk [vmem:[#allocation4 + $0x8] sm:$0xff] %vm125_vm0, %v8789_v0  ;;  %6680 = vmatprep.mubr.msk.f32.mxu0 %vm7302_vm1, %v8789_v0  ;;  %v158_v2 = vld [vmem:[#allocation5] sm:$0xff]  ;;  %v223_v3 = vld [vmem:[#allocation8 + $0x8] sm:$0xff]  ;;  %vm60_vm2 = vcmask 7168   ;;  %vm2751_vm3 = vcmask 64512  }
  0x38   :  { %128 = vst.msk [vmem:[#allocation4 + $0x10] sm:$0xff] %vm125_vm0, %v8789_v0  ;;  %129 = vst.msk [vmem:[#allocation4 + $0x18] sm:$0xff] %vm125_vm0, %v8789_v0  ;;  %6683 = vmatprep.subr.mxu1 %v8789_v0  ;;  %6685 = vmatprep.mubr.msk.f32.mxu1 %vm7302_vm1, %v8789_v0  ;;  %v190_v4 = vmul.f32 0.17677669, %v158_v2  ;;  %v159_v5 = vld [vmem:[#allocation5 + $0x8] sm:$0xff]  ;;  %v160_v6 = vld [vmem:[#allocation5 + $0x10] sm:$0xff] }
  0x39   :  { %130 = vst.msk [vmem:[#allocation4 + $0x20] sm:$0xff] %vm125_vm0, %v8789_v0  ;;  %131 = vst.msk [vmem:[#allocation4 + $0x28] sm:$0xff] %vm125_vm0, %v8789_v0  ;;  %6679 = vmatpush3.xpose.msk.msra.mxu0 %vm125_vm0, %v222_v1  ;;  %6684 = vmatpush3.xpose.msk.msra.mxu1 %vm125_vm0, %v223_v3  ;;  %v224_v7 = vld [vmem:[#allocation8 + $0x10] sm:$0xff]  ;;  %v191_v8 = vmul.f32 0.17677669, %v159_v5  ;;  %v161_v9 = vld [vmem:[#allocation5 + $0x18] sm:$0xff] }
  0x3a   :  { %132 = vst.msk [vmem:[#allocation4 + $0x30] sm:$0xff] %vm125_vm0, %v8789_v0  ;;  %133 = vst.msk [vmem:[#allocation4 + $0x38] sm:$0xff] %vm125_vm0, %v8789_v0  ;;  %6688 = vmatprep.subr.mxu0 %v8789_v0  ;;  %6693 = vmatprep.subr.mxu1 %v8789_v0  ;;  %v225_v10 = vld [vmem:[#allocation8 + $0x18] sm:$0xff]  ;;  %v192_v11 = vmul.f32 0.17677669, %v160_v6  ;;  %v162_v13 = vld [vmem:[#allocation5 + $0x20] sm:$0xff] }
  0x3b   :  { %134 = vst.msk [vmem:[#allocation4 + $0x40] sm:$0xff] %vm125_vm0, %v8789_v0  ;;  %135 = vst.msk [vmem:[#allocation4 + $0x48] sm:$0xff] %vm125_vm0, %v8789_v0  ;;  %v193_v12 = vmul.f32 0.17677669, %v161_v9  ;;  %v226_v14 = vld [vmem:[#allocation8 + $0x20] sm:$0xff]  ;;  %v163_v15 = vld [vmem:[#allocation5 + $0x28] sm:$0xff] }
  0x3c   :  { %136 = vst.msk [vmem:[#allocation4 + $0x50] sm:$0xff] %vm125_vm0, %v8789_v0  ;;  %137 = vst.msk [vmem:[#allocation4 + $0x58] sm:$0xff] %vm125_vm0, %v8789_v0  ;;  %6681 = vmatmul.mubr.msk.f32.vlgmr.msra.gmra.mrb[0].mxu0 %vm125_vm0, %v190_v4  ;;  %6686 = vmatmul.mubr.msk.f32.vlgmr.msra.gmra.mrb[0].mxu1 %vm125_vm0, %v191_v8  ;;  %v227_v16 = vld [vmem:[#allocation8 + $0x28] sm:$0xff]  ;;  %v194_v17 = vmul.f32 0.17677669, %v162_v13  ;;  %v164_v19 = vld [vmem:[#allocation5 + $0x30] sm:$0xff] }
  0x3d   :  { %138 = vst.msk [vmem:[#allocation4 + $0x60] sm:$0xff] %vm125_vm0, %v8789_v0  ;;  %139 = vst.msk [vmem:[#allocation4 + $0x68] sm:$0xff] %vm125_vm0, %v8789_v0  ;;  %6689 = vmatpush3.xpose.msk.msra.mxu0 %vm125_vm0, %v224_v7  ;;  %6690 = vmatprep.mubr.msk.f32.mxu0 %vm7302_vm1, %v8789_v0  ;;  %v195_v18 = vmul.f32 0.17677669, %v163_v15  ;;  %v165_v20 = vld [vmem:[#allocation5 + $0x38] sm:$0xff]  ;;  %v228_v21 = vld [vmem:[#allocation8 + $0x30] sm:$0xff] }
  0x3e   :  { %140 = vst.msk [vmem:[#allocation4 + $0x70] sm:$0xff] %vm125_vm0, %v8789_v0  ;;  %141 = vst.msk [vmem:[#allocation4 + $0x78] sm:$0xff] %vm125_vm0, %v8789_v0  ;;  %6694 = vmatpush3.xpose.msk.msra.mxu1 %vm125_vm0, %v225_v10  ;;  %6695 = vmatprep.mubr.msk.f32.mxu1 %vm7302_vm1, %v8789_v0  ;;  %v229_v22 = vld [vmem:[#allocation8 + $0x38] sm:$0xff]  ;;  %v196_v23 = vmul.f32 0.17677669, %v164_v19  ;;  %v166_v25 = vld [vmem:[#allocation5 + $0x40] sm:$0xff] }
  0x3f   :  { %142 = vst.msk [vmem:[#allocation4 + $0x80] sm:$0xff] %vm125_vm0, %v8789_v0  ;;  %143 = vst.msk [vmem:[#allocation4 + $0x88] sm:$0xff] %vm125_vm0, %v8789_v0  ;;  %6703 = vmatprep.subr.mxu1 %v8789_v0  ;;  %6698 = vmatprep.subr.mxu0 %v8789_v0  ;;  %v197_v24 = vmul.f32 0.17677669, %v165_v20  ;;  %v167_v26 = vld [vmem:[#allocation5 + $0x48] sm:$0xff]  ;;  %v230_v27 = vld [vmem:[#allocation8 + $0x40] sm:$0xff] }
  0x40   :  { %144 = vst.msk [vmem:[#allocation4 + $0x90] sm:$0xff] %vm125_vm0, %v8789_v0  ;;  %145 = vst.msk [vmem:[#allocation4 + $0x98] sm:$0xff] %vm125_vm0, %v8789_v0  ;;  %6691 = vmatmul.mubr.msk.f32.vlgmr.msra.gmra.mrb[2].mxu0 %vm125_vm0, %v192_v11  ;;  %v231_v28 = vld [vmem:[#allocation8 + $0x48] sm:$0xff]  ;;  %v198_v29 = vmul.f32 0.17677669, %v166_v25  ;;  %v168_v31 = vld [vmem:[#allocation5 + $0x50] sm:$0xff] }
  0x41   :  { %146 = vst.msk [vmem:[#allocation4 + $0xa0] sm:$0xff] %vm125_vm0, %v8789_v0  ;;  %147 = vst.msk [vmem:[#allocation4 + $0xa8] sm:$0xff] %vm125_vm0, %v8789_v0  ;;  %6696 = vmatmul.mubr.msk.f32.vlgmr.msra.gmra.mrb[2].mxu1 %vm125_vm0, %v193_v12  ;;  %6699 = vmatpush3.xpose.msk.msra.mxu0 %vm125_vm0, %v226_v14  ;;  %v199_v30 = vmul.f32 0.17677669, %v167_v26  ;;  %v169_v32 = vld [vmem:[#allocation5 + $0x58] sm:$0xff]  ;;  %v232_v33 = vld [vmem:[#allocation8 + $0x50] sm:$0xff] }
  0x42   :  { %148 = vst.msk [vmem:[#allocation4 + $0xb0] sm:$0xff] %vm125_vm0, %v8789_v0  ;;  %149 = vst.msk [vmem:[#allocation4 + $0xb8] sm:$0xff] %vm125_vm0, %v8789_v0  ;;  %6704 = vmatpush3.xpose.msk.msra.mxu1 %vm125_vm0, %v227_v16  ;;  %6705 = vmatprep.mubr.msk.f32.mxu1 %vm7302_vm1, %v8789_v0  ;;  %v233_v34 = vld [vmem:[#allocation8 + $0x58] sm:$0xff]  ;;  %v200_v35 = vmul.f32 0.17677669, %v168_v31  ;;  %v170_v37 = vld [vmem:[#allocation5 + $0x60] sm:$0xff] }
  0x43   :  { %150 = vst.msk [vmem:[#allocation4 + $0xc0] sm:$0xff] %vm125_vm0, %v8789_v0  ;;  %151 = vst.msk [vmem:[#allocation4 + $0xc8] sm:$0xff] %vm125_vm0, %v8789_v0  ;;  %6713 = vmatprep.subr.mxu1 %v8789_v0  ;;  %6700 = vmatprep.mubr.msk.f32.mxu0 %vm7302_vm1, %v8789_v0  ;;  %v201_v36 = vmul.f32 0.17677669, %v169_v32  ;;  %v171_v38 = vld [vmem:[#allocation5 + $0x68] sm:$0xff]  ;;  %v234_v39 = vld [vmem:[#allocation8 + $0x60] sm:$0xff] }
  0x44   :  { %152 = vst.msk [vmem:[#allocation4 + $0xd0] sm:$0xff] %vm125_vm0, %v8789_v0  ;;  %153 = vst.msk [vmem:[#allocation4 + $0xd8] sm:$0xff] %vm125_vm0, %v8789_v0  ;;  %6701 = vmatmul.mubr.msk.f32.vlgmr.msra.gmra.mrb[4].mxu0 %vm125_vm0, %v194_v17  ;;  %6708 = vmatprep.subr.mxu0 %v8789_v0  ;;  %v235_v40 = vld [vmem:[#allocation8 + $0x68] sm:$0xff]  ;;  %v202_v41 = vmul.f32 0.17677669, %v170_v37  ;;  %v172_v43 = vld [vmem:[#allocation5 + $0x70] sm:$0xff] }
  0x45   :  { %154 = vst.msk [vmem:[#allocation4 + $0xe0] sm:$0xff] %vm125_vm0, %v8789_v0  ;;  %155 = vst.msk [vmem:[#allocation4 + $0xe8] sm:$0xff] %vm125_vm0, %v8789_v0  ;;  %6706 = vmatmul.mubr.msk.f32.vlgmr.msra.gmra.mrb[4].mxu1 %vm125_vm0, %v195_v18  ;;  %6709 = vmatpush3.xpose.msk.msra.mxu0 %vm125_vm0, %v228_v21  ;;  %v203_v42 = vmul.f32 0.17677669, %v171_v38  ;;  %v173_v44 = vld [vmem:[#allocation5 + $0x78] sm:$0xff]  ;;  %v236_v45 = vld [vmem:[#allocation8 + $0x70] sm:$0xff] }
  0x46   :  { %156 = vst.msk [vmem:[#allocation4 + $0xf0] sm:$0xff] %vm125_vm0, %v8789_v0  ;;  %157 = vst.msk [vmem:[#allocation4 + $0xf8] sm:$0xff] %vm125_vm0, %v8789_v0  ;;  %6714 = vmatpush3.xpose.msk.msra.mxu1 %vm125_vm0, %v229_v22  ;;  %6715 = vmatprep.mubr.msk.f32.mxu1 %vm7302_vm1, %v8789_v0  ;;  %v237_v46 = vld [vmem:[#allocation8 + $0x78] sm:$0xff]  ;;  %v204_v47 = vmul.f32 0.17677669, %v172_v43  ;;  %v174_v49 = vld [vmem:[#allocation5 + $0x80] sm:$0xff] }
  0x47   :  { %6723 = vmatprep.subr.mxu1 %v8789_v0  ;;  %6710 = vmatprep.mubr.msk.f32.mxu0 %vm7302_vm1, %v8789_v0  ;;  %v205_v48 = vmul.f32 0.17677669, %v173_v44  ;;  %v175_v50 = vld [vmem:[#allocation5 + $0x88] sm:$0xff]  ;;  %v238_v51 = vld [vmem:[#allocation8 + $0x80] sm:$0xff]  ;;  %v206_v53 = vmul.f32 0.17677669, %v174_v49 }
  0x48   :  { %6711 = vmatmul.mubr.msk.f32.vlgmr.msra.gmra.mrb[6].mxu0 %vm125_vm0, %v196_v23  ;;  %6718 = vmatprep.subr.mxu0 %v8789_v0  ;;  %v239_v52 = vld [vmem:[#allocation8 + $0x88] sm:$0xff]  ;;  %v207_v54 = vmul.f32 0.17677669, %v175_v50  ;;  %v176_v55 = vld [vmem:[#allocation5 + $0x90] sm:$0xff]  ;;  %v177_v56 = vld [vmem:[#allocation5 + $0x98] sm:$0xff]  ;;  %93 = vst.msk [vmem:[#allocation3] sm:$0xff] %vm60_vm2, %v8789_v0 }
  0x49   :  { %6716 = vmatmul.mubr.msk.f32.vlgmr.msra.gmra.mrb[6].mxu1 %vm125_vm0, %v197_v24  ;;  %6719 = vmatpush3.xpose.msk.msra.mxu0 %vm125_vm0, %v230_v27  ;;  %v240_v57 = vld [vmem:[#allocation8 + $0x90] sm:$0xff]  ;;  %v241_v58 = vld [vmem:[#allocation8 + $0x98] sm:$0xff]  ;;  %v208_v59 = vmul.f32 0.17677669, %v176_v55  ;;  %v209_v60 = vmul.f32 0.17677669, %v177_v56 }
  0x4a   :  { %6724 = vmatpush3.xpose.msk.msra.mxu1 %vm125_vm0, %v231_v28  ;;  %6725 = vmatprep.mubr.msk.f32.mxu1 %vm7302_vm1, %v8789_v0  ;;  %v178_v61 = vld [vmem:[#allocation5 + $0xa0] sm:$0xff]  ;;  %v179_v62 = vld [vmem:[#allocation5 + $0xa8] sm:$0xff]  ;;  %v180_v4 = vld [vmem:[#allocation5 + $0xb0] sm:$0xff]  ;;  %94 = vst.msk [vmem:[#allocation3 + $0x8] sm:$0xff] %vm60_vm2, %v8789_v0  ;;  %s7305_s2 = smov [#allocation11]  }
  0x4b   :  { %6733 = vmatprep.subr.mxu1 %v8789_v0  ;;  %6720 = vmatprep.mubr.msk.f32.mxu0 %vm7302_vm1, %v8789_v0  ;;  %v242_v63 = vld [vmem:[#allocation8 + $0xa0] sm:$0xff]  ;;  %v243_v1 = vld [vmem:[#allocation8 + $0xa8] sm:$0xff]  ;;  %v210_v2 = vmul.f32 0.17677669, %v178_v61  ;;  %v211_v3 = vmul.f32 0.17677669, %v179_v62 }
  0x4c   :  { %6721 = vmatmul.mubr.msk.f32.vlgmr.msra.gmra.mrb[8].mxu0 %vm125_vm0, %v198_v29  ;;  %6728 = vmatprep.subr.mxu0 %v8789_v0  ;;  %v181_v5 = vld [vmem:[#allocation5 + $0xb8] sm:$0xff]  ;;  %v244_v6 = vld [vmem:[#allocation8 + $0xb0] sm:$0xff]  ;;  %v212_v8 = vmul.f32 0.17677669, %v180_v4  ;;  %v182_v10 = vld [vmem:[#allocation5 + $0xc0] sm:$0xff]  ;;  %95 = vst.msk [vmem:[#allocation3 + $0x10] sm:$0xff] %vm60_vm2, %v8789_v0 }
  0x4d   :  { %6726 = vmatmul.mubr.msk.f32.vlgmr.msra.gmra.mrb[8].mxu1 %vm125_vm0, %v199_v30  ;;  %6729 = vmatpush3.xpose.msk.msra.mxu0 %vm125_vm0, %v232_v33  ;;  %v245_v7 = vld [vmem:[#allocation8 + $0xb8] sm:$0xff]  ;;  %v213_v9 = vmul.f32 0.17677669, %v181_v5  ;;  %v183_v11 = vld [vmem:[#allocation5 + $0xc8] sm:$0xff]  ;;  %v246_v12 = vld [vmem:[#allocation8 + $0xc0] sm:$0xff]  ;;  %96 = vst.msk [vmem:[#allocation3 + $0x18] sm:$0xff] %vm60_vm2, %v8789_v0 }
  0x4e   :  { %6734 = vmatpush3.xpose.msk.msra.mxu1 %vm125_vm0, %v233_v34  ;;  %6735 = vmatprep.mubr.msk.f32.mxu1 %vm7302_vm1, %v8789_v0  ;;  %v247_v13 = vld [vmem:[#allocation8 + $0xc8] sm:$0xff]  ;;  %v214_v14 = vmul.f32 0.17677669, %v182_v10  ;;  %v215_v15 = vmul.f32 0.17677669, %v183_v11  ;;  %v184_v16 = vld [vmem:[#allocation5 + $0xd0] sm:$0xff] }
  0x4f   :  { %6743 = vmatprep.subr.mxu1 %v8789_v0  ;;  %6730 = vmatprep.mubr.msk.f32.mxu0 %vm7302_vm1, %v8789_v0  ;;  %v185_v17 = vld [vmem:[#allocation5 + $0xd8] sm:$0xff]  ;;  %v248_v18 = vld [vmem:[#allocation8 + $0xd0] sm:$0xff]  ;;  %v216_v20 = vmul.f32 0.17677669, %v184_v16  ;;  %v186_v22 = vld [vmem:[#allocation5 + $0xe0] sm:$0xff]  ;;  %v7303_v34 = vmov -inf  }
  0x50   :  { %6731 = vmatmul.mubr.msk.f32.vlgmr.msra.gmra.mrb[10].mxu0 %vm125_vm0, %v200_v35  ;;  %6738 = vmatprep.subr.mxu0 %v8789_v0  ;;  %v249_v19 = vld [vmem:[#allocation8 + $0xd8] sm:$0xff]  ;;  %v217_v21 = vmul.f32 0.17677669, %v185_v17  ;;  %v187_v23 = vld [vmem:[#allocation5 + $0xe8] sm:$0xff]  ;;  %v250_v24 = vld [vmem:[#allocation8 + $0xe0] sm:$0xff]  ;;  %61 = vst.msk [vmem:[#allocation2] sm:$0xff] %vm60_vm2, %v7303_v34 }
  0x51   :  { %6736 = vmatmul.mubr.msk.f32.vlgmr.msra.gmra.mrb[10].mxu1 %vm125_vm0, %v201_v36  ;;  %6739 = vmatpush3.xpose.msk.msra.mxu0 %vm125_vm0, %v234_v39  ;;  %v251_v25 = vld [vmem:[#allocation8 + $0xe8] sm:$0xff]  ;;  %v218_v26 = vmul.f32 0.17677669, %v186_v22  ;;  %v219_v27 = vmul.f32 0.17677669, %v187_v23  ;;  %v188_v28 = vld [vmem:[#allocation5 + $0xf0] sm:$0xff] }
  0x52   :  { %6744 = vmatpush3.xpose.msk.msra.mxu1 %vm125_vm0, %v235_v40  ;;  %6745 = vmatprep.mubr.msk.f32.mxu1 %vm7302_vm1, %v8789_v0  ;;  %v189_v29 = vld [vmem:[#allocation5 + $0xf8] sm:$0xff]  ;;  %v252_v30 = vld [vmem:[#allocation8 + $0xf0] sm:$0xff]  ;;  %v220_v32 = vmul.f32 0.17677669, %v188_v28  ;;  %62 = vst.msk [vmem:[#allocation2 + $0x8] sm:$0xff] %vm60_vm2, %v7303_v34  ;;  %63 = vst.msk [vmem:[#allocation2 + $0x10] sm:$0xff] %vm60_vm2, %v7303_v34 }
  0x53   :  { %6753 = vmatprep.subr.mxu1 %v8789_v0  ;;  %6740 = vmatprep.mubr.msk.f32.mxu0 %vm7302_vm1, %v8789_v0  ;;  %v253_v31 = vld [vmem:[#allocation8 + $0xf8] sm:$0xff]  ;;  %v221_v33 = vmul.f32 0.17677669, %v189_v29  ;;  %64 = vst.msk [vmem:[#allocation2 + $0x18] sm:$0xff] %vm60_vm2, %v7303_v34  ;;  %65 = vst.msk [vmem:[#allocation2 + $0x20] sm:$0xff] %vm60_vm2, %v7303_v34  ;;  %s6441_s21 = sshll.u32 %s7305_s2, 4  ;;  %s6442_s21 = int_to_ptr.vmem [resolvable:$true] %s6441_s21 }
  0x54   :  { %6741 = vmatmul.mubr.msk.f32.vlgmr.msra.gmra.mrb[12].mxu0 %vm125_vm0, %v202_v41  ;;  %6748 = vmatprep.subr.mxu0 %v8789_v0  ;;  %66 = vst.msk [vmem:[#allocation2 + $0x28] sm:$0xff] %vm60_vm2, %v7303_v34  ;;  %67 = vst.msk [vmem:[#allocation2 + $0x30] sm:$0xff] %vm60_vm2, %v7303_v34  ;;  %s7268_s22 = scalar_lea.vmem %s6442_s21, 4096  ;;  %p7273_p11 = scmp.lt.s32.totalorder %s6442_s21, %s6442_s21 }
  0x55   :  { %6746 = vmatmul.mubr.msk.f32.vlgmr.msra.gmra.mrb[12].mxu1 %vm125_vm0, %v203_v42  ;;  %6749 = vmatpush3.xpose.msk.msra.mxu0 %vm125_vm0, %v236_v45  ;;  %68 = vst.msk [vmem:[#allocation2 + $0x38] sm:$0xff] %vm60_vm2, %v7303_v34  ;;  %69 = vst.msk [vmem:[#allocation2 + $0x40] sm:$0xff] %vm60_vm2, %v7303_v34  ;;  %p7269_p10 = scmp.ne.s32.totalorder %s6442_s21, %s7268_s22  ;;  %p7274_p12 = scmp.lt.s32.totalorder %s7268_s22, %s7268_s22 }
  0x56   :  { %6754 = vmatpush3.xpose.msk.msra.mxu1 %vm125_vm0, %v237_v46  ;;  %6755 = vmatprep.mubr.msk.f32.mxu1 %vm7302_vm1, %v8789_v0  ;;  %70 = vst.msk [vmem:[#allocation2 + $0x48] sm:$0xff] %vm60_vm2, %v7303_v34  ;;  %71 = vst.msk [vmem:[#allocation2 + $0x50] sm:$0xff] %vm60_vm2, %v7303_v34 }
  0x57   :  { %6763 = vmatprep.subr.mxu1 %v8789_v0  ;;  %6750 = vmatprep.mubr.msk.f32.mxu0 %vm7302_vm1, %v8789_v0  ;;  %72 = vst.msk [vmem:[#allocation2 + $0x58] sm:$0xff] %vm60_vm2, %v7303_v34  ;;  %73 = vst.msk [vmem:[#allocation2 + $0x60] sm:$0xff] %vm60_vm2, %v7303_v34  ;;  %p7275_p13 = por %p7274_p12, %p7273_p11 }
  0x58   :  { %6751 = vmatmul.mubr.msk.f32.vlgmr.msra.gmra.mrb[14].mxu0 %vm125_vm0, %v204_v47  ;;  %6758 = vmatprep.subr.mxu0 %v8789_v0  ;;  %74 = vst.msk [vmem:[#allocation2 + $0x68] sm:$0xff] %vm60_vm2, %v7303_v34  ;;  %75 = vst.msk [vmem:[#allocation2 + $0x70] sm:$0xff] %vm60_vm2, %v7303_v34 }
  0x59   :  { %6756 = vmatmul.mubr.msk.f32.vlgmr.msra.gmra.mrb[14].mxu1 %vm125_vm0, %v205_v48  ;;  %6759 = vmatpush3.xpose.msk.msra.mxu0 %vm125_vm0, %v238_v51  ;;  %76 = vst.msk [vmem:[#allocation2 + $0x78] sm:$0xff] %vm60_vm2, %v7303_v34  ;;  %77 = vst.msk [vmem:[#allocation2 + $0x80] sm:$0xff] %vm60_vm2, %v7303_v34  ;;  %p7276_p0 = pnand %p7275_p13, %p7269_p10 }
  0x5a   :  { %6764 = vmatpush3.xpose.msk.msra.mxu1 %vm125_vm0, %v239_v52  ;;  %6765 = vmatprep.mubr.msk.f32.mxu1 %vm7302_vm1, %v8789_v0  ;;  %78 = vst.msk [vmem:[#allocation2 + $0x88] sm:$0xff] %vm60_vm2, %v7303_v34  ;;  %79 = vst.msk [vmem:[#allocation2 + $0x90] sm:$0xff] %vm60_vm2, %v7303_v34 }
  0x5b   :  { %6773 = vmatprep.subr.mxu1 %v8789_v0  ;;  %6760 = vmatprep.mubr.msk.f32.mxu0 %vm7302_vm1, %v8789_v0  ;;  %80 = vst.msk [vmem:[#allocation2 + $0x98] sm:$0xff] %vm60_vm2, %v7303_v34  ;;  %81 = vst.msk [vmem:[#allocation2 + $0xa0] sm:$0xff] %vm60_vm2, %v7303_v34 }
  0x5c   :  { %6761 = vmatmul.mubr.msk.f32.vlgmr.msra.gmra.mrb[16].mxu0 %vm125_vm0, %v206_v53  ;;  %6768 = vmatprep.subr.mxu0 %v8789_v0  ;;  %82 = vst.msk [vmem:[#allocation2 + $0xa8] sm:$0xff] %vm60_vm2, %v7303_v34  ;;  %83 = vst.msk [vmem:[#allocation2 + $0xb0] sm:$0xff] %vm60_vm2, %v7303_v34 }
  0x5d   :  { %6766 = vmatmul.mubr.msk.f32.vlgmr.msra.gmra.mrb[16].mxu1 %vm125_vm0, %v207_v54  ;;  %6769 = vmatpush3.xpose.msk.msra.mxu0 %vm125_vm0, %v240_v57  ;;  %84 = vst.msk [vmem:[#allocation2 + $0xb8] sm:$0xff] %vm60_vm2, %v7303_v34  ;;  %85 = vst.msk [vmem:[#allocation2 + $0xc0] sm:$0xff] %vm60_vm2, %v7303_v34 }
  0x5e   :  { %6774 = vmatpush3.xpose.msk.msra.mxu1 %vm125_vm0, %v241_v58  ;;  %6775 = vmatprep.mubr.msk.f32.mxu1 %vm7302_vm1, %v8789_v0  ;;  %86 = vst.msk [vmem:[#allocation2 + $0xc8] sm:$0xff] %vm60_vm2, %v7303_v34  ;;  %87 = vst.msk [vmem:[#allocation2 + $0xd0] sm:$0xff] %vm60_vm2, %v7303_v34 }
  0x5f   :  { %6783 = vmatprep.subr.mxu1 %v8789_v0  ;;  %6770 = vmatprep.mubr.msk.f32.mxu0 %vm7302_vm1, %v8789_v0  ;;  %88 = vst.msk [vmem:[#allocation2 + $0xd8] sm:$0xff] %vm60_vm2, %v7303_v34  ;;  %89 = vst.msk [vmem:[#allocation2 + $0xe0] sm:$0xff] %vm60_vm2, %v7303_v34 }
  0x60   :  { %6771 = vmatmul.mubr.msk.f32.vlgmr.msra.gmra.mrb[18].mxu0 %vm125_vm0, %v208_v59  ;;  %6778 = vmatprep.subr.mxu0 %v8789_v0  ;;  %90 = vst.msk [vmem:[#allocation2 + $0xe8] sm:$0xff] %vm60_vm2, %v7303_v34  ;;  %91 = vst.msk [vmem:[#allocation2 + $0xf0] sm:$0xff] %vm60_vm2, %v7303_v34 }
  0x61   :  { %6776 = vmatmul.mubr.msk.f32.vlgmr.msra.gmra.mrb[18].mxu1 %vm125_vm0, %v209_v60  ;;  %6779 = vmatpush3.xpose.msk.msra.mxu0 %vm125_vm0, %v242_v63  ;;  %92 = vst.msk [vmem:[#allocation2 + $0xf8] sm:$0xff] %vm60_vm2, %v7303_v34  ;;  %97 = vst.msk [vmem:[#allocation3 + $0x20] sm:$0xff] %vm60_vm2, %v8789_v0  ;;  %v7304_v63 = vmov 0  }
  0x62   :  { %6784 = vmatpush3.xpose.msk.msra.mxu1 %vm125_vm0, %v243_v1  ;;  %6785 = vmatprep.mubr.msk.f32.mxu1 %vm7302_vm1, %v8789_v0  ;;  %98 = vst.msk [vmem:[#allocation3 + $0x28] sm:$0xff] %vm60_vm2, %v8789_v0  ;;  %99 = vst.msk [vmem:[#allocation3 + $0x30] sm:$0xff] %vm60_vm2, %v8789_v0 }
  0x63   :  { %6793 = vmatprep.subr.mxu1 %v8789_v0  ;;  %6780 = vmatprep.mubr.msk.f32.mxu0 %vm7302_vm1, %v8789_v0  ;;  %100 = vst.msk [vmem:[#allocation3 + $0x38] sm:$0xff] %vm60_vm2, %v8789_v0  ;;  %101 = vst.msk [vmem:[#allocation3 + $0x40] sm:$0xff] %vm60_vm2, %v8789_v0 }
  0x64   :  { %6781 = vmatmul.mubr.msk.f32.vlgmr.msra.gmra.mrb[20].mxu0 %vm125_vm0, %v210_v2  ;;  %6788 = vmatprep.subr.mxu0 %v8789_v0  ;;  %102 = vst.msk [vmem:[#allocation3 + $0x48] sm:$0xff] %vm60_vm2, %v8789_v0  ;;  %103 = vst.msk [vmem:[#allocation3 + $0x50] sm:$0xff] %vm60_vm2, %v8789_v0 }
  0x65   :  { %6786 = vmatmul.mubr.msk.f32.vlgmr.msra.gmra.mrb[20].mxu1 %vm125_vm0, %v211_v3  ;;  %6789 = vmatpush3.xpose.msk.msra.mxu0 %vm125_vm0, %v244_v6  ;;  %104 = vst.msk [vmem:[#allocation3 + $0x58] sm:$0xff] %vm60_vm2, %v8789_v0  ;;  %105 = vst.msk [vmem:[#allocation3 + $0x60] sm:$0xff] %vm60_vm2, %v8789_v0 }
  0x66   :  { %6794 = vmatpush3.xpose.msk.msra.mxu1 %vm125_vm0, %v245_v7  ;;  %6795 = vmatprep.mubr.msk.f32.mxu1 %vm7302_vm1, %v8789_v0  ;;  %106 = vst.msk [vmem:[#allocation3 + $0x68] sm:$0xff] %vm60_vm2, %v8789_v0  ;;  %107 = vst.msk [vmem:[#allocation3 + $0x70] sm:$0xff] %vm60_vm2, %v8789_v0 }
  0x67   :  { %6803 = vmatprep.subr.mxu1 %v8789_v0  ;;  %6790 = vmatprep.mubr.msk.f32.mxu0 %vm7302_vm1, %v8789_v0  ;;  %108 = vst.msk [vmem:[#allocation3 + $0x78] sm:$0xff] %vm60_vm2, %v8789_v0  ;;  %109 = vst.msk [vmem:[#allocation3 + $0x80] sm:$0xff] %vm60_vm2, %v8789_v0 }
  0x68   :  { %6791 = vmatmul.mubr.msk.f32.vlgmr.msra.gmra.mrb[22].mxu0 %vm125_vm0, %v212_v8  ;;  %6798 = vmatprep.subr.mxu0 %v8789_v0  ;;  %110 = vst.msk [vmem:[#allocation3 + $0x88] sm:$0xff] %vm60_vm2, %v8789_v0  ;;  %111 = vst.msk [vmem:[#allocation3 + $0x90] sm:$0xff] %vm60_vm2, %v8789_v0 }
  0x69   :  { %6796 = vmatmul.mubr.msk.f32.vlgmr.msra.gmra.mrb[22].mxu1 %vm125_vm0, %v213_v9  ;;  %6799 = vmatpush3.xpose.msk.msra.mxu0 %vm125_vm0, %v246_v12  ;;  %112 = vst.msk [vmem:[#allocation3 + $0x98] sm:$0xff] %vm60_vm2, %v8789_v0  ;;  %113 = vst.msk [vmem:[#allocation3 + $0xa0] sm:$0xff] %vm60_vm2, %v8789_v0 }
  0x6a   :  { %6804 = vmatpush3.xpose.msk.msra.mxu1 %vm125_vm0, %v247_v13  ;;  %6805 = vmatprep.mubr.msk.f32.mxu1 %vm7302_vm1, %v8789_v0  ;;  %114 = vst.msk [vmem:[#allocation3 + $0xa8] sm:$0xff] %vm60_vm2, %v8789_v0  ;;  %115 = vst.msk [vmem:[#allocation3 + $0xb0] sm:$0xff] %vm60_vm2, %v8789_v0 }
  0x6b   :  { %6813 = vmatprep.subr.mxu1 %v8789_v0  ;;  %6800 = vmatprep.mubr.msk.f32.mxu0 %vm7302_vm1, %v8789_v0  ;;  %116 = vst.msk [vmem:[#allocation3 + $0xb8] sm:$0xff] %vm60_vm2, %v8789_v0  ;;  %117 = vst.msk [vmem:[#allocation3 + $0xc0] sm:$0xff] %vm60_vm2, %v8789_v0 }
  0x6c   :  { %6801 = vmatmul.mubr.msk.f32.vlgmr.msra.gmra.mrb[24].mxu0 %vm125_vm0, %v214_v14  ;;  %6808 = vmatprep.subr.mxu0 %v8789_v0  ;;  %118 = vst.msk [vmem:[#allocation3 + $0xc8] sm:$0xff] %vm60_vm2, %v8789_v0  ;;  %119 = vst.msk [vmem:[#allocation3 + $0xd0] sm:$0xff] %vm60_vm2, %v8789_v0 }
  0x6d   :  { %6806 = vmatmul.mubr.msk.f32.vlgmr.msra.gmra.mrb[24].mxu1 %vm125_vm0, %v215_v15  ;;  %6809 = vmatpush3.xpose.msk.msra.mxu0 %vm125_vm0, %v248_v18  ;;  %120 = vst.msk [vmem:[#allocation3 + $0xd8] sm:$0xff] %vm60_vm2, %v8789_v0  ;;  %121 = vst.msk [vmem:[#allocation3 + $0xe0] sm:$0xff] %vm60_vm2, %v8789_v0 }
  0x6e   :  { %6814 = vmatpush3.xpose.msk.msra.mxu1 %vm125_vm0, %v249_v19  ;;  %6815 = vmatprep.mubr.msk.f32.mxu1 %vm7302_vm1, %v8789_v0  ;;  %122 = vst.msk [vmem:[#allocation3 + $0xe8] sm:$0xff] %vm60_vm2, %v8789_v0  ;;  %123 = vst.msk [vmem:[#allocation3 + $0xf0] sm:$0xff] %vm60_vm2, %v8789_v0 }
  0x6f   :  { %6823 = vmatprep.subr.mxu1 %v8789_v0  ;;  %6810 = vmatprep.mubr.msk.f32.mxu0 %vm7302_vm1, %v8789_v0  ;;  %124 = vst.msk [vmem:[#allocation3 + $0xf8] sm:$0xff] %vm60_vm2, %v8789_v0 }
  0x70   :  { %6811 = vmatmul.mubr.msk.f32.vlgmr.msra.gmra.mrb[26].mxu0 %vm125_vm0, %v216_v20  ;;  %6818 = vmatprep.subr.mxu0 %v8789_v0 }
  0x71   :  { %6816 = vmatmul.mubr.msk.f32.vlgmr.msra.gmra.mrb[26].mxu1 %vm125_vm0, %v217_v21  ;;  %6819 = vmatpush3.xpose.msk.msra.mxu0 %vm125_vm0, %v250_v24 }
  0x72   :  { %6824 = vmatpush3.xpose.msk.msra.mxu1 %vm125_vm0, %v251_v25  ;;  %6825 = vmatprep.mubr.msk.f32.mxu1 %vm7302_vm1, %v8789_v0 }
  0x73   :  { %6833 = vmatprep.subr.mxu1 %v8789_v0  ;;  %6820 = vmatprep.mubr.msk.f32.mxu0 %vm7302_vm1, %v8789_v0 }
  0x74   :  { %6821 = vmatmul.mubr.msk.f32.vlgmr.msra.gmra.mrb[28].mxu0 %vm125_vm0, %v218_v26  ;;  %6828 = vmatprep.subr.mxu0 %v8789_v0 }
  0x75   :  { %6826 = vmatmul.mubr.msk.f32.vlgmr.msra.gmra.mrb[28].mxu1 %vm125_vm0, %v219_v27  ;;  %6829 = vmatpush3.xpose.msk.msra.mxu0 %vm125_vm0, %v252_v30 }
  0x76   :  { %6834 = vmatpush3.xpose.msk.msra.mxu1 %vm125_vm0, %v253_v31  ;;  %6835 = vmatprep.mubr.msk.f32.mxu1 %vm7302_vm1, %v8789_v0 }
  0x77   :  { %6830 = vmatprep.mubr.msk.f32.mxu0 %vm7302_vm1, %v8789_v0  ;;  %6838 = vmatprep.subr.mxu0 %v8789_v0 }
  0x78   :  { %6831 = vmatmul.mubr.msk.f32.vlgmr.msra.gmra.mrb[30].mxu0 %vm125_vm0, %v220_v32  ;;  %6843 = vmatprep.subr.mxu1 %v8789_v0 }
  0x79   :  { %6836 = vmatmul.mubr.msk.f32.vlgmr.msra.gmra.mrb[30].mxu1 %vm125_vm0, %v221_v33  ;;  %6840 = vmatprep.mubr.msk.f32.mxu0 %vm7302_vm1, %v8789_v0 }
  0x7a   :  { %6845 = vmatprep.mubr.msk.f32.mxu1 %vm7302_vm1, %v8789_v0  ;;  %7008 = vset.pattern.permute.xlu0 %v7304_v63 }
  0x7b   :  { %7009 = vset.pattern.permute.xlu1 %v7304_v63 }
 0x10f   :  { %v7704_v35 = vpop.f32.mrb[0].mxu0  ;;  %v7706_v36 = vpop.f32.mrb[0].mxu1 }
 0x110   :  { %8825 = vst [vmem:[#allocation15_spill] sm:$0xff] %v7704_v35  ;;  %8826 = vst [vmem:[#allocation16_spill] sm:$0xff] %v7706_v36  ;;  %v6682_v37 = vpop.f32.mrb[1].mxu0  ;;  %v2752_v38 = vsel %vm2751_vm3, %v7704_v35, -inf  ;;  %v6687_v39 = vpop.f32.mrb[1].mxu1  ;;  %v2755_v40 = vsel %vm2751_vm3, %v7706_v36, -inf }
 0x111   :  { %2753 = vmax.xlane.f32.xlu0 %v2752_v38  ;;  %v8086_v36 = vld [vmem:[#allocation2 + $0xe8] sm:$0xff]  ;;  %v8088_v35 = vld [vmem:[#allocation2 + $0xf0] sm:$0xff] }
 0x113   :  { %v7712_v41 = vpop.f32.mrb[2].mxu0 }
 0x114   :  { %8827 = vst [vmem:[#allocation17_spill] sm:$0xff] %v7712_v41  ;;  %v2758_v42 = vsel %vm2751_vm3, %v7712_v41, -inf  ;;  %v6692_v43 = vpop.f32.mrb[3].mxu0  ;;  %v7716_v44 = vpop.f32.mrb[2].mxu1 }
 0x115   :  { %8828 = vst [vmem:[#allocation18_spill] sm:$0xff] %v7716_v44  ;;  %2756 = vmax.xlane.f32.xlu0 %v2755_v40  ;;  %2759 = vmax.xlane.f32.xlu1 %v2758_v42  ;;  %v6697_v45 = vpop.f32.mrb[3].mxu1  ;;  %v2761_v46 = vsel %vm2751_vm3, %v7716_v44, -inf }
 0x117   :  { %v7720_v47 = vpop.f32.mrb[4].mxu0 }
 0x118   :  { %8829 = vst [vmem:[#allocation19_spill] sm:$0xff] %v7720_v47  ;;  %v7722_v48 = vpop.f32.mrb[4].mxu1  ;;  %v6702_v49 = vpop.f32.mrb[5].mxu0  ;;  %v2764_v50 = vsel %vm2751_vm3, %v7720_v47, -inf  ;;  %v8068_v47 = vld [vmem:[#allocation2 + $0xe0] sm:$0xff] }
 0x119   :  { %8830 = vst [vmem:[#allocation20_spill] sm:$0xff] %v7722_v48  ;;  %2762 = vmax.xlane.f32.xlu1 %v2761_v46  ;;  %v6707_v51 = vpop.f32.mrb[5].mxu1  ;;  %2765 = vmax.xlane.f32.xlu0 %v2764_v50  ;;  %v2767_v52 = vsel %vm2751_vm3, %v7722_v48, -inf  ;;  %v8066_v48 = vld [vmem:[#allocation2 + $0xd8] sm:$0xff] }
 0x11b   :  { %v7728_v53 = vpop.f32.mrb[6].mxu0 }
 0x11c   :  { %8831 = vst [vmem:[#allocation21_spill] sm:$0xff] %v7728_v53  ;;  %v7730_v54 = vpop.f32.mrb[6].mxu1  ;;  %v6712_v55 = vpop.f32.mrb[7].mxu0  ;;  %v2770_v56 = vsel %vm2751_vm3, %v7728_v53, -inf }
 0x11d   :  { %8832 = vst [vmem:[#allocation22_spill] sm:$0xff] %v7730_v54  ;;  %2768 = vmax.xlane.f32.xlu1 %v2767_v52  ;;  %v6717_v57 = vpop.f32.mrb[7].mxu1  ;;  %2771 = vmax.xlane.f32.xlu0 %v2770_v56  ;;  %v2773_v58 = vsel %vm2751_vm3, %v7730_v54, -inf }
 0x11f   :  { %v7736_v59 = vpop.f32.mrb[8].mxu0 }
 0x120   :  { %8833 = vst [vmem:[#allocation23_spill] sm:$0xff] %v7736_v59  ;;  %v7738_v60 = vpop.f32.mrb[8].mxu1  ;;  %v6722_v61 = vpop.f32.mrb[9].mxu0  ;;  %v2776_v62 = vsel %vm2751_vm3, %v7736_v59, -inf  ;;  %v8046_v59 = vld [vmem:[#allocation2 + $0xc8] sm:$0xff] }
 0x121   :  { %8834 = vst [vmem:[#allocation24_spill] sm:$0xff] %v7738_v60  ;;  %2774 = vmax.xlane.f32.xlu1 %v2773_v58  ;;  %v6727_v1 = vpop.f32.mrb[9].mxu1  ;;  %2777 = vmax.xlane.f32.xlu0 %v2776_v62  ;;  %v2779_v2 = vsel %vm2751_vm3, %v7738_v60, -inf }
 0x123   :  { %v7744_v3 = vpop.f32.mrb[10].mxu0 }
 0x124   :  { %8835 = vst [vmem:[#allocation25_spill] sm:$0xff] %v7744_v3  ;;  %v7746_v4 = vpop.f32.mrb[10].mxu1  ;;  %v6732_v5 = vpop.f32.mrb[11].mxu0  ;;  %v2782_v6 = vsel %vm2751_vm3, %v7744_v3, -inf }
 0x125   :  { %8836 = vst [vmem:[#allocation26_spill] sm:$0xff] %v7746_v4  ;;  %2780 = vmax.xlane.f32.xlu1 %v2779_v2  ;;  %v6737_v7 = vpop.f32.mrb[11].mxu1  ;;  %2783 = vmax.xlane.f32.xlu0 %v2782_v6  ;;  %v2785_v8 = vsel %vm2751_vm3, %v7746_v4, -inf  ;;  %v8048_v4 = vld [vmem:[#allocation2 + $0xd0] sm:$0xff] }
 0x126   :  { %8858 = vst [vmem:[#allocation48_spill] sm:$0xff] %v8048_v4 }
 0x127   :  { %v7752_v9 = vpop.f32.mrb[12].mxu0 }
 0x128   :  { %8837 = vst [vmem:[#allocation27_spill] sm:$0xff] %v7752_v9  ;;  %v7754_v10 = vpop.f32.mrb[12].mxu1  ;;  %v6742_v11 = vpop.f32.mrb[13].mxu0  ;;  %v2788_v12 = vsel %vm2751_vm3, %v7752_v9, -inf  ;;  %v8030_v9 = vld [vmem:[#allocation2 + $0xc0] sm:$0xff] }
 0x129   :  { %8838 = vst [vmem:[#allocation28_spill] sm:$0xff] %v7754_v10  ;;  %2786 = vmax.xlane.f32.xlu1 %v2785_v8  ;;  %v6747_v13 = vpop.f32.mrb[13].mxu1  ;;  %2789 = vmax.xlane.f32.xlu0 %v2788_v12  ;;  %v2791_v14 = vsel %vm2751_vm3, %v7754_v10, -inf  ;;  %8857 = vst [vmem:[#allocation47_spill] sm:$0xff] %v8030_v9 }
 0x12b   :  { %v7760_v15 = vpop.f32.mrb[14].mxu0 }
 0x12c   :  { %8839 = vst [vmem:[#allocation29_spill] sm:$0xff] %v7760_v15  ;;  %v7762_v16 = vpop.f32.mrb[14].mxu1  ;;  %v6752_v17 = vpop.f32.mrb[15].mxu0  ;;  %v2794_v18 = vsel %vm2751_vm3, %v7760_v15, -inf }
 0x12d   :  { %8840 = vst [vmem:[#allocation30_spill] sm:$0xff] %v7762_v16  ;;  %2792 = vmax.xlane.f32.xlu1 %v2791_v14  ;;  %v6757_v19 = vpop.f32.mrb[15].mxu1  ;;  %2795 = vmax.xlane.f32.xlu0 %v2794_v18  ;;  %v2797_v20 = vsel %vm2751_vm3, %v7762_v16, -inf  ;;  %v8028_v16 = vld [vmem:[#allocation2 + $0xb8] sm:$0xff] }
 0x12f   :  { %v7768_v21 = vpop.f32.mrb[16].mxu0 }
 0x130   :  { %8841 = vst [vmem:[#allocation31_spill] sm:$0xff] %v7768_v21  ;;  %v7770_v22 = vpop.f32.mrb[16].mxu1  ;;  %v6762_v23 = vpop.f32.mrb[17].mxu0  ;;  %v2800_v24 = vsel %vm2751_vm3, %v7768_v21, -inf  ;;  %v8012_v21 = vld [vmem:[#allocation2 + $0xb0] sm:$0xff] }
 0x131   :  { %8842 = vst [vmem:[#allocation32_spill] sm:$0xff] %v7770_v22  ;;  %2798 = vmax.xlane.f32.xlu1 %v2797_v20  ;;  %v6767_v25 = vpop.f32.mrb[17].mxu1  ;;  %2801 = vmax.xlane.f32.xlu0 %v2800_v24  ;;  %v2803_v26 = vsel %vm2751_vm3, %v7770_v22, -inf  ;;  %v7832_v24 = vld [vmem:[#allocation2] sm:$0xff] }
 0x133   :  { %v7776_v27 = vpop.f32.mrb[18].mxu0 }
 0x134   :  { %8843 = vst [vmem:[#allocation33_spill] sm:$0xff] %v7776_v27  ;;  %v7778_v28 = vpop.f32.mrb[18].mxu1  ;;  %v6772_v29 = vpop.f32.mrb[19].mxu0  ;;  %v2806_v30 = vsel %vm2751_vm3, %v7776_v27, -inf }
 0x135   :  { %8844 = vst [vmem:[#allocation34_spill] sm:$0xff] %v7778_v28  ;;  %2804 = vmax.xlane.f32.xlu1 %v2803_v26  ;;  %v6777_v31 = vpop.f32.mrb[19].mxu1  ;;  %2807 = vmax.xlane.f32.xlu0 %v2806_v30  ;;  %v2809_v32 = vsel %vm2751_vm3, %v7778_v28, -inf  ;;  %v7837_v29 = vld [vmem:[#allocation2 + $0x8] sm:$0xff]  ;;  %v7839_v30 = vld [vmem:[#allocation2 + $0x10] sm:$0xff] }
 0x136   :  { %v8010_v28 = vld [vmem:[#allocation2 + $0xa8] sm:$0xff] }
 0x137   :  { %v7784_v33 = vpop.f32.mrb[20].mxu0 }
 0x138   :  { %8845 = vst [vmem:[#allocation35_spill] sm:$0xff] %v7784_v33  ;;  %v7786_v34 = vpop.f32.mrb[20].mxu1  ;;  %v6782_v37 = vpop.f32.mrb[21].mxu0  ;;  %v2812_v38 = vsel %vm2751_vm3, %v7784_v33, -inf }
 0x139   :  { %8846 = vst [vmem:[#allocation36_spill] sm:$0xff] %v7786_v34  ;;  %2810 = vmax.xlane.f32.xlu1 %v2809_v32  ;;  %v6787_v39 = vpop.f32.mrb[21].mxu1  ;;  %2813 = vmax.xlane.f32.xlu0 %v2812_v38  ;;  %v2815_v40 = vsel %vm2751_vm3, %v7786_v34, -inf  ;;  %v7994_v34 = vld [vmem:[#allocation2 + $0xa0] sm:$0xff] }
 0x13a   :  { %v7850_v39 = vld [vmem:[#allocation2 + $0x18] sm:$0xff] }
 0x13b   :  { %v7792_v42 = vpop.f32.mrb[22].mxu0 }
 0x13c   :  { %8847 = vst [vmem:[#allocation37_spill] sm:$0xff] %v7792_v42  ;;  %v7794_v43 = vpop.f32.mrb[22].mxu1  ;;  %v6792_v45 = vpop.f32.mrb[23].mxu0  ;;  %v2818_v46 = vsel %vm2751_vm3, %v7792_v42, -inf  ;;  %v7992_v42 = vld [vmem:[#allocation2 + $0x98] sm:$0xff] }
 0x13d   :  { %8848 = vst [vmem:[#allocation38_spill] sm:$0xff] %v7794_v43  ;;  %2816 = vmax.xlane.f32.xlu1 %v2815_v40  ;;  %v6797_v49 = vpop.f32.mrb[23].mxu1  ;;  %2819 = vmax.xlane.f32.xlu0 %v2818_v46  ;;  %v2821_v50 = vsel %vm2751_vm3, %v7794_v43, -inf  ;;  %v7852_v40 = vld [vmem:[#allocation2 + $0x20] sm:$0xff] }
 0x13f   :  { %v7800_v51 = vpop.f32.mrb[24].mxu0 }
 0x140   :  { %8849 = vst [vmem:[#allocation39_spill] sm:$0xff] %v7800_v51  ;;  %v7802_v52 = vpop.f32.mrb[24].mxu1  ;;  %v6802_v55 = vpop.f32.mrb[25].mxu0  ;;  %v2824_v56 = vsel %vm2751_vm3, %v7800_v51, -inf }
 0x141   :  { %8850 = vst [vmem:[#allocation40_spill] sm:$0xff] %v7802_v52  ;;  %2822 = vmax.xlane.f32.xlu1 %v2821_v50  ;;  %v6807_v57 = vpop.f32.mrb[25].mxu1  ;;  %2825 = vmax.xlane.f32.xlu0 %v2824_v56  ;;  %v2827_v58 = vsel %vm2751_vm3, %v7802_v52, -inf  ;;  %v7867_v56 = vld [vmem:[#allocation2 + $0x28] sm:$0xff]  ;;  %v7976_v52 = vld [vmem:[#allocation2 + $0x90] sm:$0xff] }
 0x142   :  { %v7869_v57 = vld [vmem:[#allocation2 + $0x30] sm:$0xff] }
 0x143   :  { %v7808_v61 = vpop.f32.mrb[26].mxu0 }
 0x144   :  { %8851 = vst [vmem:[#allocation41_spill] sm:$0xff] %v7808_v61  ;;  %v7810_v62 = vpop.f32.mrb[26].mxu1  ;;  %v6812_v63 = vpop.f32.mrb[27].mxu0  ;;  %v2830_v1 = vsel %vm2751_vm3, %v7808_v61, -inf  ;;  %v7974_v61 = vld [vmem:[#allocation2 + $0x88] sm:$0xff] }
 0x145   :  { %8852 = vst [vmem:[#allocation42_spill] sm:$0xff] %v7810_v62  ;;  %2828 = vmax.xlane.f32.xlu1 %v2827_v58  ;;  %v6817_v2 = vpop.f32.mrb[27].mxu1  ;;  %2831 = vmax.xlane.f32.xlu0 %v2830_v1  ;;  %v2833_v5 = vsel %vm2751_vm3, %v7810_v62, -inf  ;;  %v7940_v58 = vld [vmem:[#allocation2 + $0x70] sm:$0xff] }
 0x147   :  { %v7816_v6 = vpop.f32.mrb[28].mxu0 }
 0x148   :  { %8853 = vst [vmem:[#allocation43_spill] sm:$0xff] %v7816_v6  ;;  %v7818_v7 = vpop.f32.mrb[28].mxu1  ;;  %v6822_v8 = vpop.f32.mrb[29].mxu0  ;;  %v2836_v11 = vsel %vm2751_vm3, %v7816_v6, -inf }
 0x149   :  { %8854 = vst [vmem:[#allocation44_spill] sm:$0xff] %v7818_v7  ;;  %2834 = vmax.xlane.f32.xlu1 %v2833_v5  ;;  %v6827_v12 = vpop.f32.mrb[29].mxu1  ;;  %2837 = vmax.xlane.f32.xlu0 %v2836_v11  ;;  %v2839_v13 = vsel %vm2751_vm3, %v7818_v7, -inf  ;;  %v7884_v8 = vld [vmem:[#allocation2 + $0x38] sm:$0xff]  ;;  %v7886_v11 = vld [vmem:[#allocation2 + $0x40] sm:$0xff] }
 0x14a   :  { %v7938_v12 = vld [vmem:[#allocation2 + $0x68] sm:$0xff]  ;;  %v7958_v7 = vld [vmem:[#allocation2 + $0x80] sm:$0xff] }
 0x14b   :  { %v7824_v14 = vpop.f32.mrb[30].mxu0 }
 0x14c   :  { %8855 = vst [vmem:[#allocation45_spill] sm:$0xff] %v7824_v14  ;;  %v7826_v17 = vpop.f32.mrb[30].mxu1  ;;  %v6832_v18 = vpop.f32.mrb[31].mxu0  ;;  %v2842_v19 = vsel %vm2751_vm3, %v7824_v14, -inf  ;;  %v7956_v14 = vld [vmem:[#allocation2 + $0x78] sm:$0xff] }
 0x14d   :  { %8856 = vst [vmem:[#allocation46_spill] sm:$0xff] %v7826_v17  ;;  %2840 = vmax.xlane.f32.xlu1 %v2839_v13  ;;  %2843 = vmax.xlane.f32.xlu0 %v2842_v19  ;;  %v6837_v20 = vpop.f32.mrb[31].mxu1  ;;  %v2845_v23 = vsel %vm2751_vm3, %v7826_v17, -inf  ;;  %v254_v19 = vld [vmem:[#allocation10] sm:$0xff] }
 0x14e   :  { %6839 = vmatpush3.msra.mxu0 %v254_v19  ;;  %v7921_v19 = vld [vmem:[#allocation2 + $0x60] sm:$0xff] }
 0x14f   :  { %6848 = vmatprep.subr.mxu0 %v8789_v0 }
 0x151   :  { %2846 = vmax.xlane.f32.xlu1 %v2845_v23 }
 0x19e   :  { %v2754_v25 = vpop.xlane.xlu0 %2753 }
 0x19f   :  { %v7835_v26 = vmax.f32 %v7832_v24, %v2754_v25  ;;  %v7901_v25 = vld [vmem:[#allocation2 + $0x48] sm:$0xff] }
 0x1a1   :  { %6081 = vst.msk [vmem:[#allocation2] sm:$0xff] %vm60_vm2, %v7835_v26  ;;  %2978 = vperm.xlu0 %7008, %v7835_v26  }
 0x1a2   :  { %v2757_v31 = vpop.xlane.xlu0 %2756  ;;  %v2760_v32 = vpop.xlane.xlu1 %2759 }
 0x1a3   :  { %v7845_v37 = vmax.f32 %v7837_v29, %v2757_v31  ;;  %v7848_v38 = vmax.f32 %v7839_v30, %v2760_v32  ;;  %v7903_v31 = vld [vmem:[#allocation2 + $0x50] sm:$0xff] }
 0x1a5   :  { %6082 = vst.msk [vmem:[#allocation2 + $0x8] sm:$0xff] %vm60_vm2, %v7845_v37  ;;  %6083 = vst.msk [vmem:[#allocation2 + $0x10] sm:$0xff] %vm60_vm2, %v7848_v38  ;;  %2983 = vperm.xlu1 %7009, %v7845_v37  }
 0x1a6   :  { %v2763_v46 = vpop.xlane.xlu1 %2762  ;;  %v2766_v49 = vpop.xlane.xlu0 %2765 }
 0x1a7   :  { %v7862_v50 = vmax.f32 %v7850_v39, %v2763_v46  ;;  %v7865_v55 = vmax.f32 %v7852_v40, %v2766_v49 }
 0x1a9   :  { %6084 = vst.msk [vmem:[#allocation2 + $0x18] sm:$0xff] %vm60_vm2, %v7862_v50  ;;  %2988 = vperm.xlu1 %7009, %v7848_v38   ;;  %6085 = vst.msk [vmem:[#allocation2 + $0x20] sm:$0xff] %vm60_vm2, %v7865_v55 }
 0x1aa   :  { %v2769_v63 = vpop.xlane.xlu1 %2768  ;;  %v2772_v1 = vpop.xlane.xlu0 %2771 }
 0x1ab   :  { %v7879_v2 = vmax.f32 %v7867_v56, %v2769_v63  ;;  %v7882_v5 = vmax.f32 %v7869_v57, %v2772_v1  ;;  %v255_v63 = vld [vmem:[#allocation10 + $0x8] sm:$0xff] }
 0x1ac   :  { %6844 = vmatpush3.msra.mxu1 %v255_v63 }
 0x1ad   :  { %6086 = vst.msk [vmem:[#allocation2 + $0x28] sm:$0xff] %vm60_vm2, %v7879_v2  ;;  %2993 = vperm.xlu1 %7009, %v7862_v50   ;;  %6087 = vst.msk [vmem:[#allocation2 + $0x30] sm:$0xff] %vm60_vm2, %v7882_v5  ;;  %6853 = vmatprep.subr.mxu1 %v8789_v0 }
 0x1ae   :  { %v2775_v13 = vpop.xlane.xlu1 %2774  ;;  %v2778_v18 = vpop.xlane.xlu0 %2777 }
 0x1af   :  { %v7896_v20 = vmax.f32 %v7884_v8, %v2775_v13  ;;  %v7899_v23 = vmax.f32 %v7886_v11, %v2778_v18  ;;  %v7919_v18 = vld [vmem:[#allocation2 + $0x58] sm:$0xff] }
 0x1b1   :  { %6088 = vst.msk [vmem:[#allocation2 + $0x38] sm:$0xff] %vm60_vm2, %v7896_v20  ;;  %2998 = vperm.xlu1 %7009, %v7865_v55   ;;  %6089 = vst.msk [vmem:[#allocation2 + $0x40] sm:$0xff] %vm60_vm2, %v7899_v23 }
 0x1b2   :  { %v2781_v46 = vpop.xlane.xlu1 %2780  ;;  %v2784_v49 = vpop.xlane.xlu0 %2783 }
 0x1b3   :  { %v7914_v1 = vmax.f32 %v7901_v25, %v2781_v46  ;;  %v7917_v13 = vmax.f32 %v7903_v31, %v2784_v49 }
 0x1b5   :  { %6090 = vst.msk [vmem:[#allocation2 + $0x48] sm:$0xff] %vm60_vm2, %v7914_v1  ;;  %3003 = vperm.xlu1 %7009, %v7879_v2   ;;  %3023 = vperm.xlu0 %7008, %v7914_v1   ;;  %6091 = vst.msk [vmem:[#allocation2 + $0x50] sm:$0xff] %vm60_vm2, %v7917_v13 }
 0x1b6   :  { %v2787_v49 = vpop.xlane.xlu1 %2786  ;;  %v2790_v63 = vpop.xlane.xlu0 %2789 }
 0x1b7   :  { %v7933_v32 = vmax.f32 %v7919_v18, %v2787_v49  ;;  %v7936_v0 = vmax.f32 %v7921_v19, %v2790_v63 }
 0x1b9   :  { %6092 = vst.msk [vmem:[#allocation2 + $0x58] sm:$0xff] %vm60_vm2, %v7933_v32  ;;  %3008 = vperm.xlu1 %7009, %v7882_v5   ;;  %3033 = vperm.xlu0 %7008, %v7933_v32   ;;  %6093 = vst.msk [vmem:[#allocation2 + $0x60] sm:$0xff] %vm60_vm2, %v7936_v0 }
 0x1ba   :  { %v2793_v49 = vpop.xlane.xlu1 %2792  ;;  %v2796_v63 = vpop.xlane.xlu0 %2795 }
 0x1bb   :  { %v7951_v45 = vmax.f32 %v7938_v12, %v2793_v49  ;;  %v7954_v17 = vmax.f32 %v7940_v58, %v2796_v63 }
 0x1bd   :  { %6094 = vst.msk [vmem:[#allocation2 + $0x68] sm:$0xff] %vm60_vm2, %v7951_v45  ;;  %3013 = vperm.xlu1 %7009, %v7896_v20   ;;  %3043 = vperm.xlu0 %7008, %v7951_v45   ;;  %6095 = vst.msk [vmem:[#allocation2 + $0x70] sm:$0xff] %vm60_vm2, %v7954_v17 }
 0x1be   :  { %v2799_v49 = vpop.xlane.xlu1 %2798  ;;  %v2802_v63 = vpop.xlane.xlu0 %2801 }
 0x1bf   :  { %v7969_v6 = vmax.f32 %v7956_v14, %v2799_v49  ;;  %v7972_v62 = vmax.f32 %v7958_v7, %v2802_v63 }
 0x1c1   :  { %6096 = vst.msk [vmem:[#allocation2 + $0x78] sm:$0xff] %vm60_vm2, %v7969_v6  ;;  %3018 = vperm.xlu1 %7009, %v7899_v23   ;;  %3053 = vperm.xlu0 %7008, %v7969_v6   ;;  %6097 = vst.msk [vmem:[#allocation2 + $0x80] sm:$0xff] %vm60_vm2, %v7972_v62 }
 0x1c2   :  { %v2805_v49 = vpop.xlane.xlu1 %2804  ;;  %v2808_v63 = vpop.xlane.xlu0 %2807 }
 0x1c3   :  { %v7987_v51 = vmax.f32 %v7974_v61, %v2805_v49  ;;  %v7990_v43 = vmax.f32 %v7976_v52, %v2808_v63 }
 0x1c5   :  { %6098 = vst.msk [vmem:[#allocation2 + $0x88] sm:$0xff] %vm60_vm2, %v7987_v51  ;;  %3028 = vperm.xlu1 %7009, %v7917_v13   ;;  %3063 = vperm.xlu0 %7008, %v7987_v51   ;;  %6099 = vst.msk [vmem:[#allocation2 + $0x90] sm:$0xff] %vm60_vm2, %v7990_v43 }
 0x1c6   :  { %v2811_v49 = vpop.xlane.xlu1 %2810  ;;  %v2814_v63 = vpop.xlane.xlu0 %2813 }
 0x1c7   :  { %v8005_v33 = vmax.f32 %v7992_v42, %v2811_v49  ;;  %v8008_v27 = vmax.f32 %v7994_v34, %v2814_v63 }
 0x1c9   :  { %6100 = vst.msk [vmem:[#allocation2 + $0x98] sm:$0xff] %vm60_vm2, %v8005_v33  ;;  %3038 = vperm.xlu1 %7009, %v7936_v0   ;;  %3073 = vperm.xlu0 %7008, %v8005_v33   ;;  %6101 = vst.msk [vmem:[#allocation2 + $0xa0] sm:$0xff] %vm60_vm2, %v8008_v27 }
 0x1ca   :  { %v2817_v49 = vpop.xlane.xlu1 %2816  ;;  %v2820_v63 = vpop.xlane.xlu0 %2819 }
 0x1cb   :  { %v8023_v22 = vmax.f32 %v8010_v28, %v2817_v49  ;;  %v8026_v15 = vmax.f32 %v8012_v21, %v2820_v63 }
 0x1cd   :  { %6102 = vst.msk [vmem:[#allocation2 + $0xa8] sm:$0xff] %vm60_vm2, %v8023_v22  ;;  %3048 = vperm.xlu1 %7009, %v7954_v17   ;;  %3083 = vperm.xlu0 %7008, %v8023_v22   ;;  %6103 = vst.msk [vmem:[#allocation2 + $0xb0] sm:$0xff] %vm60_vm2, %v8026_v15 }
 0x1ce   :  { %v2823_v49 = vpop.xlane.xlu1 %2822  ;;  %v2826_v63 = vpop.xlane.xlu0 %2825 }
 0x1cf   :  { %v8041_v10 = vmax.f32 %v8028_v16, %v2823_v49  ;;  %v8044_v3 = vmax.f32 %v8030_v9, %v2826_v63  ;;  %v2880_v49 = vsub.f32 %v7832_v24, %v7835_v26  ;;  %v8106_v9 = vld [vmem:[#allocation2 + $0xf8] sm:$0xff] }
 0x1d1   :  { %6104 = vst.msk [vmem:[#allocation2 + $0xb8] sm:$0xff] %vm60_vm2, %v8041_v10  ;;  %3058 = vperm.xlu1 %7009, %v7972_v62   ;;  %3093 = vperm.xlu0 %7008, %v8041_v10   ;;  %6105 = vst.msk [vmem:[#allocation2 + $0xc0] sm:$0xff] %vm60_vm2, %v8044_v3  ;;  %v2912_v26 = vmul.f32 1.442695, %v2880_v49 }
 0x1d2   :  { %v2829_v63 = vpop.xlane.xlu1 %2828  ;;  %v2832_v54 = vpop.xlane.xlu0 %2831 }
 0x1d3   :  { %v8061_v60 = vmax.f32 %v8046_v59, %v2829_v63  ;;  %v8064_v53 = vmax.f32 %v8048_v4, %v2832_v54  ;;  %v2883_v54 = vsub.f32 %v7850_v39, %v7862_v50  ;;  %7010 = vpow2.f32 %v2912_v26 }
 0x1d4   :  { %v2881_v39 = vsub.f32 %v7837_v29, %v7845_v37  ;;  %v2887_v26 = vsub.f32 %v7884_v8, %v7896_v20  ;;  %v2889_v8 = vsub.f32 %v7901_v25, %v7914_v1  ;;  %v8860_v25 = vsub.f32 %v7852_v40, %v7865_v55 }
 0x1d5   :  { %6106 = vst.msk [vmem:[#allocation2 + $0xc8] sm:$0xff] %vm60_vm2, %v8061_v60  ;;  %3068 = vperm.xlu1 %7009, %v7990_v43   ;;  %3103 = vperm.xlu0 %7008, %v8061_v60   ;;  %6107 = vst.msk [vmem:[#allocation2 + $0xd0] sm:$0xff] %vm60_vm2, %v8064_v53  ;;  %v2918_v50 = vmul.f32 1.442695, %v2883_v54  ;;  %v2895_v55 = vsub.f32 %v7956_v14, %v7969_v6  ;;  %v8863_v14 = vsub.f32 %v7903_v31, %v7917_v13 }
 0x1d6   :  { %v2835_v63 = vpop.xlane.xlu1 %2834  ;;  %v2838_v46 = vpop.xlane.xlu0 %2837  ;;  %v2914_v37 = vmul.f32 1.442695, %v2881_v39  ;;  %v8859_v39 = vsub.f32 %v7839_v30, %v7848_v38  ;;  %v2920_v1 = vmul.f32 1.442695, %v8860_v25  ;;  %v2893_v38 = vsub.f32 %v7938_v12, %v7951_v45 }
 0x1d7   :  { %v8081_v44 = vmax.f32 %v8066_v48, %v2835_v63  ;;  %v8084_v41 = vmax.f32 %v8068_v47, %v2838_v46  ;;  %v2885_v46 = vsub.f32 %v7867_v56, %v7879_v2  ;;  %7012 = vpow2.f32 %v2918_v50 }
 0x1d8   :  { %v2926_v50 = vmul.f32 1.442695, %v2887_v26  ;;  %v2938_v40 = vmul.f32 1.442695, %v2893_v38  ;;  %v8862_v45 = vsub.f32 %v7886_v11, %v7899_v23  ;;  %v2899_v23 = vsub.f32 %v7992_v42, %v8005_v33 }
 0x1d9   :  { %6108 = vst.msk [vmem:[#allocation2 + $0xd8] sm:$0xff] %vm60_vm2, %v8081_v44  ;;  %3078 = vperm.xlu1 %7009, %v8008_v27   ;;  %3113 = vperm.xlu0 %7008, %v8081_v44   ;;  %6109 = vst.msk [vmem:[#allocation2 + $0xe0] sm:$0xff] %vm60_vm2, %v8084_v41  ;;  %v2922_v2 = vmul.f32 1.442695, %v2885_v46  ;;  %v2916_v46 = vmul.f32 1.442695, %v8859_v39  ;;  %v2901_v13 = vsub.f32 %v8010_v28, %v8023_v22 }
 0x1da   :  { %v2841_v49 = vpop.xlane.xlu1 %2840  ;;  %v2844_v63 = vpop.xlane.xlu0 %2843  ;;  %v2928_v12 = vmul.f32 1.442695, %v8862_v45  ;;  %v2932_v39 = vmul.f32 1.442695, %v8863_v14  ;;  %v2950_v31 = vmul.f32 1.442695, %v2899_v23  ;;  %v8865_v42 = vsub.f32 %v7940_v58, %v7954_v17 }
 0x1db   :  { %v8101_v24 = vmax.f32 %v8086_v36, %v2841_v49  ;;  %v8104_v4 = vmax.f32 %v8088_v35, %v2844_v63  ;;  %7014 = vpow2.f32 %v2922_v2  ;;  %v2930_v63 = vmul.f32 1.442695, %v2889_v8 }
 0x1dc   :  { %7016 = vpow2.f32 %v2914_v37  ;;  %v2891_v2 = vsub.f32 %v7919_v18, %v7933_v32  ;;  %v8861_v32 = vsub.f32 %v7869_v57, %v7882_v5  ;;  %v2942_v57 = vmul.f32 1.442695, %v2895_v55 }
 0x1dd   :  { %6110 = vst.msk [vmem:[#allocation2 + $0xe8] sm:$0xff] %vm60_vm2, %v8101_v24  ;;  %3088 = vperm.xlu1 %7009, %v8026_v15   ;;  %3123 = vperm.xlu0 %7008, %v8101_v24   ;;  %v2910_v56 = vsub.f32 %v8088_v35, %v8104_v4  ;;  %6111 = vst.msk [vmem:[#allocation2 + $0xf0] sm:$0xff] %vm60_vm2, %v8104_v4  ;;  %v8131_v20 = vpop.eup %7010  ;;  %7018 = vpow2.f32 %v2926_v50  ;;  %v2897_v5 = vsub.f32 %v7974_v61, %v7987_v51 }
 0x1de   :  { %v2847_v54 = vpop.xlane.xlu1 %2846  ;;  %7020 = vpow2.f32 %v2916_v46  ;;  %v2934_v30 = vmul.f32 1.442695, %v2891_v2  ;;  %v2924_v18 = vmul.f32 1.442695, %v8861_v32  ;;  %v8864_v61 = vsub.f32 %v7921_v19, %v7936_v0 }
 0x1df   :  { %v8121_v29 = vmax.f32 %v8106_v9, %v2847_v54  ;;  %7022 = vpow2.f32 %v2930_v63  ;;  %v2946_v11 = vmul.f32 1.442695, %v2897_v5  ;;  %v2940_v25 = vmul.f32 1.442695, %v8865_v42  ;;  %v8872_v5 = vld [vmem:[#allocation48_spill] sm:$0xff] }
 0x1e0   :  { %7024 = vpow2.f32 %v2920_v1  ;;  %v2936_v63 = vmul.f32 1.442695, %v8864_v61  ;;  %v2954_v0 = vmul.f32 1.442695, %v2901_v13  ;;  %v2903_v19 = vsub.f32 %v8028_v16, %v8041_v10 }
 0x1e1   :  { %v2911_v49 = vsub.f32 %v8106_v9, %v8121_v29  ;;  %6112 = vst.msk [vmem:[#allocation2 + $0xf8] sm:$0xff] %vm60_vm2, %v8121_v29  ;;  %3098 = vperm.xlu1 %7009, %v8044_v3   ;;  %3133 = vperm.xlu0 %7008, %v8121_v29   ;;  %v8140_v26 = vpop.eup %7012  ;;  %7026 = vpow2.f32 %v2934_v30  ;;  %v8866_v28 = vsub.f32 %v7958_v7, %v7972_v62 }
 0x1e2   :  { %7028 = vpow2.f32 %v2924_v18  ;;  %v2958_v17 = vmul.f32 1.442695, %v2903_v19  ;;  %v2905_v58 = vsub.f32 %v8046_v59, %v8061_v60  ;;  %v8867_v16 = vsub.f32 %v7976_v52, %v7990_v43 }
 0x1e3   :  { %7030 = vpow2.f32 %v2938_v40  ;;  %v2944_v30 = vmul.f32 1.442695, %v8866_v28  ;;  %v2907_v7 = vsub.f32 %v8066_v48, %v8081_v44  ;;  %v8868_v60 = vsub.f32 %v7994_v34, %v8008_v27  ;;  %v8876_v28 = vld [vmem:[#allocation16_spill] sm:$0xff] }
 0x1e4   :  { %7032 = vpow2.f32 %v2928_v12  ;;  %v2948_v32 = vmul.f32 1.442695, %v8867_v16  ;;  %v2962_v62 = vmul.f32 1.442695, %v2905_v58  ;;  %v2909_v52 = vsub.f32 %v8086_v36, %v8101_v24  ;;  %v8870_v36 = vld [vmem:[#allocation47_spill] sm:$0xff] }
 0x1e5   :  { %3108 = vperm.xlu1 %7009, %v8064_v53   ;;  %5827 = vperm.xlu0 %7008, %v8131_v20   ;;  %v8149_v54 = vpop.eup %7014  ;;  %7034 = vpow2.f32 %v2942_v57  ;;  %v2952_v40 = vmul.f32 1.442695, %v8868_v60  ;;  %v2966_v43 = vmul.f32 1.442695, %v2907_v7  ;;  %v8869_v48 = vsub.f32 %v8012_v21, %v8026_v15  ;;  %v8878_v7 = vld [vmem:[#allocation18_spill] sm:$0xff] }
 0x1e6   :  { %v8158_v37 = vpop.eup %7016  ;;  %7036 = vpow2.f32 %v2932_v39  ;;  %v2970_v27 = vmul.f32 1.442695, %v2909_v52  ;;  %v8871_v15 = vsub.f32 %v8870_v36, %v8044_v3  ;;  %v8873_v14 = vsub.f32 %v8872_v5, %v8064_v53 }
 0x1e7   :  { %v8160_v50 = vpop.eup %7018  ;;  %7038 = vpow2.f32 %v2946_v11  ;;  %v2956_v45 = vmul.f32 1.442695, %v8869_v48  ;;  %v8874_v3 = vsub.f32 %v8068_v47, %v8084_v41  ;;  %v2972_v53 = vmul.f32 1.442695, %v2910_v56  ;;  %v8877_v56 = vld [vmem:[#allocation17_spill] sm:$0xff] }
 0x1e8   :  { %v8169_v8 = vpop.eup %7020  ;;  %7040 = vpow2.f32 %v2936_v63  ;;  %v2960_v21 = vmul.f32 1.442695, %v8871_v15  ;;  %v2964_v39 = vmul.f32 1.442695, %v8873_v14  ;;  %v8880_v36 = vmov 0.0   ;;  %v257_v15 = vld [vmem:[#allocation10 + $0x18] sm:$0xff] }
 0x1e9   :  { %3118 = vperm.xlu1 %7009, %v8084_v41   ;;  %5842 = vperm.xlu0 %7008, %v8140_v26   ;;  %v8171_v6 = vpop.eup %7022  ;;  %7042 = vpow2.f32 %v2950_v31  ;;  %v2968_v61 = vmul.f32 1.442695, %v8874_v3  ;;  %v8881_v3 = vld [vmem:[#allocation20_spill] sm:$0xff] }
 0x1ea   :  { %v8180_v46 = vpop.eup %7024  ;;  %7044 = vpow2.f32 %v2940_v25  ;;  %v8875_v25 = vld [vmem:[#allocation15_spill] sm:$0xff] }
 0x1eb   :  { %v8182_v51 = vpop.eup %7026  ;;  %7046 = vpow2.f32 %v2954_v0 }
 0x1ec   :  { %v8191_v2 = vpop.eup %7028  ;;  %7048 = vpow2.f32 %v2944_v30 }
 0x1ed   :  { %3128 = vperm.xlu1 %7009, %v8104_v4   ;;  %5852 = vperm.xlu0 %7008, %v8149_v54   ;;  %v8193_v33 = vpop.eup %7030  ;;  %7050 = vpow2.f32 %v2958_v17 }
 0x1ee   :  { %v8202_v1 = vpop.eup %7032  ;;  %7052 = vpow2.f32 %v2948_v32 }
 0x1ef   :  { %v8204_v22 = vpop.eup %7034  ;;  %7054 = vpow2.f32 %v2962_v62 }
 0x1f0   :  { %v8213_v38 = vpop.eup %7036  ;;  %7056 = vpow2.f32 %v2952_v40  ;;  %v256_v40 = vld [vmem:[#allocation10 + $0x10] sm:$0xff] }
 0x1f1   :  { %5832 = vperm.xlu1 %7009, %v8158_v37   ;;  %5862 = vperm.xlu0 %7008, %v8160_v50   ;;  %v8215_v10 = vpop.eup %7038  ;;  %7058 = vpow2.f32 %v2966_v43 }
 0x1f2   :  { %v8224_v18 = vpop.eup %7040  ;;  %7060 = vpow2.f32 %v2956_v45  ;;  %v8879_v45 = vld [vmem:[#allocation19_spill] sm:$0xff] }
 0x1f3   :  { %v8226_v59 = vpop.eup %7042  ;;  %7062 = vpow2.f32 %v2970_v27 }
 0x1f4   :  { %v8235_v55 = vpop.eup %7044  ;;  %7064 = vpow2.f32 %v2960_v21 }
 0x1f5   :  { %5837 = vperm.xlu1 %7009, %v8169_v8   ;;  %5872 = vperm.xlu0 %7008, %v8171_v6   ;;  %v8237_v44 = vpop.eup %7046  ;;  %7066 = vpow2.f32 %v2964_v39 }
 0x1f6   :  { %v8244_v34 = vpop.eup %7048  ;;  %7068 = vpow2.f32 %v2968_v61 }
 0x1f7   :  { %v8246_v12 = vpop.eup %7050  ;;  %7070 = vpow2.f32 %v2972_v53  ;;  %v258_v53 = vld [vmem:[#allocation10 + $0x20] sm:$0xff] }
 0x1f8   :  { %v8253_v24 = vpop.eup %7052 }
 0x1f9   :  { %5847 = vperm.xlu1 %7009, %v8180_v46   ;;  %5882 = vperm.xlu0 %7008, %v8182_v51   ;;  %v8255_v57 = vpop.eup %7054 }
 0x1fa   :  { %v8262_v11 = vpop.eup %7056 }
 0x1fb   :  { %v8264_v23 = vpop.eup %7058 }
 0x1fc   :  { %v8271_v63 = vpop.eup %7060 }
 0x1fd   :  { %5857 = vperm.xlu1 %7009, %v8191_v2   ;;  %5892 = vperm.xlu0 %7008, %v8193_v33   ;;  %v8273_v31 = vpop.eup %7062 }
 0x1fe   :  { %v8280_v13 = vpop.eup %7064 }
 0x1ff   :  { %v8284_v47 = vpop.eup %7066 }
 0x200   :  { %v8288_v35 = vpop.eup %7068 }
 0x201   :  { %5867 = vperm.xlu1 %7009, %v8202_v1   ;;  %5902 = vperm.xlu0 %7008, %v8204_v22   ;;  %v8292_v32 = vpop.eup %7070 }
 0x205   :  { %5877 = vperm.xlu1 %7009, %v8213_v38   ;;  %5912 = vperm.xlu0 %7008, %v8215_v10  }
 0x209   :  { %5887 = vperm.xlu1 %7009, %v8224_v18   ;;  %5922 = vperm.xlu0 %7008, %v8226_v59  }
 0x20d   :  { %5897 = vperm.xlu1 %7009, %v8235_v55   ;;  %5932 = vperm.xlu0 %7008, %v8237_v44  }
 0x211   :  { %5907 = vperm.xlu1 %7009, %v8244_v34   ;;  %5942 = vperm.xlu0 %7008, %v8246_v12  }
 0x215   :  { %5917 = vperm.xlu1 %7009, %v8253_v24   ;;  %5952 = vperm.xlu0 %7008, %v8255_v57  }
 0x219   :  { %5927 = vperm.xlu1 %7009, %v8262_v11   ;;  %5962 = vperm.xlu0 %7008, %v8264_v23  }
 0x21d   :  { %5937 = vperm.xlu1 %7009, %v8271_v63   ;;  %5972 = vperm.xlu0 %7008, %v8273_v31  }
 0x220   :  { %v2979_v42 = vpop.permute.xlu0 %2978 }
 0x221   :  { %v3136_v0 = vsub.f32 %v8875_v25, %v2979_v42  ;;  %5947 = vperm.xlu1 %7009, %v8280_v13  }
 0x223   :  { %v3168_v41 = vmul.f32 1.442695, %v3136_v0 }
 0x224   :  { %v2984_v19 = vpop.permute.xlu1 %2983 }
 0x225   :  { %7072 = vpow2.f32 %v3168_v41  ;;  %v3137_v30 = vsub.f32 %v8876_v28, %v2984_v19  ;;  %5957 = vperm.xlu1 %7009, %v8284_v47   ;;  %v8882_v19 = vld [vmem:[#allocation21_spill] sm:$0xff] }
 0x227   :  { %v3170_v17 = vmul.f32 1.442695, %v3137_v30  ;;  %v259_v30 = vld [vmem:[#allocation10 + $0x28] sm:$0xff] }
 0x228   :  { %v2989_v4 = vpop.permute.xlu1 %2988 }
 0x229   :  { %7074 = vpow2.f32 %v3170_v17  ;;  %v3138_v58 = vsub.f32 %v8877_v56, %v2989_v4  ;;  %5967 = vperm.xlu1 %7009, %v8288_v35  }
 0x22b   :  { %v3172_v16 = vmul.f32 1.442695, %v3138_v58  ;;  %v8883_v58 = vld [vmem:[#allocation24_spill] sm:$0xff] }
 0x22c   :  { %v2994_v62 = vpop.permute.xlu1 %2993 }
 0x22d   :  { %7076 = vpow2.f32 %v3172_v16  ;;  %v3139_v60 = vsub.f32 %v8878_v7, %v2994_v62  ;;  %5977 = vperm.xlu1 %7009, %v8292_v32  }
 0x22f   :  { %v8296_v43 = vpop.eup %7072  ;;  %v3174_v52 = vmul.f32 1.442695, %v3139_v60  ;;  %v8884_v60 = vld [vmem:[#allocation22_spill] sm:$0xff] }
 0x230   :  { %v2999_v48 = vpop.permute.xlu1 %2998  ;;  %6841 = vmatmul.mubr.msk.f32.vlgmr.msra.gmra.mrb[32].mxu0 %vm2751_vm3, %v8296_v43 }
 0x231   :  { %7078 = vpow2.f32 %v3174_v52  ;;  %v3140_v27 = vsub.f32 %v8879_v45, %v2999_v48  ;;  %6849 = vmatpush3.msra.mxu0 %v256_v40  ;;  %6850 = vmatprep.mubr.msk.f32.mxu0 %vm7302_vm1, %v8880_v36  ;;  %v260_v52 = vld [vmem:[#allocation10 + $0x30] sm:$0xff] }
 0x232   :  { %6858 = vmatprep.subr.mxu0 %v8880_v36 }
 0x233   :  { %v7075_v21 = vpop.eup %7074  ;;  %v3176_v5 = vmul.f32 1.442695, %v3140_v27 }
 0x234   :  { %6846 = vmatmul.mubr.msk.f32.vlgmr.msra.gmra.mrb[32].mxu1 %vm2751_vm3, %v7075_v21  ;;  %v3004_v14 = vpop.permute.xlu1 %3003  ;;  %v3024_v39 = vpop.permute.xlu0 %3023  ;;  %v3299_v56 = vsel %vm2751_vm3, %v7075_v21, 0.0  ;;  %v8885_v21 = vld [vmem:[#allocation26_spill] sm:$0xff] }
 0x235   :  { %7080 = vpow2.f32 %v3176_v5  ;;  %v3141_v61 = vsub.f32 %v8881_v3, %v3004_v14  ;;  %6854 = vmatpush3.msra.mxu1 %v257_v15  ;;  %6855 = vmatprep.mubr.msk.f32.mxu1 %vm7302_vm1, %v8880_v36  ;;  %v3145_v16 = vsub.f32 %v8883_v58, %v3024_v39  ;;  %v8886_v3 = vld [vmem:[#allocation23_spill] sm:$0xff] }
 0x236   :  { %6863 = vmatprep.subr.mxu1 %v8880_v36 }
 0x237   :  { %v7077_v42 = vpop.eup %7076  ;;  %v3178_v25 = vmul.f32 1.442695, %v3141_v61  ;;  %v3186_v15 = vmul.f32 1.442695, %v3145_v16  ;;  %v262_v16 = vld [vmem:[#allocation10 + $0x40] sm:$0xff] }
 0x238   :  { %v3009_v0 = vpop.permute.xlu1 %3008  ;;  %6851 = vmatmul.mubr.msk.f32.vlgmr.msra.gmra.mrb[34].mxu0 %vm2751_vm3, %v7077_v42  ;;  %v3034_v41 = vpop.permute.xlu0 %3033  ;;  %v3302_v27 = vsel %vm2751_vm3, %v7077_v42, 0.0 }
 0x239   :  { %7082 = vpow2.f32 %v3178_v25  ;;  %v3142_v28 = vsub.f32 %v8882_v19, %v3009_v0  ;;  %6859 = vmatpush3.msra.mxu0 %v258_v53  ;;  %6860 = vmatprep.mubr.msk.f32.mxu0 %vm7302_vm1, %v8880_v36  ;;  %v3147_v5 = vsub.f32 %v8885_v21, %v3034_v41  ;;  %v261_v53 = vld [vmem:[#allocation10 + $0x38] sm:$0xff] }
 0x23a   :  { %6868 = vmatprep.subr.mxu0 %v8880_v36 }
 0x23b   :  { %v8314_v17 = vpop.eup %7078  ;;  %v3180_v4 = vmul.f32 1.442695, %v3142_v28  ;;  %v3190_v41 = vmul.f32 1.442695, %v3147_v5  ;;  %v8890_v5 = vld [vmem:[#allocation30_spill] sm:$0xff] }
 0x23c   :  { %6856 = vmatmul.mubr.msk.f32.vlgmr.msra.gmra.mrb[34].mxu1 %vm2751_vm3, %v8314_v17  ;;  %v3014_v62 = vpop.permute.xlu1 %3013  ;;  %v3044_v7 = vpop.permute.xlu0 %3043  ;;  %3300 = vadd.xlane.f32.xlu0 %v3299_v56  ;;  %v8888_v56 = vld [vmem:[#allocation28_spill] sm:$0xff] }
 0x23d   :  { %7084 = vpow2.f32 %v3180_v4  ;;  %v3143_v40 = vsub.f32 %v8884_v60, %v3014_v62  ;;  %6864 = vmatpush3.msra.mxu1 %v259_v30  ;;  %6865 = vmatprep.mubr.msk.f32.mxu1 %vm7302_vm1, %v8880_v36  ;;  %v8887_v30 = vld [vmem:[#allocation25_spill] sm:$0xff]  ;;  %v3149_v58 = vsub.f32 %v8888_v56, %v3044_v7  ;;  %v263_v7 = vld [vmem:[#allocation10 + $0x48] sm:$0xff] }
 0x23e   :  { %6873 = vmatprep.subr.mxu1 %v8880_v36  ;;  %v8892_v56 = vld [vmem:[#allocation32_spill] sm:$0xff] }
 0x23f   :  { %v7081_v48 = vpop.eup %7080  ;;  %v3182_v45 = vmul.f32 1.442695, %v3143_v40 }
 0x240   :  { %v3019_v14 = vpop.permute.xlu1 %3018  ;;  %6861 = vmatmul.mubr.msk.f32.vlgmr.msra.gmra.mrb[36].mxu0 %vm2751_vm3, %v7081_v48  ;;  %v3054_v39 = vpop.permute.xlu0 %3053  ;;  %3303 = vadd.xlane.f32.xlu0 %v3302_v27  ;;  %v3308_v0 = vsel %vm2751_vm3, %v7081_v48, 0.0 }
 0x241   :  { %7086 = vpow2.f32 %v3182_v45  ;;  %v3144_v61 = vsub.f32 %v8886_v3, %v3019_v14  ;;  %6869 = vmatpush3.msra.mxu0 %v260_v52  ;;  %6870 = vmatprep.mubr.msk.f32.mxu0 %vm7302_vm1, %v8880_v36  ;;  %v8889_v45 = vld [vmem:[#allocation27_spill] sm:$0xff]  ;;  %v3151_v14 = vsub.f32 %v8890_v5, %v3054_v39 }
 0x242   :  { %6878 = vmatprep.subr.mxu0 %v8880_v36  ;;  %7088 = vpow2.f32 %v3186_v15  ;;  %v3194_v15 = vmul.f32 1.442695, %v3149_v58 }
 0x243   :  { %v8331_v25 = vpop.eup %7082  ;;  %v3184_v42 = vmul.f32 1.442695, %v3144_v61 }
 0x244   :  { %6866 = vmatmul.mubr.msk.f32.vlgmr.msra.gmra.mrb[36].mxu1 %vm2751_vm3, %v8331_v25  ;;  %v3029_v19 = vpop.permute.xlu1 %3028  ;;  %v3064_v28 = vpop.permute.xlu0 %3063  ;;  %3309 = vadd.xlane.f32.xlu0 %v3308_v0 }
 0x245   :  { %7090 = vpow2.f32 %v3184_v42  ;;  %v3146_v4 = vsub.f32 %v8887_v30, %v3029_v19  ;;  %6874 = vmatpush3.msra.mxu1 %v261_v53  ;;  %6875 = vmatprep.mubr.msk.f32.mxu1 %vm7302_vm1, %v8880_v36  ;;  %v8891_v53 = vld [vmem:[#allocation29_spill] sm:$0xff]  ;;  %v3198_v19 = vmul.f32 1.442695, %v3151_v14  ;;  %v3153_v58 = vsub.f32 %v8892_v56, %v3064_v28 }
 0x246   :  { %6883 = vmatprep.subr.mxu1 %v8880_v36  ;;  %7092 = vpow2.f32 %v3190_v41  ;;  %v3305_v14 = vsel %vm2751_vm3, %v8314_v17, 0.0 }
 0x247   :  { %v7085_v62 = vpop.eup %7084  ;;  %v3188_v60 = vmul.f32 1.442695, %v3146_v4  ;;  %v264_v4 = vld [vmem:[#allocation10 + $0x50] sm:$0xff] }
 0x248   :  { %v3039_v40 = vpop.permute.xlu1 %3038  ;;  %6871 = vmatmul.mubr.msk.f32.vlgmr.msra.gmra.mrb[38].mxu0 %vm2751_vm3, %v7085_v62  ;;  %v8342_v52 = vpop.permute.xlu0 %3073  ;;  %v3314_v48 = vsel %vm2751_vm3, %v7085_v62, 0.0  ;;  %v3296_v62 = vsel %vm2751_vm3, %v8296_v43, 0.0  ;;  %v3202_v43 = vmul.f32 1.442695, %v3153_v58 }
 0x249   :  { %7094 = vpow2.f32 %v3188_v60  ;;  %v3148_v27 = vsub.f32 %v8889_v45, %v3039_v40  ;;  %3315 = vadd.xlane.f32.xlu0 %v3314_v48  ;;  %6879 = vmatpush3.msra.mxu0 %v262_v16  ;;  %v265_v40 = vld [vmem:[#allocation10 + $0x58] sm:$0xff]  ;;  %v8893_v48 = vld [vmem:[#allocation31_spill] sm:$0xff] }
 0x24a   :  { %6880 = vmatprep.mubr.msk.f32.mxu0 %vm7302_vm1, %v8880_v36  ;;  %6888 = vmatprep.subr.mxu0 %v8880_v36 }
 0x24b   :  { %v8349_v21 = vpop.eup %7086  ;;  %v3192_v3 = vmul.f32 1.442695, %v3148_v27 }
 0x24c   :  { %6876 = vmatmul.mubr.msk.f32.vlgmr.msra.gmra.mrb[38].mxu1 %vm2751_vm3, %v8349_v21  ;;  %v3049_v61 = vpop.permute.xlu1 %3048  ;;  %v8355_v0 = vpop.permute.xlu0 %3083 }
 0x24d   :  { %7096 = vpow2.f32 %v3192_v3  ;;  %v3150_v42 = vsub.f32 %v8891_v53, %v3049_v61  ;;  %6884 = vmatpush3.msra.mxu1 %v263_v7  ;;  %6885 = vmatprep.mubr.msk.f32.mxu1 %vm7302_vm1, %v8880_v36  ;;  %v8359_v41 = vpop.eup %7088  ;;  %v266_v61 = vld [vmem:[#allocation10 + $0x60] sm:$0xff]  ;;  %v8894_v53 = vld [vmem:[#allocation34_spill] sm:$0xff] }
 0x24e   :  { %7098 = vpow2.f32 %v3194_v15  ;;  %6893 = vmatprep.subr.mxu1 %v8880_v36 }
 0x24f   :  { %v7091_v39 = vpop.eup %7090  ;;  %v3196_v30 = vmul.f32 1.442695, %v3150_v42  ;;  %v3155_v42 = vsub.f32 %v8894_v53, %v8342_v52 }
 0x250   :  { %v3059_v16 = vpop.permute.xlu1 %3058  ;;  %6881 = vmatmul.mubr.msk.f32.vlgmr.msra.gmra.mrb[40].mxu0 %vm2751_vm3, %v7091_v39  ;;  %6886 = vmatmul.mubr.msk.f32.vlgmr.msra.gmra.mrb[40].mxu1 %vm2751_vm3, %v8359_v41  ;;  %v3320_v60 = vsel %vm2751_vm3, %v7091_v39, 0.0  ;;  %v8370_v27 = vpop.eup %7092  ;;  %v8895_v39 = vld [vmem:[#allocation33_spill] sm:$0xff] }
 0x251   :  { %7100 = vpow2.f32 %v3196_v30  ;;  %v3152_v45 = vsub.f32 %v8893_v48, %v3059_v16  ;;  %3297 = vadd.xlane.f32.xlu1 %v3296_v62  ;;  %3321 = vadd.xlane.f32.xlu0 %v3320_v60  ;;  %v8374_v7 = vpop.permute.xlu0 %3093  ;;  %v267_v30 = vld [vmem:[#allocation10 + $0x68] sm:$0xff]  ;;  %v3206_v16 = vmul.f32 1.442695, %v3155_v42  ;;  %v8896_v60 = vld [vmem:[#allocation35_spill] sm:$0xff]  ;;  %v3311_v48 = vsel %vm2751_vm3, %v8331_v25, 0.0 }
 0x252   :  { %6889 = vmatpush3.msra.mxu0 %v264_v4  ;;  %6890 = vmatprep.mubr.msk.f32.mxu0 %vm7302_vm1, %v8880_v36  ;;  %7102 = vpow2.f32 %v3198_v19 }
 0x253   :  { %v7095_v28 = vpop.eup %7094  ;;  %v3200_v15 = vmul.f32 1.442695, %v3152_v45  ;;  %6894 = vmatpush3.msra.mxu1 %v265_v40  ;;  %6895 = vmatprep.mubr.msk.f32.mxu1 %vm7302_vm1, %v8880_v36  ;;  %v268_v45 = vld [vmem:[#allocation10 + $0x70] sm:$0xff] }
 0x254   :  { %v3069_v5 = vpop.permute.xlu1 %3068  ;;  %6891 = vmatmul.mubr.msk.f32.vlgmr.msra.gmra.mrb[42].mxu0 %vm2751_vm3, %v7095_v28  ;;  %6896 = vmatmul.mubr.msk.f32.vlgmr.msra.gmra.mrb[42].mxu1 %vm2751_vm3, %v8370_v27  ;;  %v3326_v3 = vsel %vm2751_vm3, %v7095_v28, 0.0  ;;  %v8897_v28 = vld [vmem:[#allocation36_spill] sm:$0xff] }
 0x255   :  { %7104 = vpow2.f32 %v3200_v15  ;;  %v3154_v19 = vsub.f32 %v8895_v39, %v3069_v5  ;;  %3306 = vadd.xlane.f32.xlu1 %v3305_v14  ;;  %3327 = vadd.xlane.f32.xlu0 %v3326_v3  ;;  %v8396_v62 = vpop.permute.xlu0 %3103  ;;  %v3157_v15 = vsub.f32 %v8897_v28, %v8355_v0  ;;  %v8898_v0 = vld [vmem:[#allocation37_spill] sm:$0xff]  ;;  %v3317_v39 = vsel %vm2751_vm3, %v8349_v21, 0.0  ;;  %v8900_v21 = vld [vmem:[#allocation39_spill] sm:$0xff] }
 0x256   :  { %6898 = vmatprep.subr.mxu0 %v8880_v36  ;;  %6903 = vmatprep.subr.mxu1 %v8880_v36  ;;  %7106 = vpow2.f32 %v3202_v43  ;;  %v269_v43 = vld [vmem:[#allocation10 + $0x78] sm:$0xff] }
 0x257   :  { %v7097_v4 = vpop.eup %7096  ;;  %v3204_v56 = vmul.f32 1.442695, %v3154_v19  ;;  %6899 = vmatpush3.msra.mxu0 %v266_v61  ;;  %6900 = vmatprep.mubr.msk.f32.mxu0 %vm7302_vm1, %v8880_v36  ;;  %v3210_v42 = vmul.f32 1.442695, %v3157_v15  ;;  %v270_v19 = vld [vmem:[#allocation10 + $0x80] sm:$0xff]  ;;  %v3323_v15 = vsel %vm2751_vm3, %v8359_v41, 0.0 }
 0x258   :  { %v8391_v17 = vpop.eup %7098  ;;  %6904 = vmatpush3.msra.mxu1 %v267_v30  ;;  %6905 = vmatprep.mubr.msk.f32.mxu1 %vm7302_vm1, %v8880_v36  ;;  %v3079_v52 = vpop.permute.xlu1 %3078  ;;  %v3332_v58 = vsel %vm2751_vm3, %v7097_v4, 0.0 }
 0x259   :  { %7108 = vpow2.f32 %v3204_v56  ;;  %v3156_v40 = vsub.f32 %v8896_v60, %v3079_v52  ;;  %6901 = vmatmul.mubr.msk.f32.vlgmr.msra.gmra.mrb[44].mxu0 %vm2751_vm3, %v7097_v4  ;;  %6906 = vmatmul.mubr.msk.f32.vlgmr.msra.gmra.mrb[44].mxu1 %vm2751_vm3, %v8391_v17  ;;  %v8899_v4 = vld [vmem:[#allocation38_spill] sm:$0xff]  ;;  %v8423_v52 = vpop.permute.xlu0 %3113 }
 0x25a   :  { %3312 = vadd.xlane.f32.xlu1 %v3311_v48  ;;  %3333 = vadd.xlane.f32.xlu0 %v3332_v58  ;;  %7110 = vpow2.f32 %v3206_v16  ;;  %v3159_v56 = vsub.f32 %v8899_v4, %v8374_v7  ;;  %v271_v16 = vld [vmem:[#allocation10 + $0x88] sm:$0xff]  ;;  %v3329_v4 = vsel %vm2751_vm3, %v8370_v27, 0.0 }
 0x25b   :  { %v7101_v5 = vpop.eup %7100  ;;  %v3208_v14 = vmul.f32 1.442695, %v3156_v40  ;;  %6908 = vmatprep.subr.mxu0 %v8880_v36  ;;  %6913 = vmatprep.subr.mxu1 %v8880_v36 }
 0x25c   :  { %6909 = vmatpush3.msra.mxu0 %v268_v45  ;;  %6910 = vmatprep.mubr.msk.f32.mxu0 %vm7302_vm1, %v8880_v36  ;;  %v3089_v3 = vpop.permute.xlu1 %3088  ;;  %v3338_v25 = vsel %vm2751_vm3, %v7101_v5, 0.0  ;;  %v8411_v61 = vpop.eup %7102  ;;  %v3214_v28 = vmul.f32 1.442695, %v3159_v56  ;;  %v274_v56 = vld [vmem:[#allocation10 + $0xa0] sm:$0xff] }
 0x25d   :  { %6914 = vmatpush3.msra.mxu1 %v269_v43  ;;  %6915 = vmatprep.mubr.msk.f32.mxu1 %vm7302_vm1, %v8880_v36  ;;  %v3158_v53 = vsub.f32 %v8898_v0, %v3089_v3  ;;  %7112 = vpow2.f32 %v3208_v14  ;;  %v272_v43 = vld [vmem:[#allocation10 + $0x90] sm:$0xff] }
 0x25e   :  { %6911 = vmatmul.mubr.msk.f32.vlgmr.msra.gmra.mrb[46].mxu0 %vm2751_vm3, %v7101_v5  ;;  %6916 = vmatmul.mubr.msk.f32.vlgmr.msra.gmra.mrb[46].mxu1 %vm2751_vm3, %v8411_v61  ;;  %7114 = vpow2.f32 %v3210_v42  ;;  %v8901_v5 = vld [vmem:[#allocation40_spill] sm:$0xff]  ;;  %v8902_v42 = vld [vmem:[#allocation41_spill] sm:$0xff] }
 0x25f   :  { %v7105_v30 = vpop.eup %7104  ;;  %v3212_v58 = vmul.f32 1.442695, %v3158_v53  ;;  %3318 = vadd.xlane.f32.xlu1 %v3317_v39  ;;  %3339 = vadd.xlane.f32.xlu0 %v3338_v25  ;;  %v3161_v14 = vsub.f32 %v8901_v5, %v8396_v62  ;;  %v273_v25 = vld [vmem:[#allocation10 + $0x98] sm:$0xff]  ;;  %v3124_v53 = vpop.permute.xlu0 %3123 }
 0x260   :  { %6918 = vmatprep.subr.mxu0 %v8880_v36  ;;  %6923 = vmatprep.subr.mxu1 %v8880_v36  ;;  %v3099_v60 = vpop.permute.xlu1 %3098  ;;  %v3344_v48 = vsel %vm2751_vm3, %v7105_v30, 0.0  ;;  %v8431_v7 = vpop.eup %7106 }
 0x261   :  { %6919 = vmatpush3.msra.mxu0 %v270_v19  ;;  %6920 = vmatprep.mubr.msk.f32.mxu0 %vm7302_vm1, %v8880_v36  ;;  %v3160_v40 = vsub.f32 %v8900_v21, %v3099_v60  ;;  %7116 = vpow2.f32 %v3212_v58 }
 0x262   :  { %6924 = vmatpush3.msra.mxu1 %v271_v16  ;;  %6925 = vmatprep.mubr.msk.f32.mxu1 %vm7302_vm1, %v8880_v36  ;;  %7118 = vpow2.f32 %v3214_v28  ;;  %v8903_v16 = vld [vmem:[#allocation42_spill] sm:$0xff] }
 0x263   :  { %v7109_v45 = vpop.eup %7108  ;;  %6921 = vmatmul.mubr.msk.f32.vlgmr.msra.gmra.mrb[48].mxu0 %vm2751_vm3, %v7105_v30  ;;  %6926 = vmatmul.mubr.msk.f32.vlgmr.msra.gmra.mrb[48].mxu1 %vm2751_vm3, %v8431_v7  ;;  %v3216_v3 = vmul.f32 1.442695, %v3160_v40  ;;  %v3218_v30 = vmul.f32 1.442695, %v3161_v14  ;;  %v3163_v60 = vsub.f32 %v8903_v16, %v8423_v52  ;;  %v275_v40 = vld [vmem:[#allocation10 + $0xa8] sm:$0xff]  ;;  %v3134_v28 = vpop.permute.xlu0 %3133  ;;  %v3335_v14 = vsel %vm2751_vm3, %v8391_v17, 0.0 }
 0x264   :  { %3324 = vadd.xlane.f32.xlu1 %v3323_v15  ;;  %3345 = vadd.xlane.f32.xlu0 %v3344_v48  ;;  %v3109_v0 = vpop.permute.xlu1 %3108  ;;  %v3350_v41 = vsel %vm2751_vm3, %v7109_v45, 0.0  ;;  %v8448_v19 = vpop.eup %7110  ;;  %v8904_v48 = vld [vmem:[#allocation43_spill] sm:$0xff] }
 0x265   :  { %6928 = vmatprep.subr.mxu0 %v8880_v36  ;;  %6933 = vmatprep.subr.mxu1 %v8880_v36  ;;  %v3162_v39 = vsub.f32 %v8902_v42, %v3109_v0  ;;  %7120 = vpow2.f32 %v3216_v3  ;;  %v3222_v5 = vmul.f32 1.442695, %v3163_v60  ;;  %v276_v3 = vld [vmem:[#allocation10 + $0xb0] sm:$0xff]  ;;  %v278_v16 = vld [vmem:[#allocation10 + $0xc0] sm:$0xff]  ;;  %v8907_v60 = vld [vmem:[#allocation46_spill] sm:$0xff] }
 0x266   :  { %6929 = vmatpush3.msra.mxu0 %v272_v43  ;;  %6930 = vmatprep.mubr.msk.f32.mxu0 %vm7302_vm1, %v8880_v36  ;;  %7122 = vpow2.f32 %v3218_v30 }
 0x267   :  { %6934 = vmatpush3.msra.mxu1 %v273_v25  ;;  %6935 = vmatprep.mubr.msk.f32.mxu1 %vm7302_vm1, %v8880_v36  ;;  %v7113_v62 = vpop.eup %7112  ;;  %v3220_v21 = vmul.f32 1.442695, %v3162_v39  ;;  %v8905_v25 = vld [vmem:[#allocation44_spill] sm:$0xff]  ;;  %v277_v39 = vld [vmem:[#allocation10 + $0xb8] sm:$0xff] }
 0x268   :  { %6931 = vmatmul.mubr.msk.f32.vlgmr.msra.gmra.mrb[50].mxu0 %vm2751_vm3, %v7109_v45  ;;  %6936 = vmatmul.mubr.msk.f32.vlgmr.msra.gmra.mrb[50].mxu1 %vm2751_vm3, %v8448_v19  ;;  %v3119_v58 = vpop.permute.xlu1 %3118  ;;  %v3356_v27 = vsel %vm2751_vm3, %v7113_v62, 0.0  ;;  %v8465_v15 = vpop.eup %7114  ;;  %v3165_v0 = vsub.f32 %v8905_v25, %v3124_v53 }
 0x269   :  { %3330 = vadd.xlane.f32.xlu1 %v3329_v4  ;;  %3351 = vadd.xlane.f32.xlu0 %v3350_v41  ;;  %v3164_v45 = vsub.f32 %v8904_v48, %v3119_v58  ;;  %7124 = vpow2.f32 %v3220_v21  ;;  %v8906_v41 = vld [vmem:[#allocation45_spill] sm:$0xff]  ;;  %v8483_v53 = vpop.permute.xlu0 %5827  ;;  %v3341_v58 = vsel %vm2751_vm3, %v8411_v61, 0.0  ;;  %v3167_v21 = vsub.f32 %v8907_v60, %v3134_v28  ;;  %v279_v48 = vld [vmem:[#allocation10 + $0xc8] sm:$0xff] }
 0x26a   :  { %6938 = vmatprep.subr.mxu0 %v8880_v36  ;;  %6943 = vmatprep.subr.mxu1 %v8880_v36  ;;  %7126 = vpow2.f32 %v3222_v5  ;;  %v280_v5 = vld [vmem:[#allocation10 + $0xd0] sm:$0xff] }
 0x26b   :  { %6939 = vmatpush3.msra.mxu0 %v274_v56  ;;  %6940 = vmatprep.mubr.msk.f32.mxu0 %vm7302_vm1, %v8880_v36  ;;  %v7117_v43 = vpop.eup %7116  ;;  %v3224_v42 = vmul.f32 1.442695, %v3164_v45  ;;  %v3226_v56 = vmul.f32 1.442695, %v3165_v0  ;;  %v3230_v28 = vmul.f32 1.442695, %v3167_v21 }
 0x26c   :  { %6944 = vmatpush3.msra.mxu1 %v275_v40  ;;  %6945 = vmatprep.mubr.msk.f32.mxu1 %vm7302_vm1, %v8880_v36  ;;  %v3129_v52 = vpop.permute.xlu1 %3128  ;;  %v8481_v17 = vpop.eup %7118  ;;  %v3353_v0 = vsel %vm2751_vm3, %v8448_v19, 0.0 }
 0x26d   :  { %6941 = vmatmul.mubr.msk.f32.vlgmr.msra.gmra.mrb[52].mxu0 %vm2751_vm3, %v7113_v62  ;;  %6946 = vmatmul.mubr.msk.f32.vlgmr.msra.gmra.mrb[52].mxu1 %vm2751_vm3, %v8465_v15  ;;  %v3166_v30 = vsub.f32 %v8906_v41, %v3129_v52  ;;  %v3362_v62 = vsel %vm2751_vm3, %v7117_v43, 0.0  ;;  %7128 = vpow2.f32 %v3224_v42  ;;  %v8502_v52 = vpop.permute.xlu0 %5842  ;;  %v282_v42 = vld [vmem:[#allocation10 + $0xe0] sm:$0xff]  ;;  %v283_v41 = vld [vmem:[#allocation10 + $0xe8] sm:$0xff] }
 0x26e   :  { %3336 = vadd.xlane.f32.xlu1 %v3335_v14  ;;  %3357 = vadd.xlane.f32.xlu0 %v3356_v27  ;;  %7130 = vpow2.f32 %v3226_v56  ;;  %v281_v14 = vld [vmem:[#allocation10 + $0xd8] sm:$0xff]  ;;  %v3359_v56 = vsel %vm2751_vm3, %v8465_v15, 0.0 }
 0x26f   :  { %6948 = vmatprep.subr.mxu0 %v8880_v36  ;;  %6953 = vmatprep.subr.mxu1 %v8880_v36  ;;  %v7121_v4 = vpop.eup %7120  ;;  %v3228_v40 = vmul.f32 1.442695, %v3166_v30 }
 0x270   :  { %6949 = vmatpush3.msra.mxu0 %v276_v3  ;;  %6950 = vmatprep.mubr.msk.f32.mxu0 %vm7302_vm1, %v8880_v36  ;;  %v3368_v45 = vsel %vm2751_vm3, %v7121_v4, 0.0  ;;  %v8498_v27 = vpop.eup %7122 }
 0x271   :  { %6954 = vmatpush3.msra.mxu1 %v277_v39  ;;  %6955 = vmatprep.mubr.msk.f32.mxu1 %vm7302_vm1, %v8880_v36  ;;  %7132 = vpow2.f32 %v3228_v40  ;;  %v8520_v39 = vpop.permute.xlu0 %5852 }
 0x272   :  { %6951 = vmatmul.mubr.msk.f32.vlgmr.msra.gmra.mrb[54].mxu0 %vm2751_vm3, %v7117_v43  ;;  %6956 = vmatmul.mubr.msk.f32.vlgmr.msra.gmra.mrb[54].mxu1 %vm2751_vm3, %v8481_v17  ;;  %v3347_v43 = vsel %vm2751_vm3, %v8431_v7, 0.0  ;;  %7134 = vpow2.f32 %v3230_v28 }
 0x273   :  { %3342 = vadd.xlane.f32.xlu1 %v3341_v58  ;;  %3363 = vadd.xlane.f32.xlu0 %v3362_v62  ;;  %v7125_v61 = vpop.eup %7124  ;;  %v284_v58 = vld [vmem:[#allocation10 + $0xf0] sm:$0xff] }
 0x274   :  { %6958 = vmatprep.subr.mxu0 %v8880_v36  ;;  %6963 = vmatprep.subr.mxu1 %v8880_v36  ;;  %v3374_v3 = vsel %vm2751_vm3, %v7125_v61, 0.0  ;;  %v7127_v25 = vpop.eup %7126 }
 0x275   :  { %6959 = vmatpush3.msra.mxu0 %v278_v16  ;;  %6960 = vmatprep.mubr.msk.f32.mxu0 %vm7302_vm1, %v8880_v36  ;;  %v285_v16 = vld [vmem:[#allocation10 + $0xf8] sm:$0xff]  ;;  %v8535_v60 = vpop.permute.xlu0 %5862 }
 0x276   :  { %6964 = vmatpush3.msra.mxu1 %v279_v48  ;;  %6965 = vmatprep.mubr.msk.f32.mxu1 %vm7302_vm1, %v8880_v36  ;;  %v3365_v48 = vsel %vm2751_vm3, %v8481_v17, 0.0 }
 0x277   :  { %6961 = vmatmul.mubr.msk.f32.vlgmr.msra.gmra.mrb[56].mxu0 %vm2751_vm3, %v7121_v4  ;;  %6966 = vmatmul.mubr.msk.f32.vlgmr.msra.gmra.mrb[56].mxu1 %vm2751_vm3, %v8498_v27  ;;  %v7129_v7 = vpop.eup %7128  ;;  %v8527_v4 = vpop.permute.xlu1 %5832 }
 0x278   :  { %3348 = vadd.xlane.f32.xlu1 %v3347_v43  ;;  %3369 = vadd.xlane.f32.xlu0 %v3368_v45  ;;  %v3380_v30 = vsel %vm2751_vm3, %v7129_v7, 0.0  ;;  %v7131_v62 = vpop.eup %7130  ;;  %v3377_v43 = vsel %vm2751_vm3, %v7127_v25, 0.0 }
 0x279   :  { %6968 = vmatprep.subr.mxu0 %v8880_v36  ;;  %6973 = vmatprep.subr.mxu1 %v8880_v36  ;;  %v8550_v45 = vpop.permute.xlu0 %5872 }
 0x27a   :  { %6969 = vmatpush3.msra.mxu0 %v280_v5  ;;  %6970 = vmatprep.mubr.msk.f32.mxu0 %vm7302_vm1, %v8880_v36 }
 0x27b   :  { %6974 = vmatpush3.msra.mxu1 %v281_v14  ;;  %6975 = vmatprep.mubr.msk.f32.mxu1 %vm7302_vm1, %v8880_v36  ;;  %v7133_v19 = vpop.eup %7132  ;;  %v8544_v15 = vpop.permute.xlu1 %5837  ;;  %v3383_v14 = vsel %vm2751_vm3, %v7131_v62, 0.0 }
 0x27c   :  { %6971 = vmatmul.mubr.msk.f32.vlgmr.msra.gmra.mrb[58].mxu0 %vm2751_vm3, %v7125_v61  ;;  %6976 = vmatmul.mubr.msk.f32.vlgmr.msra.gmra.mrb[58].mxu1 %vm2751_vm3, %v7127_v25  ;;  %v3386_v21 = vsel %vm2751_vm3, %v7133_v19, 0.0  ;;  %v7135_v40 = vpop.eup %7134  ;;  %v3371_v61 = vsel %vm2751_vm3, %v8498_v27, 0.0 }
 0x27d   :  { %3354 = vadd.xlane.f32.xlu1 %v3353_v0  ;;  %3375 = vadd.xlane.f32.xlu0 %v3374_v3  ;;  %v8560_v5 = vpop.permute.xlu0 %5882  ;;  %v3389_v27 = vsel %vm2751_vm3, %v7135_v40, 0.0 }
 0x27e   :  { %6978 = vmatprep.subr.mxu0 %v8880_v36  ;;  %6983 = vmatprep.subr.mxu1 %v8880_v36 }
 0x27f   :  { %6979 = vmatpush3.msra.mxu0 %v282_v42  ;;  %6980 = vmatprep.mubr.msk.f32.mxu0 %vm7302_vm1, %v8880_v36  ;;  %v8554_v28 = vpop.permute.xlu1 %5847 }
 0x280   :  { %6984 = vmatpush3.msra.mxu1 %v283_v41  ;;  %6985 = vmatprep.mubr.msk.f32.mxu1 %vm7302_vm1, %v8880_v36 }
 0x281   :  { %6981 = vmatmul.mubr.msk.f32.vlgmr.msra.gmra.mrb[60].mxu0 %vm2751_vm3, %v7129_v7  ;;  %6986 = vmatmul.mubr.msk.f32.vlgmr.msra.gmra.mrb[60].mxu1 %vm2751_vm3, %v7131_v62  ;;  %v8565_v3 = vpop.permute.xlu0 %5892 }
 0x282   :  { %3360 = vadd.xlane.f32.xlu1 %v3359_v56  ;;  %3381 = vadd.xlane.f32.xlu0 %v3380_v30 }
 0x283   :  { %6988 = vmatprep.subr.mxu0 %v8880_v36  ;;  %6993 = vmatprep.subr.mxu1 %v8880_v36  ;;  %v8562_v17 = vpop.permute.xlu1 %5857 }
 0x284   :  { %6989 = vmatpush3.msra.mxu0 %v284_v58  ;;  %6990 = vmatprep.mubr.msk.f32.mxu0 %vm7302_vm1, %v8880_v36 }
 0x285   :  { %6994 = vmatpush3.msra.mxu1 %v285_v16  ;;  %6995 = vmatprep.mubr.msk.f32.mxu1 %vm7302_vm1, %v8880_v36  ;;  %v2974_v36 = vmul.f32 1.442695, %v2911_v49  ;;  %v8570_v9 = vpop.permute.xlu0 %5902 }
 0x286   :  { %6991 = vmatmul.mubr.msk.f32.vlgmr.msra.gmra.mrb[62].mxu0 %vm2751_vm3, %v7133_v19  ;;  %6996 = vmatmul.mubr.msk.f32.vlgmr.msra.gmra.mrb[62].mxu1 %vm2751_vm3, %v7135_v40 }
 0x287   :  { %3366 = vadd.xlane.f32.xlu1 %v3365_v48  ;;  %3387 = vadd.xlane.f32.xlu0 %v3386_v21  ;;  %7136 = vpow2.f32 %v2974_v36  ;;  %v8568_v7 = vpop.permute.xlu1 %5867 }
 0x289   :  { %v8577_v25 = vpop.permute.xlu0 %5912 }
 0x28b   :  { %3372 = vadd.xlane.f32.xlu1 %v3371_v61  ;;  %v8575_v49 = vpop.permute.xlu1 %5877  ;;  %v3233_v61 = vld [vmem:[#allocation3 + $0x8] sm:$0xff] }
 0x28d   :  { %v8581_v42 = vpop.permute.xlu0 %5922 }
 0x28e   :  { %8908 = vst [vmem:[#allocation47_spill] sm:$0xff] %v8581_v42  ;;  %v3238_v42 = vld [vmem:[#allocation3 + $0x30] sm:$0xff] }
 0x28f   :  { %3378 = vadd.xlane.f32.xlu1 %v3377_v43  ;;  %v8579_v0 = vpop.permute.xlu1 %5887  ;;  %v3265_v43 = vmul.f32 %v8158_v37, %v3233_v61 }
 0x291   :  { %v8572_v29 = vpop.eup %7136  ;;  %v8585_v30 = vpop.permute.xlu0 %5932 }
 0x292   :  { %8909 = vst [vmem:[#allocation48_spill] sm:$0xff] %v8585_v30 }
 0x293   :  { %3384 = vadd.xlane.f32.xlu1 %v3383_v14  ;;  %v8583_v41 = vpop.permute.xlu1 %5897 }
 0x295   :  { %v8589_v19 = vpop.permute.xlu0 %5942 }
 0x296   :  { %8910 = vst [vmem:[#allocation15_spill] sm:$0xff] %v8589_v19 }
 0x297   :  { %3390 = vadd.xlane.f32.xlu1 %v3389_v27  ;;  %v8587_v62 = vpop.permute.xlu1 %5907  ;;  %v3234_v27 = vld [vmem:[#allocation3 + $0x10] sm:$0xff] }
 0x299   :  { %v8593_v58 = vpop.permute.xlu0 %5952 }
 0x29a   :  { %8912 = vst [vmem:[#allocation17_spill] sm:$0xff] %v8593_v58  ;;  %v3266_v58 = vmul.f32 %v8169_v8, %v3234_v27  ;;  %v3270_v8 = vmul.f32 %v8191_v2, %v3238_v42  ;;  %v3235_v27 = vld [vmem:[#allocation3 + $0x18] sm:$0xff] }
 0x29b   :  { %v8591_v56 = vpop.permute.xlu1 %5917  ;;  %v3267_v2 = vmul.f32 %v8140_v26, %v3235_v27 }
 0x29c   :  { %8911 = vst [vmem:[#allocation16_spill] sm:$0xff] %v8591_v56 }
 0x29d   :  { %5982 = vperm.xlu0 %7008, %v8572_v29   ;;  %v8597_v21 = vpop.permute.xlu0 %5962 }
 0x29e   :  { %8914 = vst [vmem:[#allocation19_spill] sm:$0xff] %v8597_v21 }
 0x29f   :  { %v8595_v16 = vpop.permute.xlu1 %5927 }
 0x2a0   :  { %8913 = vst [vmem:[#allocation18_spill] sm:$0xff] %v8595_v16  ;;  %v3236_v16 = vld [vmem:[#allocation3 + $0x20] sm:$0xff] }
 0x2a1   :  { %v8601_v48 = vpop.permute.xlu0 %5972 }
 0x2a2   :  { %8916 = vst [vmem:[#allocation21_spill] sm:$0xff] %v8601_v48  ;;  %v3268_v48 = vmul.f32 %v8180_v46, %v3236_v16 }
 0x2a3   :  { %v8599_v40 = vpop.permute.xlu1 %5937 }
 0x2a4   :  { %8915 = vst [vmem:[#allocation20_spill] sm:$0xff] %v8599_v40 }
 0x2a7   :  { %v8603_v36 = vpop.permute.xlu1 %5947 }
 0x2a8   :  { %8917 = vst [vmem:[#allocation24_spill] sm:$0xff] %v8603_v36 }
 0x2ab   :  { %v8608_v56 = vpop.permute.xlu1 %5957 }
 0x2af   :  { %v8612_v61 = vpop.permute.xlu1 %5967 }
 0x2b0   :  { %8918 = vst [vmem:[#allocation22_spill] sm:$0xff] %v8612_v61 }
 0x2c9   :  { %v3301_v14 = vpop.xlane.xlu0 %3300 }
 0x2ca   :  { %v3393_v19 = vadd.f32 %v3301_v14, %v3265_v43 }
 0x2cc   :  { %3426 = vst.msk [vmem:[#allocation3 + $0x8] sm:$0xff] %vm60_vm2, %v3393_v19 }
 0x2cd   :  { %v3304_v30 = vpop.xlane.xlu0 %3303 }
 0x2ce   :  { %v3394_v21 = vadd.f32 %v3304_v30, %v3266_v58  ;;  %v8617_v30 = vpop.permute.xlu1 %5977  ;;  %v3232_v58 = vld [vmem:[#allocation3] sm:$0xff] }
 0x2cf   :  { %v3264_v46 = vmul.f32 %v8131_v20, %v3232_v58  ;;  %v3244_v58 = vld [vmem:[#allocation3 + $0x60] sm:$0xff] }
 0x2d0   :  { %3427 = vst.msk [vmem:[#allocation3 + $0x10] sm:$0xff] %vm60_vm2, %v3394_v21  ;;  %v3240_v21 = vld [vmem:[#allocation3 + $0x40] sm:$0xff] }
 0x2d1   :  { %v3310_v40 = vpop.xlane.xlu0 %3309  ;;  %v3272_v16 = vmul.f32 %v8202_v1, %v3240_v21 }
 0x2d2   :  { %v3396_v36 = vadd.f32 %v3310_v40, %v3268_v48 }
 0x2d3   :  { %v6117_v37 = vld [vmem:[#allocation3 + $0x8] sm:$0xff] }
 0x2d4   :  { %7138 = vrcp.f32 %v6117_v37  ;;  %3429 = vst.msk [vmem:[#allocation3 + $0x20] sm:$0xff] %vm60_vm2, %v3396_v36  ;;  %v3242_v37 = vld [vmem:[#allocation3 + $0x50] sm:$0xff] }
 0x2d5   :  { %v3274_v42 = vmul.f32 %v8213_v38, %v3242_v37  ;;  %v3239_v38 = vld [vmem:[#allocation3 + $0x38] sm:$0xff] }
 0x2d6   :  { %v3316_v19 = vpop.xlane.xlu0 %3315  ;;  %v3271_v37 = vmul.f32 %v8160_v50, %v3239_v38 }
 0x2d7   :  { %v3398_v43 = vadd.f32 %v3316_v19, %v3270_v8  ;;  %v6118_v27 = vld [vmem:[#allocation3 + $0x10] sm:$0xff] }
 0x2d9   :  { %3431 = vst.msk [vmem:[#allocation3 + $0x30] sm:$0xff] %vm60_vm2, %v3398_v43  ;;  %v3237_v43 = vld [vmem:[#allocation3 + $0x28] sm:$0xff] }
 0x2da   :  { %v3269_v21 = vmul.f32 %v8149_v54, %v3237_v43 }
 0x2de   :  { %v7139_v40 = vpop.eup %7138  ;;  %v3298_v48 = vpop.xlane.xlu1 %3297 }
 0x2df   :  { %v3322_v14 = vpop.xlane.xlu0 %3321  ;;  %v3392_v36 = vadd.f32 %v3298_v48, %v3264_v46  ;;  %6219 = vperm.xlu0 %7008, %v7139_v40   ;;  %v3276_v46 = vmul.f32 %v8224_v18, %v3244_v58 }
 0x2e0   :  { %v3400_v61 = vadd.f32 %v3322_v14, %v3272_v16  ;;  %v3246_v14 = vld [vmem:[#allocation3 + $0x70] sm:$0xff] }
 0x2e1   :  { %3425 = vst.msk [vmem:[#allocation3] sm:$0xff] %vm60_vm2, %v3392_v36  ;;  %v3278_v36 = vmul.f32 %v8235_v55, %v3246_v14 }
 0x2e2   :  { %3433 = vst.msk [vmem:[#allocation3 + $0x40] sm:$0xff] %vm60_vm2, %v3400_v61  ;;  %v3307_v8 = vpop.xlane.xlu1 %3306 }
 0x2e3   :  { %v3328_v20 = vpop.xlane.xlu0 %3327  ;;  %v3395_v19 = vadd.f32 %v3307_v8, %v3267_v2 }
 0x2e4   :  { %v3402_v1 = vadd.f32 %v3328_v20, %v3274_v42  ;;  %v3241_v20 = vld [vmem:[#allocation3 + $0x48] sm:$0xff] }
 0x2e5   :  { %3428 = vst.msk [vmem:[#allocation3 + $0x18] sm:$0xff] %vm60_vm2, %v3395_v19  ;;  %v3248_v19 = vld [vmem:[#allocation3 + $0x80] sm:$0xff]  ;;  %v3273_v43 = vmul.f32 %v8171_v6, %v3241_v20 }
 0x2e6   :  { %3435 = vst.msk [vmem:[#allocation3 + $0x50] sm:$0xff] %vm60_vm2, %v3402_v1  ;;  %v6120_v1 = vld [vmem:[#allocation3 + $0x20] sm:$0xff]  ;;  %v3280_v50 = vmul.f32 %v8244_v34, %v3248_v19 }
 0x2e7   :  { %v3313_v16 = vpop.xlane.xlu1 %3312  ;;  %v3334_v61 = vpop.xlane.xlu0 %3333 }
 0x2e8   :  { %v6116_v40 = vld [vmem:[#allocation3] sm:$0xff]  ;;  %v3397_v26 = vadd.f32 %v3313_v16, %v3269_v21  ;;  %v3404_v48 = vadd.f32 %v3334_v61, %v3276_v46  ;;  %v6122_v46 = vld [vmem:[#allocation3 + $0x30] sm:$0xff] }
 0x2e9   :  { %7140 = vrcp.f32 %v6116_v40  ;;  %v3243_v40 = vld [vmem:[#allocation3 + $0x58] sm:$0xff]  ;;  %v6124_v14 = vld [vmem:[#allocation3 + $0x40] sm:$0xff] }
 0x2ea   :  { %3430 = vst.msk [vmem:[#allocation3 + $0x28] sm:$0xff] %vm60_vm2, %v3397_v26  ;;  %3437 = vst.msk [vmem:[#allocation3 + $0x60] sm:$0xff] %vm60_vm2, %v3404_v48  ;;  %7142 = vrcp.f32 %v6118_v27  ;;  %v3250_v26 = vld [vmem:[#allocation3 + $0x90] sm:$0xff]  ;;  %v3275_v6 = vmul.f32 %v8182_v51, %v3243_v40 }
 0x2eb   :  { %v3282_v34 = vmul.f32 %v8253_v24, %v3250_v26 }
 0x2ec   :  { %v6119_v54 = vld [vmem:[#allocation3 + $0x18] sm:$0xff]  ;;  %v3319_v18 = vpop.xlane.xlu1 %3318  ;;  %v3340_v2 = vpop.xlane.xlu0 %3339 }
 0x2ed   :  { %7144 = vrcp.f32 %v6119_v54  ;;  %v3399_v42 = vadd.f32 %v3319_v18, %v3271_v37  ;;  %v3406_v8 = vadd.f32 %v3340_v2, %v3278_v36  ;;  %v6126_v51 = vld [vmem:[#allocation3 + $0x50] sm:$0xff] }
 0x2ee   :  { %7146 = vrcp.f32 %v6120_v1 }
 0x2ef   :  { %3432 = vst.msk [vmem:[#allocation3 + $0x38] sm:$0xff] %vm60_vm2, %v3399_v42  ;;  %3439 = vst.msk [vmem:[#allocation3 + $0x70] sm:$0xff] %vm60_vm2, %v3406_v8  ;;  %v3245_v42 = vld [vmem:[#allocation3 + $0x68] sm:$0xff]  ;;  %v3252_v8 = vld [vmem:[#allocation3 + $0xa0] sm:$0xff] }
 0x2f0   :  { %v3277_v24 = vmul.f32 %v8193_v33, %v3245_v42  ;;  %v3284_v20 = vmul.f32 %v8262_v11, %v3252_v8  ;;  %v5793_v11 = vld [vmem:[#allocation4] sm:$0xff]  ;;  %v5794_v42 = vld [vmem:[#allocation4 + $0x8] sm:$0xff] }
 0x2f1   :  { %v6121_v55 = vld [vmem:[#allocation3 + $0x28] sm:$0xff]  ;;  %v3325_v58 = vpop.xlane.xlu1 %3324  ;;  %v3346_v21 = vpop.xlane.xlu0 %3345 }
 0x2f2   :  { %7148 = vrcp.f32 %v6121_v55  ;;  %v3401_v16 = vadd.f32 %v3325_v58, %v3273_v43  ;;  %v3408_v61 = vadd.f32 %v3346_v21, %v3280_v50 }
 0x2f3   :  { %v7141_v48 = vpop.eup %7140  ;;  %7150 = vrcp.f32 %v6122_v46  ;;  %v3247_v46 = vld [vmem:[#allocation3 + $0x78] sm:$0xff] }
 0x2f4   :  { %3434 = vst.msk [vmem:[#allocation3 + $0x48] sm:$0xff] %vm60_vm2, %v3401_v16  ;;  %3441 = vst.msk [vmem:[#allocation3 + $0x80] sm:$0xff] %vm60_vm2, %v3408_v61  ;;  %6214 = vperm.xlu1 %7009, %v7141_v48   ;;  %v7143_v38 = vpop.eup %7142  ;;  %v3254_v16 = vld [vmem:[#allocation3 + $0xb0] sm:$0xff]  ;;  %v6128_v61 = vld [vmem:[#allocation3 + $0x60] sm:$0xff]  ;;  %v3279_v40 = vmul.f32 %v8204_v22, %v3247_v46 }
 0x2f5   :  { %v3286_v26 = vmul.f32 %v8271_v63, %v3254_v16  ;;  %v3258_v46 = vld [vmem:[#allocation3 + $0xd0] sm:$0xff] }
 0x2f6   :  { %v6123_v27 = vld [vmem:[#allocation3 + $0x38] sm:$0xff]  ;;  %v3331_v37 = vpop.xlane.xlu1 %3330  ;;  %v3352_v36 = vpop.xlane.xlu0 %3351 }
 0x2f7   :  { %v7145_v54 = vpop.eup %7144  ;;  %7152 = vrcp.f32 %v6123_v27  ;;  %v3403_v18 = vadd.f32 %v3331_v37, %v3275_v6  ;;  %v3410_v2 = vadd.f32 %v3352_v36, %v3282_v34  ;;  %v3249_v37 = vld [vmem:[#allocation3 + $0x88] sm:$0xff]  ;;  %v3256_v36 = vld [vmem:[#allocation3 + $0xc0] sm:$0xff] }
 0x2f8   :  { %6229 = vperm.xlu0 %7008, %v7145_v54   ;;  %6224 = vperm.xlu1 %7009, %v7143_v38   ;;  %7154 = vrcp.f32 %v6124_v14  ;;  %v7147_v19 = vpop.eup %7146  ;;  %v5985_v54 = vmul.f32 %v8483_v53, %v5793_v11  ;;  %v3281_v63 = vmul.f32 %v8215_v10, %v3249_v37  ;;  %v3288_v8 = vmul.f32 %v8280_v13, %v3256_v36  ;;  %v5795_v13 = vld [vmem:[#allocation4 + $0x10] sm:$0xff]  ;;  %v3253_v36 = vld [vmem:[#allocation3 + $0xa8] sm:$0xff] }
 0x2f9   :  { %3436 = vst.msk [vmem:[#allocation3 + $0x58] sm:$0xff] %vm60_vm2, %v3403_v18  ;;  %3443 = vst.msk [vmem:[#allocation3 + $0x90] sm:$0xff] %vm60_vm2, %v3410_v2  ;;  %v6130_v18 = vld [vmem:[#allocation3 + $0x70] sm:$0xff]  ;;  %v3290_v11 = vmul.f32 %v8284_v47, %v3258_v46 }
 0x2fb   :  { %v6125_v1 = vld [vmem:[#allocation3 + $0x48] sm:$0xff]  ;;  %v3337_v43 = vpop.xlane.xlu1 %3336  ;;  %v3358_v50 = vpop.xlane.xlu0 %3357 }
 0x2fc   :  { %v7149_v55 = vpop.eup %7148  ;;  %7156 = vrcp.f32 %v6125_v1  ;;  %v3405_v58 = vadd.f32 %v3337_v43, %v3277_v24  ;;  %v3412_v21 = vadd.f32 %v3358_v50, %v3284_v20  ;;  %6234 = vperm.xlu1 %7009, %v7147_v19   ;;  %v5986_v43 = vmul.f32 %v8527_v4, %v5794_v42  ;;  %v6132_v50 = vld [vmem:[#allocation3 + $0x80] sm:$0xff] }
 0x2fd   :  { %7158 = vrcp.f32 %v6126_v51  ;;  %6239 = vperm.xlu0 %7008, %v7149_v55   ;;  %v7151_v33 = vpop.eup %7150  ;;  %v3285_v42 = vmul.f32 %v8237_v44, %v3253_v36 }
 0x2fe   :  { %3438 = vst.msk [vmem:[#allocation3 + $0x68] sm:$0xff] %vm60_vm2, %v3405_v58  ;;  %3445 = vst.msk [vmem:[#allocation3 + $0xa0] sm:$0xff] %vm60_vm2, %v3412_v21  ;;  %7160 = vrcp.f32 %v6128_v61  ;;  %v3251_v21 = vld [vmem:[#allocation3 + $0x98] sm:$0xff] }
 0x2ff   :  { %v3283_v4 = vmul.f32 %v8226_v59, %v3251_v21 }
 0x300   :  { %v6127_v48 = vld [vmem:[#allocation3 + $0x58] sm:$0xff]  ;;  %v3343_v6 = vpop.xlane.xlu1 %3342  ;;  %v3364_v34 = vpop.xlane.xlu0 %3363  ;;  %6244 = vperm.xlu1 %7009, %v7151_v33  }
 0x301   :  { %v7153_v38 = vpop.eup %7152  ;;  %7162 = vrcp.f32 %v6127_v48  ;;  %v3407_v14 = vadd.f32 %v3343_v6, %v3279_v40  ;;  %v3414_v27 = vadd.f32 %v3364_v34, %v3286_v26  ;;  %v5987_v26 = vmul.f32 %v8544_v15, %v5795_v13  ;;  %v6134_v48 = vld [vmem:[#allocation3 + $0x90] sm:$0xff] }
 0x302   :  { %6249 = vperm.xlu0 %7008, %v7153_v38   ;;  %v7155_v2 = vpop.eup %7154  ;;  %7164 = vrcp.f32 %v6130_v18 }
 0x303   :  { %3440 = vst.msk [vmem:[#allocation3 + $0x78] sm:$0xff] %vm60_vm2, %v3407_v14  ;;  %3447 = vst.msk [vmem:[#allocation3 + $0xb0] sm:$0xff] %vm60_vm2, %v3414_v27  ;;  %v3526_v22 = vpop.f32.mrb[32].mxu0 }
 0x304   :  { %v6017_v51 = vadd.f32 %v5985_v54, %v3526_v22  ;;  %v6842_v24 = vpop.f32.mrb[33].mxu0  ;;  %6254 = vperm.xlu1 %7009, %v7155_v2   ;;  %v3260_v54 = vld [vmem:[#allocation3 + $0xe0] sm:$0xff]  ;;  %v5796_v2 = vld [vmem:[#allocation4 + $0x18] sm:$0xff] }
 0x305   :  { %v6129_v20 = vld [vmem:[#allocation3 + $0x68] sm:$0xff]  ;;  %v3349_v19 = vpop.xlane.xlu1 %3348  ;;  %v3370_v53 = vpop.xlane.xlu0 %3369  ;;  %v6136_v15 = vld [vmem:[#allocation3 + $0xa0] sm:$0xff]  ;;  %v3292_v22 = vmul.f32 %v8288_v35, %v3260_v54  ;;  %v3259_v54 = vld [vmem:[#allocation3 + $0xd8] sm:$0xff] }
 0x306   :  { %v7157_v1 = vpop.eup %7156  ;;  %7166 = vrcp.f32 %v6129_v20  ;;  %v3409_v55 = vadd.f32 %v3349_v19, %v3281_v63  ;;  %v3416_v58 = vadd.f32 %v3370_v53, %v3288_v8  ;;  %6049 = vst.msk [vmem:[#allocation4] sm:$0xff] %vm125_vm0, %v6017_v51  ;;  %v5988_v8 = vmul.f32 %v8502_v52, %v5796_v2  ;;  %v5797_v51 = vld [vmem:[#allocation4 + $0x20] sm:$0xff] }
 0x307   :  { %v7159_v10 = vpop.eup %7158  ;;  %6259 = vperm.xlu0 %7008, %v7157_v1   ;;  %v3599_v16 = vpop.f32.mrb[32].mxu1  ;;  %7168 = vrcp.f32 %v6132_v50  ;;  %v3255_v50 = vld [vmem:[#allocation3 + $0xb8] sm:$0xff]  ;;  %v5989_v46 = vmul.f32 %v8554_v28, %v5797_v51 }
 0x308   :  { %3442 = vst.msk [vmem:[#allocation3 + $0x88] sm:$0xff] %vm60_vm2, %v3409_v55  ;;  %3449 = vst.msk [vmem:[#allocation3 + $0xc0] sm:$0xff] %vm60_vm2, %v3416_v58  ;;  %v6018_v61 = vadd.f32 %v5986_v43, %v3599_v16  ;;  %v6847_v33 = vpop.f32.mrb[33].mxu1  ;;  %6264 = vperm.xlu1 %7009, %v7159_v10   ;;  %v7161_v40 = vpop.eup %7160  ;;  %v3262_v55 = vld [vmem:[#allocation3 + $0xf0] sm:$0xff]  ;;  %v5798_v10 = vld [vmem:[#allocation4 + $0x28] sm:$0xff]  ;;  %v3287_v13 = vmul.f32 %v8246_v12, %v3255_v50 }
 0x309   :  { %v3294_v16 = vmul.f32 %v8292_v32, %v3262_v55 }
 0x30a   :  { %v6131_v6 = vld [vmem:[#allocation3 + $0x78] sm:$0xff]  ;;  %v3355_v34 = vpop.xlane.xlu1 %3354  ;;  %v3376_v38 = vpop.xlane.xlu0 %3375  ;;  %6050 = vst.msk [vmem:[#allocation4 + $0x8] sm:$0xff] %vm125_vm0, %v6018_v61  ;;  %v6138_v44 = vld [vmem:[#allocation3 + $0xb0] sm:$0xff] }
 0x30b   :  { %v7163_v14 = vpop.eup %7162  ;;  %7170 = vrcp.f32 %v6131_v6  ;;  %v3411_v27 = vadd.f32 %v3355_v34, %v3283_v4  ;;  %v3418_v37 = vadd.f32 %v3376_v38, %v3290_v11  ;;  %v3672_v18 = vpop.f32.mrb[34].mxu0  ;;  %v5990_v38 = vmul.f32 %v8520_v39, %v5798_v10 }
 0x30c   :  { %6269 = vperm.xlu0 %7008, %v7163_v14   ;;  %v6019_v59 = vadd.f32 %v5987_v26, %v3672_v18  ;;  %v6852_v47 = vpop.f32.mrb[35].mxu0  ;;  %6274 = vperm.xlu1 %7009, %v7161_v40   ;;  %7172 = vrcp.f32 %v6134_v48  ;;  %v7165_v63 = vpop.eup %7164  ;;  %v3257_v40 = vld [vmem:[#allocation3 + $0xc8] sm:$0xff]  ;;  %v5799_v14 = vld [vmem:[#allocation4 + $0x30] sm:$0xff] }
 0x30d   :  { %3444 = vst.msk [vmem:[#allocation3 + $0x98] sm:$0xff] %vm60_vm2, %v3411_v27  ;;  %3451 = vst.msk [vmem:[#allocation3 + $0xd0] sm:$0xff] %vm60_vm2, %v3418_v37  ;;  %v3289_v27 = vmul.f32 %v8255_v57, %v3257_v40  ;;  %v3291_v57 = vmul.f32 %v8264_v23, %v3259_v54  ;;  %v5806_v54 = vld [vmem:[#allocation4 + $0x68] sm:$0xff] }
 0x30e   :  { %6051 = vst.msk [vmem:[#allocation4 + $0x10] sm:$0xff] %vm125_vm0, %v6019_v59 }
 0x30f   :  { %v6133_v24 = vld [vmem:[#allocation3 + $0x88] sm:$0xff]  ;;  %v3361_v20 = vpop.xlane.xlu1 %3360  ;;  %v3382_v19 = vpop.xlane.xlu0 %3381  ;;  %v6140_v12 = vld [vmem:[#allocation3 + $0xc0] sm:$0xff] }
 0x310   :  { %v7167_v53 = vpop.eup %7166  ;;  %7174 = vrcp.f32 %v6133_v24  ;;  %v3413_v1 = vadd.f32 %v3361_v20, %v3285_v42  ;;  %v3420_v43 = vadd.f32 %v3382_v19, %v3292_v22  ;;  %v3745_v58 = vpop.f32.mrb[34].mxu1  ;;  %6284 = vperm.xlu1 %7009, %v7165_v63   ;;  %v5800_v63 = vld [vmem:[#allocation4 + $0x38] sm:$0xff]  ;;  %v3261_v24 = vld [vmem:[#allocation3 + $0xe8] sm:$0xff] }
 0x311   :  { %7176 = vrcp.f32 %v6136_v15  ;;  %6279 = vperm.xlu0 %7008, %v7167_v53   ;;  %v6020_v35 = vadd.f32 %v5988_v8, %v3745_v58  ;;  %v6857_v21 = vpop.f32.mrb[35].mxu1  ;;  %v7169_v52 = vpop.eup %7168  ;;  %v5991_v15 = vmul.f32 %v8562_v17, %v5799_v14  ;;  %v5802_v58 = vld [vmem:[#allocation4 + $0x48] sm:$0xff]  ;;  %v3293_v23 = vmul.f32 %v8273_v31, %v3261_v24  ;;  %v5803_v31 = vld [vmem:[#allocation4 + $0x50] sm:$0xff] }
 0x312   :  { %3446 = vst.msk [vmem:[#allocation3 + $0xa8] sm:$0xff] %vm60_vm2, %v3413_v1  ;;  %3453 = vst.msk [vmem:[#allocation3 + $0xe0] sm:$0xff] %vm60_vm2, %v3420_v43  ;;  %7178 = vrcp.f32 %v6138_v44  ;;  %v5992_v1 = vmul.f32 %v8535_v60, %v5800_v63  ;;  %v5801_v44 = vld [vmem:[#allocation4 + $0x40] sm:$0xff]  ;;  %v5995_v14 = vmul.f32 %v8575_v49, %v5803_v31  ;;  %v5807_v24 = vld [vmem:[#allocation4 + $0x70] sm:$0xff] }
 0x313   :  { %6052 = vst.msk [vmem:[#allocation4 + $0x18] sm:$0xff] %vm125_vm0, %v6020_v35  ;;  %v3818_v61 = vpop.f32.mrb[36].mxu0 }
 0x314   :  { %v6135_v33 = vld [vmem:[#allocation3 + $0x98] sm:$0xff]  ;;  %v3367_v4 = vpop.xlane.xlu1 %3366  ;;  %v3388_v11 = vpop.xlane.xlu0 %3387  ;;  %v6021_v26 = vadd.f32 %v5989_v46, %v3818_v61  ;;  %6294 = vperm.xlu1 %7009, %v7169_v52   ;;  %v6142_v42 = vld [vmem:[#allocation3 + $0xd0] sm:$0xff] }
 0x315   :  { %v7171_v28 = vpop.eup %7170  ;;  %7180 = vrcp.f32 %v6135_v33  ;;  %v3415_v48 = vadd.f32 %v3367_v4, %v3287_v13  ;;  %v3422_v6 = vadd.f32 %v3388_v11, %v3294_v16  ;;  %v6862_v34 = vpop.f32.mrb[37].mxu0  ;;  %v3263_v46 = vld [vmem:[#allocation3 + $0xf8] sm:$0xff]  ;;  %v5994_v13 = vmul.f32 %v8550_v45, %v5802_v58 }
 0x316   :  { %6289 = vperm.xlu0 %7008, %v7171_v28   ;;  %6053 = vst.msk [vmem:[#allocation4 + $0x20] sm:$0xff] %vm125_vm0, %v6021_v26  ;;  %v7173_v32 = vpop.eup %7172  ;;  %7182 = vrcp.f32 %v6140_v12  ;;  %v5993_v16 = vmul.f32 %v8568_v7, %v5801_v44  ;;  %v5804_v11 = vld [vmem:[#allocation4 + $0x58] sm:$0xff]  ;;  %v3295_v40 = vmul.f32 %v8572_v29, %v3263_v46  ;;  %v5810_v44 = vld [vmem:[#allocation4 + $0x88] sm:$0xff] }
 0x317   :  { %3448 = vst.msk [vmem:[#allocation3 + $0xb8] sm:$0xff] %vm60_vm2, %v3415_v48  ;;  %3455 = vst.msk [vmem:[#allocation3 + $0xf0] sm:$0xff] %vm60_vm2, %v3422_v6  ;;  %v3891_v37 = vpop.f32.mrb[36].mxu1 }
 0x318   :  { %v3373_v36 = vpop.xlane.xlu1 %3372  ;;  %v6022_v18 = vadd.f32 %v5990_v38, %v3891_v37  ;;  %v6867_v2 = vpop.f32.mrb[37].mxu1  ;;  %6304 = vperm.xlu1 %7009, %v7173_v32   ;;  %v5996_v32 = vmul.f32 %v8560_v5, %v5804_v11 }
 0x319   :  { %v6137_v39 = vld [vmem:[#allocation3 + $0xa8] sm:$0xff]  ;;  %v3417_v59 = vadd.f32 %v3373_v36, %v3289_v27  ;;  %v6144_v43 = vld [vmem:[#allocation3 + $0xe0] sm:$0xff] }
 0x31a   :  { %v7175_v47 = vpop.eup %7174  ;;  %7184 = vrcp.f32 %v6137_v39  ;;  %6054 = vst.msk [vmem:[#allocation4 + $0x28] sm:$0xff] %vm125_vm0, %v6022_v18  ;;  %v5805_v18 = vld [vmem:[#allocation4 + $0x60] sm:$0xff] }
 0x31b   :  { %v7177_v22 = vpop.eup %7176  ;;  %3450 = vst.msk [vmem:[#allocation3 + $0xc8] sm:$0xff] %vm60_vm2, %v3417_v59  ;;  %6299 = vperm.xlu0 %7008, %v7175_v47   ;;  %v3964_v8 = vpop.f32.mrb[38].mxu0  ;;  %7186 = vrcp.f32 %v6142_v42  ;;  %v5998_v42 = vmul.f32 %v8565_v3, %v5806_v54 }
 0x31c   :  { %v3379_v51 = vpop.xlane.xlu1 %3378  ;;  %v6023_v20 = vadd.f32 %v5991_v15, %v3964_v8  ;;  %6314 = vperm.xlu1 %7009, %v7177_v22   ;;  %v6872_v53 = vpop.f32.mrb[39].mxu0  ;;  %v5997_v22 = vmul.f32 %v8579_v0, %v5805_v18  ;;  %v5999_v0 = vmul.f32 %v8583_v41, %v5807_v24  ;;  %v5816_v18 = vld [vmem:[#allocation4 + $0xb8] sm:$0xff] }
 0x31d   :  { %v3419_v19 = vadd.f32 %v3379_v51, %v3291_v57  ;;  %v7179_v17 = vpop.eup %7178  ;;  %v5808_v51 = vld [vmem:[#allocation4 + $0x78] sm:$0xff] }
 0x31e   :  { %v6139_v50 = vld [vmem:[#allocation3 + $0xb8] sm:$0xff]  ;;  %6055 = vst.msk [vmem:[#allocation4 + $0x30] sm:$0xff] %vm125_vm0, %v6023_v20  ;;  %v6146_v61 = vld [vmem:[#allocation3 + $0xf0] sm:$0xff]  ;;  %v6000_v3 = vmul.f32 %v8570_v9, %v5808_v51  ;;  %v6002_v9 = vmul.f32 %v8577_v25, %v5810_v44  ;;  %v5817_v51 = vld [vmem:[#allocation4 + $0xc0] sm:$0xff] }
 0x31f   :  { %v7181_v55 = vpop.eup %7180  ;;  %7188 = vrcp.f32 %v6139_v50  ;;  %3452 = vst.msk [vmem:[#allocation3 + $0xd8] sm:$0xff] %vm60_vm2, %v3419_v19  ;;  %v4037_v35 = vpop.f32.mrb[38].mxu1 }
 0x320   :  { %v3385_v21 = vpop.xlane.xlu1 %3384  ;;  %6309 = vperm.xlu0 %7008, %v7181_v55   ;;  %v6024_v52 = vadd.f32 %v5992_v1, %v4037_v35  ;;  %v6877_v10 = vpop.f32.mrb[39].mxu1  ;;  %6324 = vperm.xlu1 %7009, %v7179_v17   ;;  %7190 = vrcp.f32 %v6144_v43 }
 0x321   :  { %v3421_v60 = vadd.f32 %v3385_v21, %v3293_v23  ;;  %v7183_v4 = vpop.eup %7182  ;;  %v5809_v23 = vld [vmem:[#allocation4 + $0x80] sm:$0xff] }
 0x322   :  { %v6141_v33 = vld [vmem:[#allocation3 + $0xc8] sm:$0xff]  ;;  %6056 = vst.msk [vmem:[#allocation4 + $0x38] sm:$0xff] %vm125_vm0, %v6024_v52  ;;  %v6001_v41 = vmul.f32 %v8587_v62, %v5809_v23 }
 0x323   :  { %7192 = vrcp.f32 %v6141_v33  ;;  %3454 = vst.msk [vmem:[#allocation3 + $0xe8] sm:$0xff] %vm60_vm2, %v3421_v60  ;;  %v4110_v26 = vpop.f32.mrb[40].mxu0  ;;  %v4183_v28 = vpop.f32.mrb[40].mxu1 }
 0x324   :  { %v7185_v48 = vpop.eup %7184  ;;  %v3391_v6 = vpop.xlane.xlu1 %3390  ;;  %v6025_v34 = vadd.f32 %v5993_v16, %v4110_v26  ;;  %v6026_v45 = vadd.f32 %v5994_v13, %v4183_v28  ;;  %6334 = vperm.xlu1 %7009, %v7183_v4   ;;  %7194 = vrcp.f32 %v6146_v61  ;;  %v5812_v16 = vld [vmem:[#allocation4 + $0x98] sm:$0xff]  ;;  %v5811_v61 = vld [vmem:[#allocation4 + $0x90] sm:$0xff]  ;;  %v8919_v26 = vld [vmem:[#allocation47_spill] sm:$0xff] }
 0x325   :  { %v6882_v38 = vpop.f32.mrb[41].mxu0  ;;  %v3423_v7 = vadd.f32 %v3391_v6, %v3295_v40  ;;  %6319 = vperm.xlu0 %7008, %v7185_v48   ;;  %v6887_v12 = vpop.f32.mrb[41].mxu1  ;;  %v6004_v28 = vmul.f32 %v8919_v26, %v5812_v16  ;;  %v8920_v48 = vld [vmem:[#allocation16_spill] sm:$0xff] }
 0x326   :  { %v6143_v27 = vld [vmem:[#allocation3 + $0xd8] sm:$0xff]  ;;  %6057 = vst.msk [vmem:[#allocation4 + $0x40] sm:$0xff] %vm125_vm0, %v6025_v34  ;;  %6058 = vst.msk [vmem:[#allocation4 + $0x48] sm:$0xff] %vm125_vm0, %v6026_v45  ;;  %v7187_v29 = vpop.eup %7186  ;;  %v6003_v25 = vmul.f32 %v8920_v48, %v5811_v61  ;;  %v5814_v34 = vld [vmem:[#allocation4 + $0xa8] sm:$0xff] }
 0x327   :  { %7196 = vrcp.f32 %v6143_v27  ;;  %3456 = vst.msk [vmem:[#allocation3 + $0xf8] sm:$0xff] %vm60_vm2, %v3423_v7  ;;  %v4256_v37 = vpop.f32.mrb[42].mxu0  ;;  %v4329_v36 = vpop.f32.mrb[42].mxu1  ;;  %v5813_v45 = vld [vmem:[#allocation4 + $0xa0] sm:$0xff] }
 0x328   :  { %v6027_v2 = vadd.f32 %v5995_v14, %v4256_v37  ;;  %v6028_v39 = vadd.f32 %v5996_v32, %v4329_v36  ;;  %v6892_v59 = vpop.f32.mrb[43].mxu0  ;;  %v6897_v47 = vpop.f32.mrb[43].mxu1  ;;  %6344 = vperm.xlu1 %7009, %v7187_v29   ;;  %v8921_v14 = vld [vmem:[#allocation48_spill] sm:$0xff]  ;;  %v8922_v29 = vld [vmem:[#allocation18_spill] sm:$0xff] }
 0x329   :  { %v7189_v5 = vpop.eup %7188  ;;  %v6006_v27 = vmul.f32 %v8921_v14, %v5814_v34  ;;  %v6005_v37 = vmul.f32 %v8922_v29, %v5813_v45 }
 0x32a   :  { %v6145_v49 = vld [vmem:[#allocation3 + $0xe8] sm:$0xff]  ;;  %6329 = vperm.xlu0 %7008, %v7189_v5   ;;  %6059 = vst.msk [vmem:[#allocation4 + $0x50] sm:$0xff] %vm125_vm0, %v6027_v2  ;;  %6060 = vst.msk [vmem:[#allocation4 + $0x58] sm:$0xff] %vm125_vm0, %v6028_v39  ;;  %v7191_v15 = vpop.eup %7190  ;;  %v5815_v2 = vld [vmem:[#allocation4 + $0xb0] sm:$0xff] }
 0x32b   :  { %7198 = vrcp.f32 %v6145_v49  ;;  %v8923_v49 = vld [vmem:[#allocation15_spill] sm:$0xff] }
 0x32c   :  { %v4402_v63 = vpop.f32.mrb[44].mxu0  ;;  %v4475_v57 = vpop.f32.mrb[44].mxu1  ;;  %6354 = vperm.xlu1 %7009, %v7191_v15   ;;  %v6008_v15 = vmul.f32 %v8923_v49, %v5816_v18  ;;  %v6182_v49 = vld [vmem:[#allocation4 + $0x10] sm:$0xff] }
 0x32d   :  { %v7193_v8 = vpop.eup %7192  ;;  %v6029_v20 = vadd.f32 %v5997_v22, %v4402_v63  ;;  %v6030_v19 = vadd.f32 %v5998_v42, %v4475_v57  ;;  %v6902_v53 = vpop.f32.mrb[45].mxu0  ;;  %v8924_v42 = vld [vmem:[#allocation20_spill] sm:$0xff] }
 0x32e   :  { %v6907_v17 = vpop.f32.mrb[45].mxu1  ;;  %v6147_v1 = vld [vmem:[#allocation3 + $0xf8] sm:$0xff]  ;;  %6339 = vperm.xlu0 %7008, %v7193_v8   ;;  %v7195_v43 = vpop.eup %7194  ;;  %v6007_v22 = vmul.f32 %v8924_v42, %v5815_v2  ;;  %v5818_v8 = vld [vmem:[#allocation4 + $0xc8] sm:$0xff] }
 0x32f   :  { %7200 = vrcp.f32 %v6147_v1  ;;  %6061 = vst.msk [vmem:[#allocation4 + $0x60] sm:$0xff] %vm125_vm0, %v6029_v20  ;;  %6062 = vst.msk [vmem:[#allocation4 + $0x68] sm:$0xff] %vm125_vm0, %v6030_v19  ;;  %v8925_v17 = vld [vmem:[#allocation17_spill] sm:$0xff] }
 0x330   :  { %6364 = vperm.xlu1 %7009, %v7195_v43   ;;  %v6010_v1 = vmul.f32 %v8925_v17, %v5818_v8  ;;  %v8926_v43 = vld [vmem:[#allocation24_spill] sm:$0xff] }
 0x331   :  { %v7197_v50 = vpop.eup %7196  ;;  %v4548_v55 = vpop.f32.mrb[46].mxu0  ;;  %v6185_v8 = vld [vmem:[#allocation4 + $0x28] sm:$0xff] }
 0x332   :  { %v4621_v58 = vpop.f32.mrb[46].mxu1  ;;  %6349 = vperm.xlu0 %7008, %v7197_v50   ;;  %v6031_v35 = vadd.f32 %v5999_v0, %v4548_v55  ;;  %v6912_v46 = vpop.f32.mrb[47].mxu0  ;;  %v5820_v55 = vld [vmem:[#allocation4 + $0xd8] sm:$0xff] }
 0x333   :  { %v6032_v21 = vadd.f32 %v6000_v3, %v4621_v58  ;;  %v6917_v52 = vpop.f32.mrb[47].mxu1  ;;  %v6009_v3 = vmul.f32 %v8926_v43, %v5817_v51  ;;  %v5819_v58 = vld [vmem:[#allocation4 + $0xd0] sm:$0xff]  ;;  %v8927_v46 = vld [vmem:[#allocation19_spill] sm:$0xff] }
 0x334   :  { %6063 = vst.msk [vmem:[#allocation4 + $0x70] sm:$0xff] %vm125_vm0, %v6031_v35  ;;  %v6012_v52 = vmul.f32 %v8927_v46, %v5820_v55 }
 0x335   :  { %6064 = vst.msk [vmem:[#allocation4 + $0x78] sm:$0xff] %vm125_vm0, %v6032_v21  ;;  %v7199_v10 = vpop.eup %7198 }
 0x336   :  { %6359 = vperm.xlu0 %7008, %v7199_v10   ;;  %v4694_v60 = vpop.f32.mrb[48].mxu0  ;;  %v4767_v13 = vpop.f32.mrb[48].mxu1  ;;  %v6011_v10 = vmul.f32 %v8608_v56, %v5819_v58  ;;  %v5823_v56 = vld [vmem:[#allocation4 + $0xf0] sm:$0xff]  ;;  %v6189_v58 = vld [vmem:[#allocation4 + $0x48] sm:$0xff] }
 0x337   :  { %v6033_v33 = vadd.f32 %v6001_v41, %v4694_v60  ;;  %v6034_v4 = vadd.f32 %v6002_v9, %v4767_v13  ;;  %v6922_v11 = vpop.f32.mrb[49].mxu0  ;;  %v6927_v31 = vpop.f32.mrb[49].mxu1  ;;  %v5822_v60 = vld [vmem:[#allocation4 + $0xe8] sm:$0xff]  ;;  %v5821_v13 = vld [vmem:[#allocation4 + $0xe0] sm:$0xff] }
 0x338   :  { %v8928_v11 = vld [vmem:[#allocation21_spill] sm:$0xff] }
 0x339   :  { %v7201_v40 = vpop.eup %7200  ;;  %6065 = vst.msk [vmem:[#allocation4 + $0x80] sm:$0xff] %vm125_vm0, %v6033_v33  ;;  %6066 = vst.msk [vmem:[#allocation4 + $0x88] sm:$0xff] %vm125_vm0, %v6034_v4  ;;  %v6014_v31 = vmul.f32 %v8928_v11, %v5822_v60 }
 0x33a   :  { %6369 = vperm.xlu0 %7008, %v7201_v40   ;;  %v8929_v40 = vld [vmem:[#allocation22_spill] sm:$0xff] }
 0x33b   :  { %v4840_v62 = vpop.f32.mrb[50].mxu0  ;;  %v4913_v6 = vpop.f32.mrb[50].mxu1  ;;  %v6013_v26 = vmul.f32 %v8929_v40, %v5821_v13 }
 0x33c   :  { %v6035_v38 = vadd.f32 %v6003_v25, %v4840_v62  ;;  %v6036_v7 = vadd.f32 %v6004_v28, %v4913_v6  ;;  %v6932_v12 = vpop.f32.mrb[51].mxu0  ;;  %v6937_v32 = vpop.f32.mrb[51].mxu1  ;;  %v5824_v62 = vld [vmem:[#allocation4 + $0xf8] sm:$0xff] }
 0x33d   :  { %v5983_v28 = vpop.permute.xlu0 %5982 }
 0x33e   :  { %6067 = vst.msk [vmem:[#allocation4 + $0x90] sm:$0xff] %vm125_vm0, %v6035_v38  ;;  %6068 = vst.msk [vmem:[#allocation4 + $0x98] sm:$0xff] %vm125_vm0, %v6036_v7  ;;  %v6015_v7 = vmul.f32 %v8617_v30, %v5823_v56  ;;  %v6016_v12 = vmul.f32 %v5983_v28, %v5824_v62  ;;  %v6183_v30 = vld [vmem:[#allocation4 + $0x18] sm:$0xff] }
 0x340   :  { %v4986_v36 = vpop.f32.mrb[52].mxu0  ;;  %v5059_v54 = vpop.f32.mrb[52].mxu1  ;;  %v6196_v40 = vld [vmem:[#allocation4 + $0x80] sm:$0xff] }
 0x341   :  { %v6037_v39 = vadd.f32 %v6005_v37, %v4986_v36  ;;  %v6038_v59 = vadd.f32 %v6006_v27, %v5059_v54  ;;  %v6942_v47 = vpop.f32.mrb[53].mxu0  ;;  %v6947_v5 = vpop.f32.mrb[53].mxu1  ;;  %v6181_v54 = vld [vmem:[#allocation4 + $0x8] sm:$0xff] }
 0x343   :  { %6069 = vst.msk [vmem:[#allocation4 + $0xa0] sm:$0xff] %vm125_vm0, %v6037_v39  ;;  %6070 = vst.msk [vmem:[#allocation4 + $0xa8] sm:$0xff] %vm125_vm0, %v6038_v59  ;;  %v6180_v39 = vld [vmem:[#allocation4] sm:$0xff] }
 0x345   :  { %v5132_v63 = vpop.f32.mrb[54].mxu0  ;;  %v5205_v57 = vpop.f32.mrb[54].mxu1  ;;  %v6198_v62 = vld [vmem:[#allocation4 + $0x90] sm:$0xff] }
 0x346   :  { %v6039_v24 = vadd.f32 %v6007_v22, %v5132_v63  ;;  %v6040_v20 = vadd.f32 %v6008_v15, %v5205_v57  ;;  %v6952_v19 = vpop.f32.mrb[55].mxu0  ;;  %v6957_v53 = vpop.f32.mrb[55].mxu1  ;;  %v6184_v63 = vld [vmem:[#allocation4 + $0x20] sm:$0xff] }
 0x347   :  { %v6186_v19 = vld [vmem:[#allocation4 + $0x30] sm:$0xff] }
 0x348   :  { %6071 = vst.msk [vmem:[#allocation4 + $0xb0] sm:$0xff] %vm125_vm0, %v6039_v24  ;;  %6072 = vst.msk [vmem:[#allocation4 + $0xb8] sm:$0xff] %vm125_vm0, %v6040_v20 }
 0x34a   :  { %v5278_v0 = vpop.f32.mrb[56].mxu0  ;;  %v5351_v50 = vpop.f32.mrb[56].mxu1 }
 0x34b   :  { %v6041_v44 = vadd.f32 %v6009_v3, %v5278_v0  ;;  %v6042_v23 = vadd.f32 %v6010_v1, %v5351_v50  ;;  %v6962_v35 = vpop.f32.mrb[57].mxu0  ;;  %v6967_v21 = vpop.f32.mrb[57].mxu1  ;;  %v6187_v1 = vld [vmem:[#allocation4 + $0x38] sm:$0xff]  ;;  %v6188_v0 = vld [vmem:[#allocation4 + $0x40] sm:$0xff] }
 0x34c   :  { %v6190_v35 = vld [vmem:[#allocation4 + $0x50] sm:$0xff] }
 0x34d   :  { %6073 = vst.msk [vmem:[#allocation4 + $0xc0] sm:$0xff] %vm125_vm0, %v6041_v44  ;;  %6074 = vst.msk [vmem:[#allocation4 + $0xc8] sm:$0xff] %vm125_vm0, %v6042_v23 }
 0x34f   :  { %v5424_v9 = vpop.f32.mrb[58].mxu0  ;;  %v5497_v41 = vpop.f32.mrb[58].mxu1 }
 0x350   :  { %v6043_v16 = vadd.f32 %v6011_v10, %v5424_v9  ;;  %v6044_v61 = vadd.f32 %v6012_v52, %v5497_v41  ;;  %v6972_v33 = vpop.f32.mrb[59].mxu0  ;;  %v6977_v4 = vpop.f32.mrb[59].mxu1  ;;  %v6191_v52 = vld [vmem:[#allocation4 + $0x58] sm:$0xff]  ;;  %v6192_v9 = vld [vmem:[#allocation4 + $0x60] sm:$0xff] }
 0x351   :  { %v6193_v33 = vld [vmem:[#allocation4 + $0x68] sm:$0xff] }
 0x352   :  { %6075 = vst.msk [vmem:[#allocation4 + $0xd0] sm:$0xff] %vm125_vm0, %v6043_v16  ;;  %6076 = vst.msk [vmem:[#allocation4 + $0xd8] sm:$0xff] %vm125_vm0, %v6044_v61  ;;  %v6194_v16 = vld [vmem:[#allocation4 + $0x70] sm:$0xff] }
 0x354   :  { %v5570_v48 = vpop.f32.mrb[60].mxu0  ;;  %v5643_v25 = vpop.f32.mrb[60].mxu1 }
 0x355   :  { %v6045_v6 = vadd.f32 %v6013_v26, %v5570_v48  ;;  %v6046_v34 = vadd.f32 %v6014_v31, %v5643_v25  ;;  %v6982_v45 = vpop.f32.mrb[61].mxu0  ;;  %v6987_v38 = vpop.f32.mrb[61].mxu1  ;;  %v6195_v48 = vld [vmem:[#allocation4 + $0x78] sm:$0xff] }
 0x356   :  { %v6197_v45 = vld [vmem:[#allocation4 + $0x88] sm:$0xff] }
 0x357   :  { %6077 = vst.msk [vmem:[#allocation4 + $0xe0] sm:$0xff] %vm125_vm0, %v6045_v6  ;;  %6078 = vst.msk [vmem:[#allocation4 + $0xe8] sm:$0xff] %vm125_vm0, %v6046_v34 }
 0x359   :  { %v5716_v32 = vpop.f32.mrb[62].mxu0  ;;  %v5789_v14 = vpop.f32.mrb[62].mxu1 }
 0x35a   :  { %v6047_v27 = vadd.f32 %v6015_v7, %v5716_v32  ;;  %v6048_v29 = vadd.f32 %v6016_v12, %v5789_v14  ;;  %v6992_v37 = vpop.f32.mrb[63].mxu0  ;;  %v6997_v36 = vpop.f32.mrb[63].mxu1  ;;  %v6200_v12 = vld [vmem:[#allocation4 + $0xa0] sm:$0xff] }
 0x35b   :  { %v6202_v37 = vld [vmem:[#allocation4 + $0xb0] sm:$0xff] }
 0x35c   :  { %6079 = vst.msk [vmem:[#allocation4 + $0xf0] sm:$0xff] %vm125_vm0, %v6047_v27  ;;  %6080 = vst.msk [vmem:[#allocation4 + $0xf8] sm:$0xff] %vm125_vm0, %v6048_v29  ;;  %v6199_v27 = vld [vmem:[#allocation4 + $0x98] sm:$0xff] }
 0x35e   :  { %v6220_v18 = vpop.permute.xlu0 %6219 }
 0x35f   :  { %v6373_v2 = vmul.f32 %v6220_v18, %v6181_v54 }
 0x361   :  { %6405 = vst.msk [vmem:[#allocation11 + $0x8] sm:$0xff] %vm125_vm0, %v6373_v2  ;;  %v6204_v2 = vld [vmem:[#allocation4 + $0xc0] sm:$0xff] }
 0x373   :  { %v6215_v59 = vpop.permute.xlu1 %6214 }
 0x374   :  { %v6372_v47 = vmul.f32 %v6215_v59, %v6180_v39  ;;  %v6201_v59 = vld [vmem:[#allocation4 + $0xa8] sm:$0xff] }
 0x376   :  { %6404 = vst.msk [vmem:[#allocation11] sm:$0xff] %vm125_vm0, %v6372_v47 }
 0x377   :  { %v6230_v5 = vpop.permute.xlu0 %6229  ;;  %v6225_v15 = vpop.permute.xlu1 %6224 }
 0x378   :  { %v6375_v42 = vmul.f32 %v6230_v5, %v6183_v30  ;;  %v6374_v22 = vmul.f32 %v6225_v15, %v6182_v49  ;;  %v6206_v49 = vld [vmem:[#allocation4 + $0xd0] sm:$0xff] }
 0x37a   :  { %6407 = vst.msk [vmem:[#allocation11 + $0x18] sm:$0xff] %vm125_vm0, %v6375_v42  ;;  %6406 = vst.msk [vmem:[#allocation11 + $0x10] sm:$0xff] %vm125_vm0, %v6374_v22  ;;  %v6203_v22 = vld [vmem:[#allocation4 + $0xb8] sm:$0xff] }
 0x37b   :  { %v6235_v57 = vpop.permute.xlu1 %6234 }
 0x37c   :  { %v6240_v51 = vpop.permute.xlu0 %6239  ;;  %v6376_v24 = vmul.f32 %v6235_v57, %v6184_v63 }
 0x37d   :  { %v6377_v20 = vmul.f32 %v6240_v51, %v6185_v8  ;;  %v6208_v8 = vld [vmem:[#allocation4 + $0xe0] sm:$0xff] }
 0x37e   :  { %6408 = vst.msk [vmem:[#allocation11 + $0x20] sm:$0xff] %vm125_vm0, %v6376_v24 }
 0x37f   :  { %6409 = vst.msk [vmem:[#allocation11 + $0x28] sm:$0xff] %vm125_vm0, %v6377_v20  ;;  %v6245_v53 = vpop.permute.xlu1 %6244  ;;  %v6205_v20 = vld [vmem:[#allocation4 + $0xc8] sm:$0xff] }
 0x380   :  { %v6378_v17 = vmul.f32 %v6245_v53, %v6186_v19 }
 0x381   :  { %v6250_v43 = vpop.permute.xlu0 %6249 }
 0x382   :  { %v6379_v3 = vmul.f32 %v6250_v43, %v6187_v1  ;;  %6410 = vst.msk [vmem:[#allocation11 + $0x30] sm:$0xff] %vm125_vm0, %v6378_v17  ;;  %v6210_v17 = vld [vmem:[#allocation4 + $0xf0] sm:$0xff] }
 0x383   :  { %v6255_v50 = vpop.permute.xlu1 %6254 }
 0x384   :  { %6411 = vst.msk [vmem:[#allocation11 + $0x38] sm:$0xff] %vm125_vm0, %v6379_v3  ;;  %v6380_v55 = vmul.f32 %v6255_v50, %v6188_v0  ;;  %v6207_v3 = vld [vmem:[#allocation4 + $0xd8] sm:$0xff] }
 0x386   :  { %v6260_v44 = vpop.permute.xlu0 %6259  ;;  %6412 = vst.msk [vmem:[#allocation11 + $0x40] sm:$0xff] %vm125_vm0, %v6380_v55  ;;  %v6209_v55 = vld [vmem:[#allocation4 + $0xe8] sm:$0xff] }
 0x387   :  { %v6381_v23 = vmul.f32 %v6260_v44, %v6189_v58  ;;  %v6265_v21 = vpop.permute.xlu1 %6264 }
 0x388   :  { %v6382_v46 = vmul.f32 %v6265_v21, %v6190_v35 }
 0x389   :  { %6413 = vst.msk [vmem:[#allocation11 + $0x48] sm:$0xff] %vm125_vm0, %v6381_v23  ;;  %v6211_v23 = vld [vmem:[#allocation4 + $0xf8] sm:$0xff] }
 0x38a   :  { %6414 = vst.msk [vmem:[#allocation11 + $0x50] sm:$0xff] %vm125_vm0, %v6382_v46 }
 0x38b   :  { %v6270_v10 = vpop.permute.xlu0 %6269  ;;  %v6275_v41 = vpop.permute.xlu1 %6274 }
 0x38c   :  { %v6383_v60 = vmul.f32 %v6270_v10, %v6191_v52  ;;  %v6384_v13 = vmul.f32 %v6275_v41, %v6192_v9 }
 0x38e   :  { %6415 = vst.msk [vmem:[#allocation11 + $0x58] sm:$0xff] %vm125_vm0, %v6383_v60  ;;  %6416 = vst.msk [vmem:[#allocation11 + $0x60] sm:$0xff] %vm125_vm0, %v6384_v13 }
 0x38f   :  { %v6285_v61 = vpop.permute.xlu1 %6284 }
 0x390   :  { %v6280_v4 = vpop.permute.xlu0 %6279  ;;  %v6386_v11 = vmul.f32 %v6285_v61, %v6194_v16 }
 0x391   :  { %v6385_v31 = vmul.f32 %v6280_v4, %v6193_v33 }
 0x392   :  { %6418 = vst.msk [vmem:[#allocation11 + $0x70] sm:$0xff] %vm125_vm0, %v6386_v11 }
 0x393   :  { %6417 = vst.msk [vmem:[#allocation11 + $0x68] sm:$0xff] %vm125_vm0, %v6385_v31  ;;  %v6295_v26 = vpop.permute.xlu1 %6294 }
 0x394   :  { %v6388_v28 = vmul.f32 %v6295_v26, %v6196_v40 }
 0x395   :  { %v6290_v25 = vpop.permute.xlu0 %6289 }
 0x396   :  { %v6387_v56 = vmul.f32 %v6290_v25, %v6195_v48  ;;  %6420 = vst.msk [vmem:[#allocation11 + $0x80] sm:$0xff] %vm125_vm0, %v6388_v28 }
 0x397   :  { %v6305_v6 = vpop.permute.xlu1 %6304 }
 0x398   :  { %6419 = vst.msk [vmem:[#allocation11 + $0x78] sm:$0xff] %vm125_vm0, %v6387_v56  ;;  %v6390_v34 = vmul.f32 %v6305_v6, %v6198_v62 }
 0x39a   :  { %v6300_v38 = vpop.permute.xlu0 %6299  ;;  %6422 = vst.msk [vmem:[#allocation11 + $0x90] sm:$0xff] %vm125_vm0, %v6390_v34 }
 0x39b   :  { %v6389_v7 = vmul.f32 %v6300_v38, %v6197_v45  ;;  %v6315_v32 = vpop.permute.xlu1 %6314 }
 0x39c   :  { %v6392_v14 = vmul.f32 %v6315_v32, %v6200_v12 }
 0x39d   :  { %6421 = vst.msk [vmem:[#allocation11 + $0x88] sm:$0xff] %vm125_vm0, %v6389_v7 }
 0x39e   :  { %6424 = vst.msk [vmem:[#allocation11 + $0xa0] sm:$0xff] %vm125_vm0, %v6392_v14 }
 0x39f   :  { %v6310_v29 = vpop.permute.xlu0 %6309  ;;  %v6325_v36 = vpop.permute.xlu1 %6324 }
 0x3a0   :  { %v6391_v54 = vmul.f32 %v6310_v29, %v6199_v27  ;;  %v6394_v18 = vmul.f32 %v6325_v36, %v6202_v37 }
 0x3a2   :  { %6423 = vst.msk [vmem:[#allocation11 + $0x98] sm:$0xff] %vm125_vm0, %v6391_v54  ;;  %6426 = vst.msk [vmem:[#allocation11 + $0xb0] sm:$0xff] %vm125_vm0, %v6394_v18 }
 0x3a3   :  { %v6335_v39 = vpop.permute.xlu1 %6334 }
 0x3a4   :  { %v6320_v47 = vpop.permute.xlu0 %6319  ;;  %v6396_v30 = vmul.f32 %v6335_v39, %v6204_v2 }
 0x3a5   :  { %v6393_v5 = vmul.f32 %v6320_v47, %v6201_v59 }
 0x3a6   :  { %6428 = vst.msk [vmem:[#allocation11 + $0xc0] sm:$0xff] %vm125_vm0, %v6396_v30 }
 0x3a7   :  { %6425 = vst.msk [vmem:[#allocation11 + $0xa8] sm:$0xff] %vm125_vm0, %v6393_v5  ;;  %v6345_v15 = vpop.permute.xlu1 %6344 }
 0x3a8   :  { %v6398_v42 = vmul.f32 %v6345_v15, %v6206_v49 }
 0x3a9   :  { %v6330_v63 = vpop.permute.xlu0 %6329 }
 0x3aa   :  { %v6395_v57 = vmul.f32 %v6330_v63, %v6203_v22  ;;  %6430 = vst.msk [vmem:[#allocation11 + $0xd0] sm:$0xff] %vm125_vm0, %v6398_v42 }
 0x3ab   :  { %v6355_v51 = vpop.permute.xlu1 %6354 }
 0x3ac   :  { %6427 = vst.msk [vmem:[#allocation11 + $0xb8] sm:$0xff] %vm125_vm0, %v6395_v57  ;;  %v6400_v24 = vmul.f32 %v6355_v51, %v6208_v8 }
 0x3ad   :  { %v6340_v19 = vpop.permute.xlu0 %6339 }
 0x3ae   :  { %v6397_v53 = vmul.f32 %v6340_v19, %v6205_v20  ;;  %6432 = vst.msk [vmem:[#allocation11 + $0xe0] sm:$0xff] %vm125_vm0, %v6400_v24 }
 0x3af   :  { %v6365_v1 = vpop.permute.xlu1 %6364 }
 0x3b0   :  { %6429 = vst.msk [vmem:[#allocation11 + $0xc8] sm:$0xff] %vm125_vm0, %v6397_v53  ;;  %v6402_v43 = vmul.f32 %v6365_v1, %v6210_v17 }
 0x3b1   :  { %v6350_v0 = vpop.permute.xlu0 %6349 }
 0x3b2   :  { %v6399_v50 = vmul.f32 %v6350_v0, %v6207_v3  ;;  %6434 = vst.msk [vmem:[#allocation11 + $0xf0] sm:$0xff] %vm125_vm0, %v6402_v43 }
 0x3b4   :  { %6431 = vst.msk [vmem:[#allocation11 + $0xd8] sm:$0xff] %vm125_vm0, %v6399_v50 }
 0x3b5   :  { %v6360_v58 = vpop.permute.xlu0 %6359 }
 0x3b6   :  { %v6401_v44 = vmul.f32 %v6360_v58, %v6209_v55 }
 0x3b8   :  { %6433 = vst.msk [vmem:[#allocation11 + $0xe8] sm:$0xff] %vm125_vm0, %v6401_v44 }
 0x3b9   :  { %v6370_v35 = vpop.permute.xlu0 %6369 }
 0x3ba   :  { %v6403_v21 = vmul.f32 %v6370_v35, %v6211_v23 }
 0x3bc   :  { %6435 = vst.msk [vmem:[#allocation11 + $0xf8] sm:$0xff] %vm125_vm0, %v6403_v21 }
 0x3bd   :  { %7279 = shalt.err (!%p7276_p0)
}
 0x3be   :  { %s7280_s27 = scalar_lea.hbm %s8788_s3, 4096 }
 0x3bf   :  { %p7281_p1 = scmp.ne.s32.totalorder %s8788_s3, %s7280_s27  ;;  %p7284_p2 = scmp.lt.u32.totalorder %s7280_s27, %s8788_s3 }
 0x3c1   :  { %p7286_p3 = pnand %p7284_p2, %p7281_p1 }
 0x3c3   :  { %7289 = shalt.err (!%p7286_p3)
}
 0x3c4   :  { %6447 = dma.vmem_to_hbm [thread:$0]  %s6442_s21, 4096, %s8788_s3, [#allocation7], %s7298_s24, %s7298_s24, %s7299_s25  }
 0x3c5   :  { %7294 = dma.done.wait [#allocation7], 4096  }
 0x3c6   :  { %7295 = vsyncadd [#allocation7], 4294963200 }
 0x3c7   :  { %6451 = vsyncpa [#allocation6], 1 }
 0x3c8   :  { %6452 = vsyncpa [#allocation9], 1 }
 0x3c9   :  { %6453 = vsyncpa [#allocation7], 1 }

</bundles_post_ra>
